<compile_context>
chip_gen: v7x
topology: tpu7x:2x2x1
jax: 0.10.0
libtpu: 0.0.40
codegen_flags: <defaults>
</compile_context>

<pallas_src>
import functools

import jax
import jax.numpy as jnp
from jax import lax
from jax.experimental import pallas as pl
from jax.experimental.pallas import tpu as pltpu

EPS = 1e-5  # PyTorch nn.LayerNorm default
F32 = jnp.float32
BF16 = jnp.bfloat16


def _layernorm(x, w, b):
    mu = jnp.mean(x, axis=-1, keepdims=True)
    var = jnp.mean((x - mu) ** 2, axis=-1, keepdims=True)
    return (x - mu) * lax.rsqrt(var + EPS) * w + b


def vit_forward_kernel(
        x_ref, cls_ref, pos_ref,
        pre_w_ref, pre_b_ref,
        wqkv_ref, wproj_ref, bproj_ref,
        n1_w_ref, n1_b_ref,
        w1_ref, b1_ref, w2_ref, b2_ref,
        n_w_ref, n_b_ref, fc_w_ref, fc_b_ref,
        out_ref,
        x_scr,
        *, num_heads, f_chunk, approx_recip=True):
    """Grid = (batch_block, layer). Per step: one encoder layer on B_blk rows.

    The flat (B_blk*N, C) activation lives in x_scr across the layer axis; at
    layer 0 it is built from the input tokens (+class token, +sine pos-emb), at
    the last layer the classifier head (LN on class tokens + fc) writes logits.
    """
    layer = pl.program_id(1)
    num_layers = pl.num_programs(1)

    b_blk, _, dim = x_ref.shape
    n_tok = pos_ref.shape[0]                 # = S + 1 (class token)
    m_rows = b_blk * n_tok
    head_dim = dim // num_heads
    scale = head_dim ** (-0.5)

    # ---- layer 0: build token sequence = cat(cls, x) + pos (dropout = id) ----
    @pl.when(layer == 0)
    def _():
        cls_row = cls_ref[...] + pos_ref[0:1, :]          # (1, C)
        pos_body = pos_ref[1:, :]                         # (S, C)
        for b in range(b_blk):                            # static, small
            r0 = b * n_tok
            x_scr[r0:r0 + 1, :] = cls_row
            x_scr[r0 + 1:r0 + n_tok, :] = x_ref[b] + pos_body

    x = x_scr[...]                                        # (M, C) f32 residual stream

    # ---- self-attention: x + proj(softmax(q k^T * scale) v) ----
    xn = _layernorm(x, pre_w_ref[...], pre_b_ref[...])
    qkv = jnp.dot(xn.astype(BF16), wqkv_ref[...],
                  preferred_element_type=F32)             # (M, 3C) single GEMM
    q = (qkv[:, 0 * dim:1 * dim] * scale).astype(BF16)    # fold scale into q
    k = qkv[:, 1 * dim:2 * dim].astype(BF16)
    v = qkv[:, 2 * dim:3 * dim].astype(BF16)

    def split_heads(t):                                   # (N, C) -> (H, N, hd)
        return jnp.stack(
            [t[:, h * head_dim:(h + 1) * head_dim] for h in range(num_heads)],
            axis=0)

    ctx_rows = []
    for b in range(b_blk):                                # static loop over batch rows
        r0 = b * n_tok
        qh = split_heads(q[r0:r0 + n_tok, :])
        kh = split_heads(k[r0:r0 + n_tok, :])
        vh = split_heads(v[r0:r0 + n_tok, :])
        # batched over heads on the MXU, f32 accumulation
        s = jnp.einsum('hnd,hmd->hnm', qh, kh, preferred_element_type=F32)
        s = s - jnp.max(s, axis=-1, keepdims=True)
        e = jnp.exp(s)
        p = e * pl.reciprocal(jnp.sum(e, axis=-1, keepdims=True),
                              approx=approx_recip)
        o = jnp.einsum('hnm,hmd->hnd', p.astype(BF16), vh,
                       preferred_element_type=F32)        # (H, N, hd)
        ctx_rows.append(jnp.concatenate([o[h] for h in range(num_heads)], axis=-1))
    ctx = jnp.concatenate(ctx_rows, axis=0) if b_blk > 1 else ctx_rows[0]  # (M, C)

    attn = jnp.dot(ctx.astype(BF16), wproj_ref[...],
                   preferred_element_type=F32) + bproj_ref[...]

    src = _layernorm(x + attn, n1_w_ref[...], n1_b_ref[...])   # norm1

    # ---- MLP: src + linear2(relu(linear1(src))), hidden dim chunked ----
    src_bf = src.astype(BF16)
    f_total = w1_ref.shape[1]
    if f_chunk >= f_total:
        h1 = jnp.maximum(
            jnp.dot(src_bf, w1_ref[...], preferred_element_type=F32) + b1_ref[...],
            0.0)
        mlp = jnp.dot(h1.astype(BF16), w2_ref[...], preferred_element_type=F32)
    else:
        num_chunks = f_total // f_chunk                   # exact divisor (wrapper)

        def mlp_chunk(c, acc):
            f0 = pl.multiple_of(c * f_chunk, f_chunk)
            h1 = jnp.maximum(
                jnp.dot(src_bf, w1_ref[:, pl.ds(f0, f_chunk)],
                        preferred_element_type=F32)
                + b1_ref[:, pl.ds(f0, f_chunk)],
                0.0)
            return acc + jnp.dot(h1.astype(BF16), w2_ref[pl.ds(f0, f_chunk), :],
                                 preferred_element_type=F32)

        mlp = lax.fori_loop(0, num_chunks, mlp_chunk,
                            jnp.zeros((m_rows, dim), F32),
                            unroll=num_chunks <= 4)

    new_x = src + mlp + b2_ref[...]
    x_scr[...] = new_x                                    # carry to next layer

    # ---- last layer: classifier head on the class-token rows only ----
    @pl.when(layer == num_layers - 1)
    def _():
        if b_blk > 1:
            cls_tok = jnp.concatenate(
                [new_x[b * n_tok:b * n_tok + 1, :] for b in range(b_blk)], axis=0)
        else:
            cls_tok = new_x[0:1, :]
        cls_n = _layernorm(cls_tok, n_w_ref[...], n_b_ref[...])
        out_ref[...] = jnp.dot(cls_n.astype(BF16), fc_w_ref[...],
                               preferred_element_type=F32) + fc_b_ref[...]


def _choose_f_chunk(f_hidden):
    """Exact-divisor MLP hidden chunk (avoids masked/unaligned tail slices)."""
    if f_hidden <= 512:
        return f_hidden
    for c in (512, 256, 128):
        if f_hidden % c == 0:
            return c
    return f_hidden  # no clean divisor: single chunk


def _choose_b_blk(B, N, C, f_hidden, f_chunk, max_b_blk=8):
    """Largest divisor of B that fits a conservative (v7x-sized) VMEM budget."""
    budget = 36 * 1024 * 1024
    # double-buffered per-layer bf16 weights: qkv (C,3C) + proj (C,C) + w1 + w2
    weight_bytes = 2 * 2 * (4 * C * C + 2 * C * f_hidden)
    # rough f32 working set per batch row (residual, qkv, attn, MLP chunk)
    per_row = 4 * N * (6 * C + 2 * min(f_chunk, f_hidden)) + 4 * N * N
    avail = max(budget - weight_bytes, per_row)
    cap = min(max_b_blk, max(1, avail // per_row))
    best = 1
    for d in range(1, B + 1):
        if B % d == 0 and d <= cap:
            best = d
            if d * N >= 512:      # enough MXU M-rows; stop growing
                break
    return best


def _vmem_limit_bytes():
    """Scoped VMEM limit sized per generation (v7x 64 MiB vs 128 MiB v5e/v6e)."""
    try:
        cap = pltpu.get_tpu_info().vmem_capacity_bytes
        return int(min(100 * 1024 * 1024, cap * 3 // 4))
    except Exception:
        return 64 * 1024 * 1024


@functools.partial(jax.jit, static_argnames=("num_heads", "num_classes"))
def transformer_classifier(x_tokens, params, *, num_heads, num_classes):
    B, S, C = x_tokens.shape
    L = params['wqkv'].shape[0]
    F_hidden = params['w1'].shape[2]
    N = S + 1                                        # +1 class token
    K_pad = params['fc_w'].shape[1]                  # lane-dense padded classes
    f_chunk = _choose_f_chunk(F_hidden)
    B_blk = _choose_b_blk(B, N, C, F_hidden, f_chunk)

    kernel = functools.partial(vit_forward_kernel, num_heads=num_heads,
                               f_chunk=f_chunk)

    batch_map = lambda g, l: (g, 0, 0)
    layer_map = lambda g, l: (l, 0, 0)
    const2 = lambda g, l: (0, 0)

    in_specs = [
        pl.BlockSpec((B_blk, S, C), batch_map),        # x tokens (B_blk rows)
        pl.BlockSpec((1, C), const2),                  # class token
        pl.BlockSpec((N, C), const2),                  # sine positional emb
        pl.BlockSpec((None, 1, C), layer_map),         # pre_norm weight
        pl.BlockSpec((None, 1, C), layer_map),         # pre_norm bias
        pl.BlockSpec((None, C, 3 * C), layer_map),     # qkv weight (C, 3C)
        pl.BlockSpec((None, C, C), layer_map),         # proj weight (C, C)
        pl.BlockSpec((None, 1, C), layer_map),         # proj bias
        pl.BlockSpec((None, 1, C), layer_map),         # norm1 weight
        pl.BlockSpec((None, 1, C), layer_map),         # norm1 bias
        pl.BlockSpec((None, C, F_hidden), layer_map),  # linear1 weight (C, F)
        pl.BlockSpec((None, 1, F_hidden), layer_map),  # linear1 bias
        pl.BlockSpec((None, F_hidden, C), layer_map),  # linear2 weight (F, C)
        pl.BlockSpec((None, 1, C), layer_map),         # linear2 bias
        pl.BlockSpec((1, C), const2),                  # final norm weight
        pl.BlockSpec((1, C), const2),                  # final norm bias
        pl.BlockSpec((C, K_pad), const2),              # fc weight (C, K_pad)
        pl.BlockSpec((1, K_pad), const2),              # fc bias
    ]

    logits_pad = pl.pallas_call(
        kernel,
        out_shape=jax.ShapeDtypeStruct((B, K_pad), F32),
        grid=(B // B_blk, L),
        in_specs=in_specs,
        out_specs=pl.BlockSpec((B_blk, K_pad), lambda g, l: (g, 0)),
        scratch_shapes=[pltpu.VMEM((B_blk * N, C), F32)],  # activation across layers
        compiler_params=pltpu.CompilerParams(
            dimension_semantics=("parallel", "arbitrary"),
            vmem_limit_bytes=_vmem_limit_bytes()),
    )(x_tokens,
      params['cls'], params['pos'],
      params['pre_w'], params['pre_b'],
      params['wqkv'], params['wproj'], params['bproj'],
      params['n1_w'], params['n1_b'],
      params['w1'], params['b1'], params['w2'], params['b2'],
      params['n_w'], params['n_b'], params['fc_w'], params['fc_b'])

    return logits_pad[:, :num_classes]


def sinusoidal_embedding(n_positions, dim):
    """Matches TransformerClassifier.sinusoidal_embedding."""
    p = jnp.arange(n_positions, dtype=F32)[:, None]
    i = jnp.arange(dim)[None, :]
    exponent = (2 * (i // 2)).astype(F32) / dim
    angle = p / jnp.power(10000.0, exponent)
    return jnp.where(i % 2 == 0, jnp.sin(angle), jnp.cos(angle)).astype(F32)


def init_params(key, *, sequence_length, embedding_dim, num_layers, num_heads,
                mlp_ratio, num_classes):
    C = embedding_dim
    F_hidden = int(C * mlp_ratio)
    N = sequence_length + 1                         # +1 class token (seq_pool=False)
    K_pad = ((num_classes + 127) // 128) * 128      # lane-dense fc output

    def trunc_normal(k, shape, std=0.02):
        return (std * jax.random.truncated_normal(k, -2.0, 2.0, shape)).astype(F32)

    keys = jax.random.split(key, 4 * num_layers + 1)
    wqkv = jnp.stack([trunc_normal(keys[4 * i + 0], (C, 3 * C))
                      for i in range(num_layers)])
    wproj = jnp.stack([trunc_normal(keys[4 * i + 1], (C, C))
                       for i in range(num_layers)])
    w1 = jnp.stack([trunc_normal(keys[4 * i + 2], (C, F_hidden))
                    for i in range(num_layers)])
    w2 = jnp.stack([trunc_normal(keys[4 * i + 3], (F_hidden, C))
                    for i in range(num_layers)])
    fc_w = jnp.zeros((C, K_pad), F32).at[:, :num_classes].set(
        trunc_normal(keys[-1], (C, num_classes)))

    return dict(
        cls=jnp.zeros((1, C), F32),                 # class_emb init = zeros
        pos=sinusoidal_embedding(N, C),             # 'sine' positional embedding
        pre_w=jnp.ones((num_layers, 1, C), F32),
        pre_b=jnp.zeros((num_layers, 1, C), F32),
        wqkv=wqkv.astype(BF16),
        wproj=wproj.astype(BF16),
        bproj=jnp.zeros((num_layers, 1, C), F32),
        n1_w=jnp.ones((num_layers, 1, C), F32),
        n1_b=jnp.zeros((num_layers, 1, C), F32),
        w1=w1.astype(BF16),
        b1=jnp.zeros((num_layers, 1, F_hidden), F32),
        w2=w2.astype(BF16),
        b2=jnp.zeros((num_layers, 1, C), F32),
        n_w=jnp.ones((1, C), F32),
        n_b=jnp.zeros((1, C), F32),
        fc_w=fc_w.astype(BF16),
        fc_b=jnp.zeros((1, K_pad), F32),
    )


def reference_forward(x_tokens, params, *, num_heads, num_classes):
    """Pure-JAX f32 reference of the PyTorch module forward."""
    B, S, C = x_tokens.shape
    H = num_heads
    hd = C // H

    def ln(t, w, b):
        mu = jnp.mean(t, axis=-1, keepdims=True)
        var = jnp.mean((t - mu) ** 2, axis=-1, keepdims=True)
        return (t - mu) / jnp.sqrt(var + EPS) * w + b

    cls = jnp.broadcast_to(params['cls'][None], (B, 1, C))
    x = jnp.concatenate([cls, x_tokens], axis=1) + params['pos'][None]
    num_layers = params['wqkv'].shape[0]
    for l in range(num_layers):
        wqkv = params['wqkv'][l].astype(F32)
        wproj = params['wproj'][l].astype(F32)
        w1 = params['w1'][l].astype(F32)
        w2 = params['w2'][l].astype(F32)
        xn = ln(x, params['pre_w'][l], params['pre_b'][l])
        qkv = xn @ wqkv
        q, k, v = qkv[..., :C], qkv[..., C:2 * C], qkv[..., 2 * C:]

        def heads(t):
            return t.reshape(B, -1, H, hd).transpose(0, 2, 1, 3)

        qh, kh, vh = heads(q) * (hd ** -0.5), heads(k), heads(v)
        attn_p = jax.nn.softmax(qh @ kh.transpose(0, 1, 3, 2), axis=-1)
        ctx = (attn_p @ vh).transpose(0, 2, 1, 3).reshape(B, -1, C)
        x = x + ctx @ wproj + params['bproj'][l]
        src = ln(x, params['n1_w'][l], params['n1_b'][l])
        h1 = jnp.maximum(src @ w1 + params['b1'][l], 0.0)
        x = src + h1 @ w2 + params['b2'][l]
    x = ln(x, params['n_w'], params['n_b'])
    logits = x[:, 0] @ params['fc_w'].astype(F32) + params['fc_b']
    return logits[:, :num_classes]


if __name__ == "__main__":
    batch, seq_len, embed_dim = 2, 8, 32
    num_heads, num_layers, mlp_ratio, num_classes = 4, 2, 4.0, 16

    key = jax.random.PRNGKey(0)
    key, kx = jax.random.split(key)
    x = jax.random.normal(kx, (batch, seq_len, embed_dim), dtype=F32)

    params = init_params(key, sequence_length=seq_len, embedding_dim=embed_dim,
                         num_layers=num_layers, num_heads=num_heads,
                         mlp_ratio=mlp_ratio, num_classes=num_classes)

    out = transformer_classifier(x, params, num_heads=num_heads,
                                 num_classes=num_classes)
    out = jax.block_until_ready(out)

    assert out.shape == (batch, num_classes), out.shape
    assert bool(jnp.all(jnp.isfinite(out)))

    ref = reference_forward(x, params, num_heads=num_heads,
                            num_classes=num_classes)
    assert jnp.allclose(out, ref, atol=5e-2, rtol=5e-2), \
        float(jnp.max(jnp.abs(out - ref)))

    print("KERNEL_OK")
</pallas_src>

<mosaic_0001>
module attributes {stable_mosaic.version = 11 : i64} {
  func.func @vit_forward_kernel(%arg0: i32, %arg1: i32, %arg2: memref<2x8x32xf32, #tpu.memory_space<vmem>>, %arg3: memref<1x32xf32, #tpu.memory_space<vmem>>, %arg4: memref<9x32xf32, #tpu.memory_space<vmem>>, %arg5: memref<1x1x32xf32, #tpu.memory_space<vmem>>, %arg6: memref<1x1x32xf32, #tpu.memory_space<vmem>>, %arg7: memref<1x32x96xbf16, #tpu.memory_space<vmem>>, %arg8: memref<1x32x32xbf16, #tpu.memory_space<vmem>>, %arg9: memref<1x1x32xf32, #tpu.memory_space<vmem>>, %arg10: memref<1x1x32xf32, #tpu.memory_space<vmem>>, %arg11: memref<1x1x32xf32, #tpu.memory_space<vmem>>, %arg12: memref<1x32x128xbf16, #tpu.memory_space<vmem>>, %arg13: memref<1x1x128xf32, #tpu.memory_space<vmem>>, %arg14: memref<1x128x32xbf16, #tpu.memory_space<vmem>>, %arg15: memref<1x1x32xf32, #tpu.memory_space<vmem>>, %arg16: memref<1x32xf32, #tpu.memory_space<vmem>>, %arg17: memref<1x32xf32, #tpu.memory_space<vmem>>, %arg18: memref<32x128xbf16, #tpu.memory_space<vmem>>, %arg19: memref<1x128xf32, #tpu.memory_space<vmem>>, %arg20: memref<2x128xf32, #tpu.memory_space<vmem>>, %arg21: memref<18x32xf32, #tpu.memory_space<vmem>>) attributes {dimension_semantics = [#tpu.dimension_semantics<parallel>, #tpu.dimension_semantics<arbitrary>], iteration_bounds = array<i64: 1, 2>, scalar_prefetch = 0 : i64, scratch_operands = 1 : i64, tpu.core_type = #tpu.core_type<tc>, window_params = [{transform_indices = @transform_0, window_bounds = array<i64: 2, 8, 32>}, {pipeline_mode = #tpu.pipeline_mode<synchronous>, transform_indices = @transform_1, window_bounds = array<i64: 1, 32>}, {pipeline_mode = #tpu.pipeline_mode<synchronous>, transform_indices = @transform_2, window_bounds = array<i64: 9, 32>}, {transform_indices = @transform_3, window_bounds = array<i64: 1, 1, 32>}, {transform_indices = @transform_4, window_bounds = array<i64: 1, 1, 32>}, {transform_indices = @transform_5, window_bounds = array<i64: 1, 32, 96>}, {transform_indices = @transform_6, window_bounds = array<i64: 1, 32, 32>}, {transform_indices = @transform_7, window_bounds = array<i64: 1, 1, 32>}, {transform_indices = @transform_8, window_bounds = array<i64: 1, 1, 32>}, {transform_indices = @transform_9, window_bounds = array<i64: 1, 1, 32>}, {transform_indices = @transform_10, window_bounds = array<i64: 1, 32, 128>}, {transform_indices = @transform_11, window_bounds = array<i64: 1, 1, 128>}, {transform_indices = @transform_12, window_bounds = array<i64: 1, 128, 32>}, {transform_indices = @transform_13, window_bounds = array<i64: 1, 1, 32>}, {pipeline_mode = #tpu.pipeline_mode<synchronous>, transform_indices = @transform_14, window_bounds = array<i64: 1, 32>}, {pipeline_mode = #tpu.pipeline_mode<synchronous>, transform_indices = @transform_15, window_bounds = array<i64: 1, 32>}, {pipeline_mode = #tpu.pipeline_mode<synchronous>, transform_indices = @transform_16, window_bounds = array<i64: 32, 128>}, {pipeline_mode = #tpu.pipeline_mode<synchronous>, transform_indices = @transform_17, window_bounds = array<i64: 1, 128>}, {transform_indices = @transform_18, window_bounds = array<i64: 2, 128>}]} {
    %c0_i32 = arith.constant 0 : i32
    %0 = arith.cmpi eq, %arg1, %c0_i32 : i32
    %1 = arith.extui %0 : i1 to i32
    %c0_i32_0 = arith.constant 0 : i32
    %2 = arith.cmpi ne, %1, %c0_i32_0 : i32
    scf.if %2 {
      %c0_61 = arith.constant 0 : index
      %c0_62 = arith.constant 0 : index
      %205 = vector.load %arg3[%c0_61, %c0_62] : memref<1x32xf32, #tpu.memory_space<vmem>>, vector<1x32xf32>
      %c0_63 = arith.constant 0 : index
      %c0_64 = arith.constant 0 : index
      %206 = vector.load %arg4[%c0_63, %c0_64] : memref<9x32xf32, #tpu.memory_space<vmem>>, vector<1x32xf32>
      %207 = arith.addf %205, %206 : vector<1x32xf32>
      %c1 = arith.constant 1 : index
      %c0_65 = arith.constant 0 : index
      %208 = vector.load %arg4[%c1, %c0_65] : memref<9x32xf32, #tpu.memory_space<vmem>>, vector<8x32xf32>
      %c0_66 = arith.constant 0 : index
      %c0_67 = arith.constant 0 : index
      %209 = vector.load %arg21[%c0_66, %c0_67] : memref<18x32xf32, #tpu.memory_space<vmem>>, vector<1x32xf32>
      tpu.vector_store %arg21[%c0_66, %c0_67], %207 {strides = array<i32>} : memref<18x32xf32, #tpu.memory_space<vmem>>, vector<1x32xf32>,
      %c0_68 = arith.constant 0 : index
      %c0_69 = arith.constant 0 : index
      %c0_70 = arith.constant 0 : index
      %210 = vector.load %arg2[%c0_68, %c0_69, %c0_70] : memref<2x8x32xf32, #tpu.memory_space<vmem>>, vector<1x8x32xf32>
      %211 = vector.shape_cast %210 : vector<1x8x32xf32> to vector<8x32xf32>
      %212 = arith.addf %211, %208 : vector<8x32xf32>
      %c1_71 = arith.constant 1 : index
      %c0_72 = arith.constant 0 : index
      %213 = vector.load %arg21[%c1_71, %c0_72] : memref<18x32xf32, #tpu.memory_space<vmem>>, vector<8x32xf32>
      tpu.vector_store %arg21[%c1_71, %c0_72], %212 {strides = array<i32>} : memref<18x32xf32, #tpu.memory_space<vmem>>, vector<8x32xf32>,
      %c9 = arith.constant 9 : index
      %c0_73 = arith.constant 0 : index
      %214 = vector.load %arg21[%c9, %c0_73] : memref<18x32xf32, #tpu.memory_space<vmem>>, vector<1x32xf32>
      tpu.vector_store %arg21[%c9, %c0_73], %207 {strides = array<i32>} : memref<18x32xf32, #tpu.memory_space<vmem>>, vector<1x32xf32>,
      %c1_74 = arith.constant 1 : index
      %c0_75 = arith.constant 0 : index
      %c0_76 = arith.constant 0 : index
      %215 = vector.load %arg2[%c1_74, %c0_75, %c0_76] : memref<2x8x32xf32, #tpu.memory_space<vmem>>, vector<1x8x32xf32>
      %216 = vector.shape_cast %215 : vector<1x8x32xf32> to vector<8x32xf32>
      %217 = arith.addf %216, %208 : vector<8x32xf32>
      %c10 = arith.constant 10 : index
      %c0_77 = arith.constant 0 : index
      %218 = vector.load %arg21[%c10, %c0_77] : memref<18x32xf32, #tpu.memory_space<vmem>>, vector<8x32xf32>
      tpu.vector_store %arg21[%c10, %c0_77], %217 {strides = array<i32>} : memref<18x32xf32, #tpu.memory_space<vmem>>, vector<8x32xf32>,
    } else {
    }
    %c0 = arith.constant 0 : index
    %c0_1 = arith.constant 0 : index
    %3 = vector.load %arg21[%c0, %c0_1] : memref<18x32xf32, #tpu.memory_space<vmem>>, vector<18x32xf32>
    %c0_2 = arith.constant 0 : index
    %c0_3 = arith.constant 0 : index
    %c0_4 = arith.constant 0 : index
    %4 = vector.load %arg5[%c0_2, %c0_3, %c0_4] : memref<1x1x32xf32, #tpu.memory_space<vmem>>, vector<1x1x32xf32>
    %5 = vector.shape_cast %4 : vector<1x1x32xf32> to vector<1x32xf32>
    %c0_5 = arith.constant 0 : index
    %c0_6 = arith.constant 0 : index
    %c0_7 = arith.constant 0 : index
    %6 = vector.load %arg6[%c0_5, %c0_6, %c0_7] : memref<1x1x32xf32, #tpu.memory_space<vmem>>, vector<1x1x32xf32>
    %7 = vector.shape_cast %6 : vector<1x1x32xf32> to vector<1x32xf32>
    %cst = arith.constant dense<0.000000e+00> : vector<18xf32>
    %8 = vector.multi_reduction <add>, %3, %cst [1] : vector<18x32xf32> to vector<18xf32>
    %9 = vector.shape_cast %8 : vector<18xf32> to vector<18x1xf32>
    %cst_8 = arith.constant 3.200000e+01 : f32
    %10 = vector.broadcast %cst_8 : f32 to vector<18x1xf32>
    %11 = arith.divf %9, %10 : vector<18x1xf32>
    %12 = vector.broadcast %11 : vector<18x1xf32> to vector<18x32xf32>
    %13 = arith.subf %3, %12 : vector<18x32xf32>
    %14 = arith.mulf %13, %13 : vector<18x32xf32>
    %cst_9 = arith.constant dense<0.000000e+00> : vector<18xf32>
    %15 = vector.multi_reduction <add>, %14, %cst_9 [1] : vector<18x32xf32> to vector<18xf32>
    %16 = vector.shape_cast %15 : vector<18xf32> to vector<18x1xf32>
    %cst_10 = arith.constant 3.200000e+01 : f32
    %17 = vector.broadcast %cst_10 : f32 to vector<18x1xf32>
    %18 = arith.divf %16, %17 : vector<18x1xf32>
    %19 = vector.broadcast %11 : vector<18x1xf32> to vector<18x32xf32>
    %20 = arith.subf %3, %19 : vector<18x32xf32>
    %cst_11 = arith.constant 9.99999974E-6 : f32
    %21 = vector.broadcast %cst_11 : f32 to vector<18x1xf32>
    %22 = arith.addf %18, %21 : vector<18x1xf32>
    %23 = math.rsqrt %22 : vector<18x1xf32>
    %24 = vector.broadcast %23 : vector<18x1xf32> to vector<18x32xf32>
    %25 = arith.mulf %20, %24 : vector<18x32xf32>
    %26 = vector.broadcast %5 : vector<1x32xf32> to vector<18x32xf32>
    %27 = arith.mulf %25, %26 : vector<18x32xf32>
    %28 = vector.broadcast %7 : vector<1x32xf32> to vector<18x32xf32>
    %29 = arith.addf %27, %28 : vector<18x32xf32>
    %30 = arith.truncf %29 : vector<18x32xf32> to vector<18x32xbf16>
    %c0_12 = arith.constant 0 : index
    %c0_13 = arith.constant 0 : index
    %c0_14 = arith.constant 0 : index
    %31 = vector.load %arg7[%c0_12, %c0_13, %c0_14] : memref<1x32x96xbf16, #tpu.memory_space<vmem>>, vector<1x32x96xbf16>
    %32 = vector.shape_cast %31 : vector<1x32x96xbf16> to vector<32x96xbf16>
    %cst_15 = arith.constant dense<0.000000e+00> : vector<18x96xf32>
    %33 = tpu.matmul %30, %32, %cst_15 {dimension_numbers = #tpu.dot_dimension_numbers<[1], [0], [0], [1], [0, 0, 1, 1], [], []>} : vector<18x32xbf16>, vector<32x96xbf16>, vector<18x96xf32> -> vector<18x96xf32>
    %34 = vector.extract_strided_slice %33 {offsets = [0, 0], sizes = [18, 32], strides = [1, 1]} : vector<18x96xf32> to vector<18x32xf32>
    %cst_16 = arith.constant 0.353553385 : f32
    %35 = vector.broadcast %cst_16 : f32 to vector<18x32xf32>
    %36 = arith.mulf %34, %35 : vector<18x32xf32>
    %37 = arith.truncf %36 : vector<18x32xf32> to vector<18x32xbf16>
    %38 = vector.extract_strided_slice %33 {offsets = [0, 32], sizes = [18, 32], strides = [1, 1]} : vector<18x96xf32> to vector<18x32xf32>
    %39 = arith.truncf %38 : vector<18x32xf32> to vector<18x32xbf16>
    %40 = vector.extract_strided_slice %33 {offsets = [0, 64], sizes = [18, 32], strides = [1, 1]} : vector<18x96xf32> to vector<18x32xf32>
    %41 = arith.truncf %40 : vector<18x32xf32> to vector<18x32xbf16>
    %42 = vector.extract_strided_slice %37 {offsets = [0, 0], sizes = [9, 32], strides = [1, 1]} : vector<18x32xbf16> to vector<9x32xbf16>
    %43 = vector.extract_strided_slice %42 {offsets = [0, 0], sizes = [9, 8], strides = [1, 1]} : vector<9x32xbf16> to vector<9x8xbf16>
    %44 = vector.extract_strided_slice %42 {offsets = [0, 8], sizes = [9, 8], strides = [1, 1]} : vector<9x32xbf16> to vector<9x8xbf16>
    %45 = vector.extract_strided_slice %42 {offsets = [0, 16], sizes = [9, 8], strides = [1, 1]} : vector<9x32xbf16> to vector<9x8xbf16>
    %46 = vector.extract_strided_slice %42 {offsets = [0, 24], sizes = [9, 8], strides = [1, 1]} : vector<9x32xbf16> to vector<9x8xbf16>
    %47 = vector.shape_cast %43 : vector<9x8xbf16> to vector<1x9x8xbf16>
    %48 = vector.shape_cast %44 : vector<9x8xbf16> to vector<1x9x8xbf16>
    %49 = vector.shape_cast %45 : vector<9x8xbf16> to vector<1x9x8xbf16>
    %50 = vector.shape_cast %46 : vector<9x8xbf16> to vector<1x9x8xbf16>
    %51 = tpu.concatenate %47, %48, %49, %50 in 0 : vector<1x9x8xbf16>, vector<1x9x8xbf16>, vector<1x9x8xbf16>, vector<1x9x8xbf16> -> vector<4x9x8xbf16>
    %52 = vector.extract_strided_slice %39 {offsets = [0, 0], sizes = [9, 32], strides = [1, 1]} : vector<18x32xbf16> to vector<9x32xbf16>
    %53 = vector.extract_strided_slice %52 {offsets = [0, 0], sizes = [9, 8], strides = [1, 1]} : vector<9x32xbf16> to vector<9x8xbf16>
    %54 = vector.extract_strided_slice %52 {offsets = [0, 8], sizes = [9, 8], strides = [1, 1]} : vector<9x32xbf16> to vector<9x8xbf16>
    %55 = vector.extract_strided_slice %52 {offsets = [0, 16], sizes = [9, 8], strides = [1, 1]} : vector<9x32xbf16> to vector<9x8xbf16>
    %56 = vector.extract_strided_slice %52 {offsets = [0, 24], sizes = [9, 8], strides = [1, 1]} : vector<9x32xbf16> to vector<9x8xbf16>
    %57 = vector.shape_cast %53 : vector<9x8xbf16> to vector<1x9x8xbf16>
    %58 = vector.shape_cast %54 : vector<9x8xbf16> to vector<1x9x8xbf16>
    %59 = vector.shape_cast %55 : vector<9x8xbf16> to vector<1x9x8xbf16>
    %60 = vector.shape_cast %56 : vector<9x8xbf16> to vector<1x9x8xbf16>
    %61 = tpu.concatenate %57, %58, %59, %60 in 0 : vector<1x9x8xbf16>, vector<1x9x8xbf16>, vector<1x9x8xbf16>, vector<1x9x8xbf16> -> vector<4x9x8xbf16>
    %62 = vector.extract_strided_slice %41 {offsets = [0, 0], sizes = [9, 32], strides = [1, 1]} : vector<18x32xbf16> to vector<9x32xbf16>
    %63 = vector.extract_strided_slice %62 {offsets = [0, 0], sizes = [9, 8], strides = [1, 1]} : vector<9x32xbf16> to vector<9x8xbf16>
    %64 = vector.extract_strided_slice %62 {offsets = [0, 8], sizes = [9, 8], strides = [1, 1]} : vector<9x32xbf16> to vector<9x8xbf16>
    %65 = vector.extract_strided_slice %62 {offsets = [0, 16], sizes = [9, 8], strides = [1, 1]} : vector<9x32xbf16> to vector<9x8xbf16>
    %66 = vector.extract_strided_slice %62 {offsets = [0, 24], sizes = [9, 8], strides = [1, 1]} : vector<9x32xbf16> to vector<9x8xbf16>
    %67 = vector.shape_cast %63 : vector<9x8xbf16> to vector<1x9x8xbf16>
    %68 = vector.shape_cast %64 : vector<9x8xbf16> to vector<1x9x8xbf16>
    %69 = vector.shape_cast %65 : vector<9x8xbf16> to vector<1x9x8xbf16>
    %70 = vector.shape_cast %66 : vector<9x8xbf16> to vector<1x9x8xbf16>
    %71 = tpu.concatenate %67, %68, %69, %70 in 0 : vector<1x9x8xbf16>, vector<1x9x8xbf16>, vector<1x9x8xbf16>, vector<1x9x8xbf16> -> vector<4x9x8xbf16>
    "tpu.trace_start"() <{level = 10 : i32, message = "hnd,hmd->hnm"}> : () -> ()
    %cst_17 = arith.constant dense<0.000000e+00> : vector<4x9x9xf32>
    %72 = tpu.matmul %51, %61, %cst_17 {dimension_numbers = #tpu.dot_dimension_numbers<[2], [2], [1], [1], [0, 0, 0, 1, 1, 1], [0], [0]>} : vector<4x9x8xbf16>, vector<4x9x8xbf16>, vector<4x9x9xf32> -> vector<4x9x9xf32>
    "tpu.trace_stop"() : () -> ()
    %cst_18 = arith.constant dense<0xFF800000> : vector<4x9xf32>
    %73 = vector.multi_reduction <maximumf>, %72, %cst_18 [2] : vector<4x9x9xf32> to vector<4x9xf32>
    %74 = vector.shape_cast %73 : vector<4x9xf32> to vector<4x9x1xf32>
    %75 = vector.broadcast %74 : vector<4x9x1xf32> to vector<4x9x9xf32>
    %76 = arith.subf %72, %75 : vector<4x9x9xf32>
    %77 = math.exp %76 : vector<4x9x9xf32>
    %cst_19 = arith.constant dense<0.000000e+00> : vector<4x9xf32>
    %78 = vector.multi_reduction <add>, %77, %cst_19 [2] : vector<4x9x9xf32> to vector<4x9xf32>
    %79 = vector.shape_cast %78 : vector<4x9xf32> to vector<4x9x1xf32>
    %80 = tpu.reciprocal %79 {approx = true} : vector<4x9x1xf32> -> vector<4x9x1xf32>
    %81 = vector.broadcast %80 : vector<4x9x1xf32> to vector<4x9x9xf32>
    %82 = arith.mulf %77, %81 : vector<4x9x9xf32>
    %83 = arith.truncf %82 : vector<4x9x9xf32> to vector<4x9x9xbf16>
    "tpu.trace_start"() <{level = 10 : i32, message = "hnm,hmd->hnd"}> : () -> ()
    %cst_20 = arith.constant dense<0.000000e+00> : vector<4x9x8xf32>
    %84 = tpu.matmul %83, %71, %cst_20 {dimension_numbers = #tpu.dot_dimension_numbers<[2], [1], [1], [2], [0, 0, 0, 1, 1, 2], [0], [0]>} : vector<4x9x9xbf16>, vector<4x9x8xbf16>, vector<4x9x8xf32> -> vector<4x9x8xf32>
    "tpu.trace_stop"() : () -> ()
    %85 = vector.extract_strided_slice %84 {offsets = [0, 0, 0], sizes = [1, 9, 8], strides = [1, 1, 1]} : vector<4x9x8xf32> to vector<1x9x8xf32>
    %86 = vector.shape_cast %85 : vector<1x9x8xf32> to vector<9x8xf32>
    %87 = vector.extract_strided_slice %84 {offsets = [1, 0, 0], sizes = [1, 9, 8], strides = [1, 1, 1]} : vector<4x9x8xf32> to vector<1x9x8xf32>
    %88 = vector.shape_cast %87 : vector<1x9x8xf32> to vector<9x8xf32>
    %89 = vector.extract_strided_slice %84 {offsets = [2, 0, 0], sizes = [1, 9, 8], strides = [1, 1, 1]} : vector<4x9x8xf32> to vector<1x9x8xf32>
    %90 = vector.shape_cast %89 : vector<1x9x8xf32> to vector<9x8xf32>
    %91 = vector.extract_strided_slice %84 {offsets = [3, 0, 0], sizes = [1, 9, 8], strides = [1, 1, 1]} : vector<4x9x8xf32> to vector<1x9x8xf32>
    %92 = vector.shape_cast %91 : vector<1x9x8xf32> to vector<9x8xf32>
    %93 = tpu.concatenate %86, %88, %90, %92 in 1 : vector<9x8xf32>, vector<9x8xf32>, vector<9x8xf32>, vector<9x8xf32> -> vector<9x32xf32>
    %94 = vector.extract_strided_slice %37 {offsets = [9, 0], sizes = [9, 32], strides = [1, 1]} : vector<18x32xbf16> to vector<9x32xbf16>
    %95 = vector.extract_strided_slice %94 {offsets = [0, 0], sizes = [9, 8], strides = [1, 1]} : vector<9x32xbf16> to vector<9x8xbf16>
    %96 = vector.extract_strided_slice %94 {offsets = [0, 8], sizes = [9, 8], strides = [1, 1]} : vector<9x32xbf16> to vector<9x8xbf16>
    %97 = vector.extract_strided_slice %94 {offsets = [0, 16], sizes = [9, 8], strides = [1, 1]} : vector<9x32xbf16> to vector<9x8xbf16>
    %98 = vector.extract_strided_slice %94 {offsets = [0, 24], sizes = [9, 8], strides = [1, 1]} : vector<9x32xbf16> to vector<9x8xbf16>
    %99 = vector.shape_cast %95 : vector<9x8xbf16> to vector<1x9x8xbf16>
    %100 = vector.shape_cast %96 : vector<9x8xbf16> to vector<1x9x8xbf16>
    %101 = vector.shape_cast %97 : vector<9x8xbf16> to vector<1x9x8xbf16>
    %102 = vector.shape_cast %98 : vector<9x8xbf16> to vector<1x9x8xbf16>
    %103 = tpu.concatenate %99, %100, %101, %102 in 0 : vector<1x9x8xbf16>, vector<1x9x8xbf16>, vector<1x9x8xbf16>, vector<1x9x8xbf16> -> vector<4x9x8xbf16>
    %104 = vector.extract_strided_slice %39 {offsets = [9, 0], sizes = [9, 32], strides = [1, 1]} : vector<18x32xbf16> to vector<9x32xbf16>
    %105 = vector.extract_strided_slice %104 {offsets = [0, 0], sizes = [9, 8], strides = [1, 1]} : vector<9x32xbf16> to vector<9x8xbf16>
    %106 = vector.extract_strided_slice %104 {offsets = [0, 8], sizes = [9, 8], strides = [1, 1]} : vector<9x32xbf16> to vector<9x8xbf16>
    %107 = vector.extract_strided_slice %104 {offsets = [0, 16], sizes = [9, 8], strides = [1, 1]} : vector<9x32xbf16> to vector<9x8xbf16>
    %108 = vector.extract_strided_slice %104 {offsets = [0, 24], sizes = [9, 8], strides = [1, 1]} : vector<9x32xbf16> to vector<9x8xbf16>
    %109 = vector.shape_cast %105 : vector<9x8xbf16> to vector<1x9x8xbf16>
    %110 = vector.shape_cast %106 : vector<9x8xbf16> to vector<1x9x8xbf16>
    %111 = vector.shape_cast %107 : vector<9x8xbf16> to vector<1x9x8xbf16>
    %112 = vector.shape_cast %108 : vector<9x8xbf16> to vector<1x9x8xbf16>
    %113 = tpu.concatenate %109, %110, %111, %112 in 0 : vector<1x9x8xbf16>, vector<1x9x8xbf16>, vector<1x9x8xbf16>, vector<1x9x8xbf16> -> vector<4x9x8xbf16>
    %114 = vector.extract_strided_slice %41 {offsets = [9, 0], sizes = [9, 32], strides = [1, 1]} : vector<18x32xbf16> to vector<9x32xbf16>
    %115 = vector.extract_strided_slice %114 {offsets = [0, 0], sizes = [9, 8], strides = [1, 1]} : vector<9x32xbf16> to vector<9x8xbf16>
    %116 = vector.extract_strided_slice %114 {offsets = [0, 8], sizes = [9, 8], strides = [1, 1]} : vector<9x32xbf16> to vector<9x8xbf16>
    %117 = vector.extract_strided_slice %114 {offsets = [0, 16], sizes = [9, 8], strides = [1, 1]} : vector<9x32xbf16> to vector<9x8xbf16>
    %118 = vector.extract_strided_slice %114 {offsets = [0, 24], sizes = [9, 8], strides = [1, 1]} : vector<9x32xbf16> to vector<9x8xbf16>
    %119 = vector.shape_cast %115 : vector<9x8xbf16> to vector<1x9x8xbf16>
    %120 = vector.shape_cast %116 : vector<9x8xbf16> to vector<1x9x8xbf16>
    %121 = vector.shape_cast %117 : vector<9x8xbf16> to vector<1x9x8xbf16>
    %122 = vector.shape_cast %118 : vector<9x8xbf16> to vector<1x9x8xbf16>
    %123 = tpu.concatenate %119, %120, %121, %122 in 0 : vector<1x9x8xbf16>, vector<1x9x8xbf16>, vector<1x9x8xbf16>, vector<1x9x8xbf16> -> vector<4x9x8xbf16>
    "tpu.trace_start"() <{level = 10 : i32, message = "hnd,hmd->hnm"}> : () -> ()
    %cst_21 = arith.constant dense<0.000000e+00> : vector<4x9x9xf32>
    %124 = tpu.matmul %103, %113, %cst_21 {dimension_numbers = #tpu.dot_dimension_numbers<[2], [2], [1], [1], [0, 0, 0, 1, 1, 1], [0], [0]>} : vector<4x9x8xbf16>, vector<4x9x8xbf16>, vector<4x9x9xf32> -> vector<4x9x9xf32>
    "tpu.trace_stop"() : () -> ()
    %cst_22 = arith.constant dense<0xFF800000> : vector<4x9xf32>
    %125 = vector.multi_reduction <maximumf>, %124, %cst_22 [2] : vector<4x9x9xf32> to vector<4x9xf32>
    %126 = vector.shape_cast %125 : vector<4x9xf32> to vector<4x9x1xf32>
    %127 = vector.broadcast %126 : vector<4x9x1xf32> to vector<4x9x9xf32>
    %128 = arith.subf %124, %127 : vector<4x9x9xf32>
    %129 = math.exp %128 : vector<4x9x9xf32>
    %cst_23 = arith.constant dense<0.000000e+00> : vector<4x9xf32>
    %130 = vector.multi_reduction <add>, %129, %cst_23 [2] : vector<4x9x9xf32> to vector<4x9xf32>
    %131 = vector.shape_cast %130 : vector<4x9xf32> to vector<4x9x1xf32>
    %132 = tpu.reciprocal %131 {approx = true} : vector<4x9x1xf32> -> vector<4x9x1xf32>
    %133 = vector.broadcast %132 : vector<4x9x1xf32> to vector<4x9x9xf32>
    %134 = arith.mulf %129, %133 : vector<4x9x9xf32>
    %135 = arith.truncf %134 : vector<4x9x9xf32> to vector<4x9x9xbf16>
    "tpu.trace_start"() <{level = 10 : i32, message = "hnm,hmd->hnd"}> : () -> ()
    %cst_24 = arith.constant dense<0.000000e+00> : vector<4x9x8xf32>
    %136 = tpu.matmul %135, %123, %cst_24 {dimension_numbers = #tpu.dot_dimension_numbers<[2], [1], [1], [2], [0, 0, 0, 1, 1, 2], [0], [0]>} : vector<4x9x9xbf16>, vector<4x9x8xbf16>, vector<4x9x8xf32> -> vector<4x9x8xf32>
    "tpu.trace_stop"() : () -> ()
    %137 = vector.extract_strided_slice %136 {offsets = [0, 0, 0], sizes = [1, 9, 8], strides = [1, 1, 1]} : vector<4x9x8xf32> to vector<1x9x8xf32>
    %138 = vector.shape_cast %137 : vector<1x9x8xf32> to vector<9x8xf32>
    %139 = vector.extract_strided_slice %136 {offsets = [1, 0, 0], sizes = [1, 9, 8], strides = [1, 1, 1]} : vector<4x9x8xf32> to vector<1x9x8xf32>
    %140 = vector.shape_cast %139 : vector<1x9x8xf32> to vector<9x8xf32>
    %141 = vector.extract_strided_slice %136 {offsets = [2, 0, 0], sizes = [1, 9, 8], strides = [1, 1, 1]} : vector<4x9x8xf32> to vector<1x9x8xf32>
    %142 = vector.shape_cast %141 : vector<1x9x8xf32> to vector<9x8xf32>
    %143 = vector.extract_strided_slice %136 {offsets = [3, 0, 0], sizes = [1, 9, 8], strides = [1, 1, 1]} : vector<4x9x8xf32> to vector<1x9x8xf32>
    %144 = vector.shape_cast %143 : vector<1x9x8xf32> to vector<9x8xf32>
    %145 = tpu.concatenate %138, %140, %142, %144 in 1 : vector<9x8xf32>, vector<9x8xf32>, vector<9x8xf32>, vector<9x8xf32> -> vector<9x32xf32>
    %146 = tpu.concatenate %93, %145 in 0 : vector<9x32xf32>, vector<9x32xf32> -> vector<18x32xf32>
    %147 = arith.truncf %146 : vector<18x32xf32> to vector<18x32xbf16>
    %c0_25 = arith.constant 0 : index
    %c0_26 = arith.constant 0 : index
    %c0_27 = arith.constant 0 : index
    %148 = vector.load %arg8[%c0_25, %c0_26, %c0_27] : memref<1x32x32xbf16, #tpu.memory_space<vmem>>, vector<1x32x32xbf16>
    %149 = vector.shape_cast %148 : vector<1x32x32xbf16> to vector<32x32xbf16>
    %cst_28 = arith.constant dense<0.000000e+00> : vector<18x32xf32>
    %150 = tpu.matmul %147, %149, %cst_28 {dimension_numbers = #tpu.dot_dimension_numbers<[1], [0], [0], [1], [0, 0, 1, 1], [], []>} : vector<18x32xbf16>, vector<32x32xbf16>, vector<18x32xf32> -> vector<18x32xf32>
    %c0_29 = arith.constant 0 : index
    %c0_30 = arith.constant 0 : index
    %c0_31 = arith.constant 0 : index
    %151 = vector.load %arg9[%c0_29, %c0_30, %c0_31] : memref<1x1x32xf32, #tpu.memory_space<vmem>>, vector<1x1x32xf32>
    %152 = vector.shape_cast %151 : vector<1x1x32xf32> to vector<1x32xf32>
    %153 = vector.broadcast %152 : vector<1x32xf32> to vector<18x32xf32>
    %154 = arith.addf %150, %153 : vector<18x32xf32>
    %155 = arith.addf %3, %154 : vector<18x32xf32>
    %c0_32 = arith.constant 0 : index
    %c0_33 = arith.constant 0 : index
    %c0_34 = arith.constant 0 : index
    %156 = vector.load %arg10[%c0_32, %c0_33, %c0_34] : memref<1x1x32xf32, #tpu.memory_space<vmem>>, vector<1x1x32xf32>
    %157 = vector.shape_cast %156 : vector<1x1x32xf32> to vector<1x32xf32>
    %c0_35 = arith.constant 0 : index
    %c0_36 = arith.constant 0 : index
    %c0_37 = arith.constant 0 : index
    %158 = vector.load %arg11[%c0_35, %c0_36, %c0_37] : memref<1x1x32xf32, #tpu.memory_space<vmem>>, vector<1x1x32xf32>
    %159 = vector.shape_cast %158 : vector<1x1x32xf32> to vector<1x32xf32>
    %cst_38 = arith.constant dense<0.000000e+00> : vector<18xf32>
    %160 = vector.multi_reduction <add>, %155, %cst_38 [1] : vector<18x32xf32> to vector<18xf32>
    %161 = vector.shape_cast %160 : vector<18xf32> to vector<18x1xf32>
    %cst_39 = arith.constant 3.200000e+01 : f32
    %162 = vector.broadcast %cst_39 : f32 to vector<18x1xf32>
    %163 = arith.divf %161, %162 : vector<18x1xf32>
    %164 = vector.broadcast %163 : vector<18x1xf32> to vector<18x32xf32>
    %165 = arith.subf %155, %164 : vector<18x32xf32>
    %166 = arith.mulf %165, %165 : vector<18x32xf32>
    %cst_40 = arith.constant dense<0.000000e+00> : vector<18xf32>
    %167 = vector.multi_reduction <add>, %166, %cst_40 [1] : vector<18x32xf32> to vector<18xf32>
    %168 = vector.shape_cast %167 : vector<18xf32> to vector<18x1xf32>
    %cst_41 = arith.constant 3.200000e+01 : f32
    %169 = vector.broadcast %cst_41 : f32 to vector<18x1xf32>
    %170 = arith.divf %168, %169 : vector<18x1xf32>
    %171 = vector.broadcast %163 : vector<18x1xf32> to vector<18x32xf32>
    %172 = arith.subf %155, %171 : vector<18x32xf32>
    %cst_42 = arith.constant 9.99999974E-6 : f32
    %173 = vector.broadcast %cst_42 : f32 to vector<18x1xf32>
    %174 = arith.addf %170, %173 : vector<18x1xf32>
    %175 = math.rsqrt %174 : vector<18x1xf32>
    %176 = vector.broadcast %175 : vector<18x1xf32> to vector<18x32xf32>
    %177 = arith.mulf %172, %176 : vector<18x32xf32>
    %178 = vector.broadcast %157 : vector<1x32xf32> to vector<18x32xf32>
    %179 = arith.mulf %177, %178 : vector<18x32xf32>
    %180 = vector.broadcast %159 : vector<1x32xf32> to vector<18x32xf32>
    %181 = arith.addf %179, %180 : vector<18x32xf32>
    %182 = arith.truncf %181 : vector<18x32xf32> to vector<18x32xbf16>
    %c0_43 = arith.constant 0 : index
    %c0_44 = arith.constant 0 : index
    %c0_45 = arith.constant 0 : index
    %183 = vector.load %arg12[%c0_43, %c0_44, %c0_45] : memref<1x32x128xbf16, #tpu.memory_space<vmem>>, vector<1x32x128xbf16>
    %184 = vector.shape_cast %183 : vector<1x32x128xbf16> to vector<32x128xbf16>
    %cst_46 = arith.constant dense<0.000000e+00> : vector<18x128xf32>
    %185 = tpu.matmul %182, %184, %cst_46 {dimension_numbers = #tpu.dot_dimension_numbers<[1], [0], [0], [1], [0, 0, 1, 1], [], []>} : vector<18x32xbf16>, vector<32x128xbf16>, vector<18x128xf32> -> vector<18x128xf32>
    %c0_47 = arith.constant 0 : index
    %c0_48 = arith.constant 0 : index
    %c0_49 = arith.constant 0 : index
    %186 = vector.load %arg13[%c0_47, %c0_48, %c0_49] : memref<1x1x128xf32, #tpu.memory_space<vmem>>, vector<1x1x128xf32>
    %187 = vector.shape_cast %186 : vector<1x1x128xf32> to vector<1x128xf32>
    %188 = vector.broadcast %187 : vector<1x128xf32> to vector<18x128xf32>
    %189 = arith.addf %185, %188 : vector<18x128xf32>
    %cst_50 = arith.constant 0.000000e+00 : f32
    %190 = vector.broadcast %cst_50 : f32 to vector<18x128xf32>
    %191 = arith.maximumf %189, %190 : vector<18x128xf32>
    %192 = arith.truncf %191 : vector<18x128xf32> to vector<18x128xbf16>
    %c0_51 = arith.constant 0 : index
    %c0_52 = arith.constant 0 : index
    %c0_53 = arith.constant 0 : index
    %193 = vector.load %arg14[%c0_51, %c0_52, %c0_53] : memref<1x128x32xbf16, #tpu.memory_space<vmem>>, vector<1x128x32xbf16>
    %194 = vector.shape_cast %193 : vector<1x128x32xbf16> to vector<128x32xbf16>
    %cst_54 = arith.constant dense<0.000000e+00> : vector<18x32xf32>
    %195 = tpu.matmul %192, %194, %cst_54 {dimension_numbers = #tpu.dot_dimension_numbers<[1], [0], [0], [1], [0, 0, 1, 1], [], []>} : vector<18x128xbf16>, vector<128x32xbf16>, vector<18x32xf32> -> vector<18x32xf32>
    %196 = arith.addf %181, %195 : vector<18x32xf32>
    %c0_55 = arith.constant 0 : index
    %c0_56 = arith.constant 0 : index
    %c0_57 = arith.constant 0 : index
    %197 = vector.load %arg15[%c0_55, %c0_56, %c0_57] : memref<1x1x32xf32, #tpu.memory_space<vmem>>, vector<1x1x32xf32>
    %198 = vector.shape_cast %197 : vector<1x1x32xf32> to vector<1x32xf32>
    %199 = vector.broadcast %198 : vector<1x32xf32> to vector<18x32xf32>
    %200 = arith.addf %196, %199 : vector<18x32xf32>
    %c0_58 = arith.constant 0 : index
    %c0_59 = arith.constant 0 : index
    %201 = vector.load %arg21[%c0_58, %c0_59] : memref<18x32xf32, #tpu.memory_space<vmem>>, vector<18x32xf32>
    tpu.vector_store %arg21[%c0_58, %c0_59], %200 {strides = array<i32>} : memref<18x32xf32, #tpu.memory_space<vmem>>, vector<18x32xf32>,
    %c1_i32 = arith.constant 1 : i32
    %202 = arith.cmpi eq, %arg1, %c1_i32 : i32
    %203 = arith.extui %202 : i1 to i32
    %c0_i32_60 = arith.constant 0 : i32
    %204 = arith.cmpi ne, %203, %c0_i32_60 : i32
    scf.if %204 {
      %205 = vector.extract_strided_slice %200 {offsets = [0, 0], sizes = [1, 32], strides = [1, 1]} : vector<18x32xf32> to vector<1x32xf32>
      %206 = vector.extract_strided_slice %200 {offsets = [9, 0], sizes = [1, 32], strides = [1, 1]} : vector<18x32xf32> to vector<1x32xf32>
      %207 = tpu.concatenate %205, %206 in 0 : vector<1x32xf32>, vector<1x32xf32> -> vector<2x32xf32>
      %c0_61 = arith.constant 0 : index
      %c0_62 = arith.constant 0 : index
      %208 = vector.load %arg16[%c0_61, %c0_62] : memref<1x32xf32, #tpu.memory_space<vmem>>, vector<1x32xf32>
      %c0_63 = arith.constant 0 : index
      %c0_64 = arith.constant 0 : index
      %209 = vector.load %arg17[%c0_63, %c0_64] : memref<1x32xf32, #tpu.memory_space<vmem>>, vector<1x32xf32>
      %cst_65 = arith.constant dense<0.000000e+00> : vector<2xf32>
      %210 = vector.multi_reduction <add>, %207, %cst_65 [1] : vector<2x32xf32> to vector<2xf32>
      %211 = vector.shape_cast %210 : vector<2xf32> to vector<2x1xf32>
      %cst_66 = arith.constant 3.200000e+01 : f32
      %212 = vector.broadcast %cst_66 : f32 to vector<2x1xf32>
      %213 = arith.divf %211, %212 : vector<2x1xf32>
      %214 = vector.broadcast %213 : vector<2x1xf32> to vector<2x32xf32>
      %215 = arith.subf %207, %214 : vector<2x32xf32>
      %216 = arith.mulf %215, %215 : vector<2x32xf32>
      %cst_67 = arith.constant dense<0.000000e+00> : vector<2xf32>
      %217 = vector.multi_reduction <add>, %216, %cst_67 [1] : vector<2x32xf32> to vector<2xf32>
      %218 = vector.shape_cast %217 : vector<2xf32> to vector<2x1xf32>
      %cst_68 = arith.constant 3.200000e+01 : f32
      %219 = vector.broadcast %cst_68 : f32 to vector<2x1xf32>
      %220 = arith.divf %218, %219 : vector<2x1xf32>
      %221 = vector.broadcast %213 : vector<2x1xf32> to vector<2x32xf32>
      %222 = arith.subf %207, %221 : vector<2x32xf32>
      %cst_69 = arith.constant 9.99999974E-6 : f32
      %223 = vector.broadcast %cst_69 : f32 to vector<2x1xf32>
      %224 = arith.addf %220, %223 : vector<2x1xf32>
      %225 = math.rsqrt %224 : vector<2x1xf32>
      %226 = vector.broadcast %225 : vector<2x1xf32> to vector<2x32xf32>
      %227 = arith.mulf %222, %226 : vector<2x32xf32>
      %228 = vector.broadcast %208 : vector<1x32xf32> to vector<2x32xf32>
      %229 = arith.mulf %227, %228 : vector<2x32xf32>
      %230 = vector.broadcast %209 : vector<1x32xf32> to vector<2x32xf32>
      %231 = arith.addf %229, %230 : vector<2x32xf32>
      %232 = arith.truncf %231 : vector<2x32xf32> to vector<2x32xbf16>
      %c0_70 = arith.constant 0 : index
      %c0_71 = arith.constant 0 : index
      %233 = vector.load %arg18[%c0_70, %c0_71] : memref<32x128xbf16, #tpu.memory_space<vmem>>, vector<32x128xbf16>
      %cst_72 = arith.constant dense<0.000000e+00> : vector<2x128xf32>
      %234 = tpu.matmul %232, %233, %cst_72 {dimension_numbers = #tpu.dot_dimension_numbers<[1], [0], [0], [1], [0, 0, 1, 1], [], []>} : vector<2x32xbf16>, vector<32x128xbf16>, vector<2x128xf32> -> vector<2x128xf32>
      %c0_73 = arith.constant 0 : index
      %c0_74 = arith.constant 0 : index
      %235 = vector.load %arg19[%c0_73, %c0_74] : memref<1x128xf32, #tpu.memory_space<vmem>>, vector<1x128xf32>
      %236 = vector.broadcast %235 : vector<1x128xf32> to vector<2x128xf32>
      %237 = arith.addf %234, %236 : vector<2x128xf32>
      %c0_75 = arith.constant 0 : index
      %c0_76 = arith.constant 0 : index
      %238 = vector.load %arg20[%c0_75, %c0_76] : memref<2x128xf32, #tpu.memory_space<vmem>>, vector<2x128xf32>
      tpu.vector_store %arg20[%c0_75, %c0_76], %237 {strides = array<i32>} : memref<2x128xf32, #tpu.memory_space<vmem>>, vector<2x128xf32>,
    } else {
    }
    return
  }
  func.func @transform_0(%arg0: i32, %arg1: i32) -> (i32, i32, i32) {
    %c0_i32 = arith.constant 0 : i32
    %c0_i32_0 = arith.constant 0 : i32
    %c0_i32_1 = arith.constant 0 : i32
    return %arg0, %c0_i32, %c0_i32_0 : i32, i32, i32
  }
  func.func @transform_1(%arg0: i32, %arg1: i32) -> (i32, i32) {
    %c0_i32 = arith.constant 0 : i32
    %c0_i32_0 = arith.constant 0 : i32
    %c0_i32_1 = arith.constant 0 : i32
    return %c0_i32, %c0_i32_0 : i32, i32
  }
  func.func @transform_2(%arg0: i32, %arg1: i32) -> (i32, i32) {
    %c0_i32 = arith.constant 0 : i32
    %c0_i32_0 = arith.constant 0 : i32
    %c0_i32_1 = arith.constant 0 : i32
    return %c0_i32, %c0_i32_0 : i32, i32
  }
  func.func @transform_3(%arg0: i32, %arg1: i32) -> (i32, i32, i32) {
    %c0_i32 = arith.constant 0 : i32
    %c0_i32_0 = arith.constant 0 : i32
    %c0_i32_1 = arith.constant 0 : i32
    return %arg1, %c0_i32, %c0_i32_0 : i32, i32, i32
  }
  func.func @transform_4(%arg0: i32, %arg1: i32) -> (i32, i32, i32) {
    %c0_i32 = arith.constant 0 : i32
    %c0_i32_0 = arith.constant 0 : i32
    %c0_i32_1 = arith.constant 0 : i32
    return %arg1, %c0_i32, %c0_i32_0 : i32, i32, i32
  }
  func.func @transform_5(%arg0: i32, %arg1: i32) -> (i32, i32, i32) {
    %c0_i32 = arith.constant 0 : i32
    %c0_i32_0 = arith.constant 0 : i32
    %c0_i32_1 = arith.constant 0 : i32
    return %arg1, %c0_i32, %c0_i32_0 : i32, i32, i32
  }
  func.func @transform_6(%arg0: i32, %arg1: i32) -> (i32, i32, i32) {
    %c0_i32 = arith.constant 0 : i32
    %c0_i32_0 = arith.constant 0 : i32
    %c0_i32_1 = arith.constant 0 : i32
    return %arg1, %c0_i32, %c0_i32_0 : i32, i32, i32
  }
  func.func @transform_7(%arg0: i32, %arg1: i32) -> (i32, i32, i32) {
    %c0_i32 = arith.constant 0 : i32
    %c0_i32_0 = arith.constant 0 : i32
    %c0_i32_1 = arith.constant 0 : i32
    return %arg1, %c0_i32, %c0_i32_0 : i32, i32, i32
  }
  func.func @transform_8(%arg0: i32, %arg1: i32) -> (i32, i32, i32) {
    %c0_i32 = arith.constant 0 : i32
    %c0_i32_0 = arith.constant 0 : i32
    %c0_i32_1 = arith.constant 0 : i32
    return %arg1, %c0_i32, %c0_i32_0 : i32, i32, i32
  }
  func.func @transform_9(%arg0: i32, %arg1: i32) -> (i32, i32, i32) {
    %c0_i32 = arith.constant 0 : i32
    %c0_i32_0 = arith.constant 0 : i32
    %c0_i32_1 = arith.constant 0 : i32
    return %arg1, %c0_i32, %c0_i32_0 : i32, i32, i32
  }
  func.func @transform_10(%arg0: i32, %arg1: i32) -> (i32, i32, i32) {
    %c0_i32 = arith.constant 0 : i32
    %c0_i32_0 = arith.constant 0 : i32
    %c0_i32_1 = arith.constant 0 : i32
    return %arg1, %c0_i32, %c0_i32_0 : i32, i32, i32
  }
  func.func @transform_11(%arg0: i32, %arg1: i32) -> (i32, i32, i32) {
    %c0_i32 = arith.constant 0 : i32
    %c0_i32_0 = arith.constant 0 : i32
    %c0_i32_1 = arith.constant 0 : i32
    return %arg1, %c0_i32, %c0_i32_0 : i32, i32, i32
  }
  func.func @transform_12(%arg0: i32, %arg1: i32) -> (i32, i32, i32) {
    %c0_i32 = arith.constant 0 : i32
    %c0_i32_0 = arith.constant 0 : i32
    %c0_i32_1 = arith.constant 0 : i32
    return %arg1, %c0_i32, %c0_i32_0 : i32, i32, i32
  }
  func.func @transform_13(%arg0: i32, %arg1: i32) -> (i32, i32, i32) {
    %c0_i32 = arith.constant 0 : i32
    %c0_i32_0 = arith.constant 0 : i32
    %c0_i32_1 = arith.constant 0 : i32
    return %arg1, %c0_i32, %c0_i32_0 : i32, i32, i32
  }
  func.func @transform_14(%arg0: i32, %arg1: i32) -> (i32, i32) {
    %c0_i32 = arith.constant 0 : i32
    %c0_i32_0 = arith.constant 0 : i32
    %c0_i32_1 = arith.constant 0 : i32
    return %c0_i32, %c0_i32_0 : i32, i32
  }
  func.func @transform_15(%arg0: i32, %arg1: i32) -> (i32, i32) {
    %c0_i32 = arith.constant 0 : i32
    %c0_i32_0 = arith.constant 0 : i32
    %c0_i32_1 = arith.constant 0 : i32
    return %c0_i32, %c0_i32_0 : i32, i32
  }
  func.func @transform_16(%arg0: i32, %arg1: i32) -> (i32, i32) {
    %c0_i32 = arith.constant 0 : i32
    %c0_i32_0 = arith.constant 0 : i32
    %c0_i32_1 = arith.constant 0 : i32
    return %c0_i32, %c0_i32_0 : i32, i32
  }
  func.func @transform_17(%arg0: i32, %arg1: i32) -> (i32, i32) {
    %c0_i32 = arith.constant 0 : i32
    %c0_i32_0 = arith.constant 0 : i32
    %c0_i32_1 = arith.constant 0 : i32
    return %c0_i32, %c0_i32_0 : i32, i32
  }
  func.func @transform_18(%arg0: i32, %arg1: i32) -> (i32, i32) {
    %c0_i32 = arith.constant 0 : i32
    %c0_i32_0 = arith.constant 0 : i32
    return %arg0, %c0_i32 : i32, i32
  }
}

</mosaic_0001>

<bundles_post_ra>
// kernel: transformer_classifier.1
= control target key start
LH: loop header
LB: loop body
LE: loop exit
PB: predicated region body
PF: predicated region fallthrough
CT: control target
= control target key end

     0   :  { %s5715_s0 = inlined_call_operand.hbm [shape: f32[2,8,32], index: 0, kind: input, shape index: {}]   ;;  %s5716_s1 = inlined_call_operand.hbm [shape: f32[1,32], index: 1, kind: input, shape index: {}]   ;;  %s5717_s2 = inlined_call_operand.hbm [shape: f32[9,32], index: 2, kind: input, shape index: {}]   ;;  %s5718_s3 = inlined_call_operand.hbm [shape: f32[2,1,32], index: 3, kind: input, shape index: {}]   ;;  %s5719_s4 = inlined_call_operand.hbm [shape: f32[2,1,32], index: 4, kind: input, shape index: {}]   ;;  %s5720_s5 = inlined_call_operand.hbm [shape: bf16[2,32,96], index: 5, kind: input, shape index: {}]   ;;  %s5721_s6 = inlined_call_operand.hbm [shape: bf16[2,32,32], index: 6, kind: input, shape index: {}]   ;;  %s5722_s7 = inlined_call_operand.hbm [shape: f32[2,1,32], index: 7, kind: input, shape index: {}]   ;;  %s5723_s8 = inlined_call_operand.hbm [shape: f32[2,1,32], index: 8, kind: input, shape index: {}]   ;;  %s5724_s9 = inlined_call_operand.hbm [shape: f32[2,1,32], index: 9, kind: input, shape index: {}]   ;;  %s5725_s10 = inlined_call_operand.hbm [shape: bf16[2,32,128], index: 10, kind: input, shape index: {}]   ;;  %s5726_s11 = inlined_call_operand.hbm [shape: f32[2,1,128], index: 11, kind: input, shape index: {}]   ;;  %s5727_s12 = inlined_call_operand.hbm [shape: bf16[2,128,32], index: 12, kind: input, shape index: {}]   ;;  %s5728_s13 = inlined_call_operand.hbm [shape: f32[2,1,32], index: 13, kind: input, shape index: {}]   ;;  %s5729_s14 = inlined_call_operand.hbm [shape: f32[1,32], index: 14, kind: input, shape index: {}]   ;;  %s5730_s15 = inlined_call_operand.hbm [shape: f32[1,32], index: 15, kind: input, shape index: {}]   ;;  %s5731_s16 = inlined_call_operand.hbm [shape: bf16[32,128], index: 16, kind: input, shape index: {}]   ;;  %s5732_s17 = inlined_call_operand.hbm [shape: f32[1,128], index: 17, kind: input, shape index: {}]   ;;  %s5733_s18 = inlined_call_operand.hbm [shape: f32[2,128], index: 18, kind: output, shape index: {}]  }
   0x1   :  { %5776 = sst [smem:[#allocation54_spill]] %s5715_s0 }
   0x2   :  { %5777 = sst [smem:[#allocation55_spill]] %s5716_s1 }
   0x3   :  { %5778 = sst [smem:[#allocation56_spill]] %s5717_s2 }
   0x4   :  { %5779 = sst [smem:[#allocation57_spill]] %s5718_s3 }
   0x5   :  { %5780 = sst [smem:[#allocation58_spill]] %s5719_s4 }
   0x6   :  { %5781 = sst [smem:[#allocation59_spill]] %s5720_s5 }
   0x7   :  { %5782 = sst [smem:[#allocation60_spill]] %s5721_s6 }
   0x8   :  { %5783 = sst [smem:[#allocation61_spill]] %s5722_s7 }
   0x9   :  { %5784 = sst [smem:[#allocation62_spill]] %s5723_s8 }
   0xa   :  { %5785 = sst [smem:[#allocation63_spill]] %s5724_s9 }
   0xb   :  { %5786 = sst [smem:[#allocation64_spill]] %s5725_s10 }
   0xc   :  { %5787 = sst [smem:[#allocation65_spill]] %s5726_s11 }
   0xd   :  { %5788 = sst [smem:[#allocation66_spill]] %s5727_s12 }
   0xe   :  { %5789 = sst [smem:[#allocation67_spill]] %s5728_s13 }
   0xf   :  { %5790 = sst [smem:[#allocation68_spill]] %s5729_s14 }
  0x10   :  { %5791 = sst [smem:[#allocation69_spill]] %s5730_s15 }
  0x11   :  { %5792 = sst [smem:[#allocation70_spill]] %s5733_s18 }
  0x12   :  { %23 = vsyncpa [#allocation4], 0 }
  0x13   :  { %24 = vsyncpa [#allocation7], 0 }
  0x14   :  { %25 = vsyncpa [#allocation10], 0 }
  0x15   :  { %27 = vsyncpa [#allocation10 + $0x1], 0 }
  0x16   :  { %28 = vsyncpa [#allocation13], 0 }
  0x17   :  { %30 = vsyncpa [#allocation13 + $0x1], 0 }
  0x18   :  { %31 = vsyncpa [#allocation16], 0 }
  0x19   :  { %33 = vsyncpa [#allocation16 + $0x1], 0 }
  0x1a   :  { %34 = vsyncpa [#allocation19], 0 }
  0x1b   :  { %36 = vsyncpa [#allocation19 + $0x1], 0 }
  0x1c   :  { %37 = vsyncpa [#allocation22], 0 }
  0x1d   :  { %39 = vsyncpa [#allocation22 + $0x1], 0 }
  0x1e   :  { %40 = vsyncpa [#allocation25], 0 }
  0x1f   :  { %42 = vsyncpa [#allocation25 + $0x1], 0 }
  0x20   :  { %43 = vsyncpa [#allocation28], 0 }
  0x21   :  { %44 = vsyncpa [#allocation31], 0 }
  0x22   :  { %45 = vsyncpa [#allocation5], 0  ;;  %s4617_s27 = smov 0   ;;  %s4619_s28 = smov 0  }
  0x23   :  { %s4621_s29 = smov 0   ;;  %s4623_s30 = smov 0  }
  0x24   :  { %s4625_s0 = smov 0   ;;  %s4627_s19 = smov 0  }
  0x25 LB: > { %5793 = sst [smem:[#allocation45_spill]] %s4468_s28  ;;  %s4486_s1 = smov [#allocation6]   ;;  %s4484_s19 = sphi %s4627_s19, %s51_s19   ;;  %s4480_s0 = sphi %s4625_s0, %s5873_s0   ;;  %s4476_s30 = sphi %s4623_s30, %s5872_s30   ;;  %s4472_s29 = sphi %s4621_s29, %s5870_s29   ;;  %s4468_s28 = sphi %s4619_s28, %s5869_s28   ;;  %s4464_s27 = sphi %s4617_s27, %s5868_s27  }
  0x26   : > { %5794 = sst [smem:[#allocation46_spill]] %s4472_s29  ;;  %s561_s20 = sshll.u32 %s4486_s1, 4  ;;  %s562_s20 = int_to_ptr.vmem [resolvable:$true] %s561_s20 }
  0x27   : > { %5795 = sst [smem:[#allocation47_spill]] %s4476_s30  ;;  %s4648_s21 = sadd.s32 4294967295, %s4484_s19  }
  0x28   : > { %5796 = sst [smem:[#allocation48_spill]] %s4484_s19  ;;  %p3207_p0 = scmp.ge.s32.totalorder %s4484_s19, 1 }
  0x29   : > { %5797 = sst [smem:[#allocation49_spill]] %s4648_s21  ;;  %p5743_p1 = scmp.eq.s32.totalorder %s4648_s21, 0 }
  0x2a   : > { %p532_p2 = scmp.lt.s32.totalorder %s4484_s19, 3  ;;  %s4487_s2 = smov [#allocation26]  }
  0x2b   : > { %s585_s23 = sshll.u32 %s4487_s2, 4  ;;  %s4488_s24 = smov [#allocation27]   ;;  %s4659_s23 = int_to_ptr.vmem [resolvable:$true] %s585_s23 }
  0x2c   : > { %p4653_p3 = pnand %p3207_p0, %p532_p2  ;;  %s596_s25 = sshll.u32 %s4488_s24, 4  ;;  %s4667_s25 = int_to_ptr.vmem [resolvable:$true] %s596_s25 }
  0x2d   : > { %s5801_s30 = sld [smem:[#allocation55_spill]] }
  0x2e   : > { %s5798_s22 = scalar_select %p4653_p3, 1, 0 }
  0x2f   : > { %p3565_p4 = pneg %p4653_p3 }
  0x30   : > { %5799 = sst [smem:[#allocation50_spill]] %s5798_s22 }
  0x31   : > { %p4663_p5 = pnand %p3565_p4, %p5743_p1 }
  0x33   : > { %s5800_s26 = scalar_select %p4663_p5, 1, 0 }
  0x34   : > { %s5802_s13 = smov %s5801_s30  ;;  %s3838_s12 = scalar_lea.hbm %s5801_s30, 16 }
  0x35   : > { %p3839_p6 = scmp.ne.s32.totalorder %s5802_s13, %s3838_s12  ;;  %p4677_p7 = pneg %p4663_p5 }
  0x36   : > { %p3845_p10 = scmp.lt.u32.totalorder %s3838_s12, %s5802_s13 }
  0x37   : > { %s5803_s2 = scalar_select %p4677_p7, 1, 0 }
  0x38   : > { %p3841_p8 = pnand %p4677_p7, %p3839_p6 }
  0x3a   : > { %p3842_p9 = pneg %p3841_p8 }
  0x3c   : > { %p3847_p11 = pnand %p3845_p10, %p3842_p9 }
  0x3e   : > { %3850 = shalt.err (!%p3847_p11)
}
  0x3f   : > { %s3851_s18 = scalar_lea.vmem %s562_s20, 16  ;;  %s3858_s10 = scalar_lea.vmem %s562_s20, 32 }
  0x40   : > { %p3852_p12 = scmp.ne.s32.totalorder %s562_s20, %s3851_s18  ;;  %p3859_p2 = scmp.lt.s32.totalorder %s562_s20, %s562_s20 }
  0x41   : > { %p3860_p4 = scmp.lt.s32.totalorder %s3858_s10, %s3851_s18 }
  0x42   : > { %p3854_p13 = pnand %p3852_p12, %p4677_p7 }
  0x43   : > { %p3861_p1 = por %p3860_p4, %p3859_p2 }
  0x44   : > { %p3855_p0 = pneg %p3854_p13 }
  0x46   : > { %p3862_p3 = pnand %p3861_p1, %p3855_p0 }
  0x48   : > { %3865 = shalt.err (!%p3862_p3)
}
  0x49   : > { %3571 = dma.hbm_to_vmem [thread:$0]  (!%p4663_p5), %s5802_s13, 16, %s562_s20, [#allocation7]  }
  0x4a   : > { %s5804_s14 = sld [smem:[#allocation68_spill]] }
  0x50   : > { %s3866_s1 = scalar_lea.hbm %s5804_s14, 16 }
  0x51   : > { %p3867_p6 = scmp.ne.s32.totalorder %s5804_s14, %s3866_s1  ;;  %p3873_p1 = scmp.lt.u32.totalorder %s3866_s1, %s5804_s14 }
  0x53   : > { %p3869_p8 = pnand %p3867_p6, %p4677_p7 }
  0x55   : > { %p3870_p9 = pneg %p3869_p8 }
  0x57   : > { %p3875_p3 = pnand %p3873_p1, %p3870_p9 }
  0x59   : > { %3878 = shalt.err (!%p3875_p3)
}
  0x5a   : > { %s3879_s20 = scalar_lea.vmem %s4659_s23, 16  ;;  %s3886_s6 = scalar_lea.vmem %s4659_s23, 32 }
  0x5b   : > { %p3880_p10 = scmp.ne.s32.totalorder %s4659_s23, %s3879_s20  ;;  %p3887_p13 = scmp.lt.s32.totalorder %s4659_s23, %s4659_s23 }
  0x5c   : > { %p3888_p0 = scmp.lt.s32.totalorder %s3886_s6, %s3879_s20 }
  0x5d   : > { %p3882_p11 = pnand %p3880_p10, %p4677_p7 }
  0x5e   : > { %p3889_p2 = por %p3888_p0, %p3887_p13 }
  0x5f   : > { %p3883_p12 = pneg %p3882_p11 }
  0x61   : > { %p3890_p4 = pnand %p3889_p2, %p3883_p12 }
  0x63   : > { %3893 = shalt.err (!%p3890_p4)
}
  0x64   : > { %3577 = dma.hbm_to_vmem [thread:$0]  (!%p4663_p5), %s5804_s14, 16, %s4659_s23, [#allocation25]  }
  0x65   : > { %s5805_s15 = sld [smem:[#allocation69_spill]] }
  0x6b   : > { %s3894_s1 = scalar_lea.hbm %s5805_s15, 16 }
  0x6c   : > { %p3895_p6 = scmp.ne.s32.totalorder %s5805_s15, %s3894_s1  ;;  %p3901_p1 = scmp.lt.u32.totalorder %s3894_s1, %s5805_s15 }
  0x6e   : > { %p3897_p8 = pnand %p3895_p6, %p4677_p7 }
  0x70   : > { %p3898_p9 = pneg %p3897_p8 }
  0x72   : > { %p3903_p3 = pnand %p3901_p1, %p3898_p9 }
  0x74   : > { %3906 = shalt.err (!%p3903_p3)
}
  0x75   : > { %s3907_s23 = scalar_lea.vmem %s4667_s25, 16  ;;  %s3914_s6 = scalar_lea.vmem %s4667_s25, 32 }
  0x76   : > { %p3908_p10 = scmp.ne.s32.totalorder %s4667_s25, %s3907_s23  ;;  %p3915_p13 = scmp.lt.s32.totalorder %s4667_s25, %s4667_s25 }
  0x77   : > { %p3916_p0 = scmp.lt.s32.totalorder %s3914_s6, %s3907_s23 }
  0x78   : > { %p3910_p11 = pnand %p3908_p10, %p4677_p7 }
  0x79   : > { %p3917_p2 = por %p3916_p0, %p3915_p13 }
  0x7a   : > { %p3911_p12 = pneg %p3910_p11 }
  0x7c   : > { %p3918_p4 = pnand %p3917_p2, %p3911_p12 }
  0x7e   : > { %3921 = shalt.err (!%p3918_p4)
}
  0x7f   : > { %3580 = dma.hbm_to_vmem [thread:$0]  (!%p4663_p5), %s5805_s15, 16, %s4667_s25, [#allocation28]  }
  0x80   : > { %s60_s8 = sadd.s32 1, %s4480_s0  ;;  %s138_s12 = sadd.s32 1, %s4472_s29 }
  0x81   : > { %p61_p6 = scmp.ge.s32.totalorder %s60_s8, 2  ;;  %p145_p8 = scmp.ne.s32.totalorder %s4472_s29, %s4468_s28 }
  0x82   : > { %p146_p9 = scmp.eq.s32.totalorder %s4484_s19, 0  ;;  %p151_p3 = scmp.ne.s32.totalorder %s4468_s28, %s4464_s27 }
  0x83   : > { %s5875_s8 = smov (%p61_p6, %s60_s8), 0  ;;  %p3628_p10 = scmp.lt.s32.totalorder %s4484_s19, 2 }
  0x84   : > { %5806 = sst [smem:[#allocation51_spill]] %s5875_s8  ;;  %p4748_p1 = por %p146_p9, %p145_p8 }
  0x85   : > { %s135_s24 = ssub.s32 %s4480_s0, %s5875_s8  ;;  %p5808_p12 = scmp.eq.s32.totalorder %s4648_s21, 0 }
  0x86   : > { %p136_p11 = scmp.eq.s32.totalorder %s135_s24, 0  ;;  %s4764_s18 = sand.u32 1, %s4484_s19  }
  0x87   : > { %p4759_p13 = por %p5808_p12, %p151_p3  ;;  %s4767_s10 = sand.u32 1, %s4472_s29  }
  0x88   : > { %s4770_s20 = scalar_select %p136_p11, %s4472_s29, %s138_s12  }
  0x89   : > { %s5809_s25 = scalar_select %p4759_p13, 1, 0 }
  0x8a   : > { %5811 = sst [smem:[#allocation53_spill]] %s4770_s20  ;;  %s4773_s23 = sshll.u32 %s4480_s0, 4 }
  0x8b   : > { %5810 = sst [smem:[#allocation52_spill]] %s5809_s25  ;;  %s634_s27 = scalar_lea.vmem [#allocation9], %s4767_s10 }
  0x8c   : > { %s641_s6 = sshll.u32 %s634_s27, 4  ;;  %s5812_s3 = sld [smem:[#allocation57_spill]]  ;;  %s4782_s6 = int_to_ptr.vmem [resolvable:$true] %s641_s6 }
  0x8d   : > { %p4786_p0 = pnand %p3628_p10, %p4748_p1  ;;  %s4791_s13 = sshll.u32 %s4767_s10, 4 }
  0x8f   : > { %s5813_s12 = scalar_select %p4786_p0, 1, 0 }
  0x90   : > { %p4798_p4 = pneg %p4786_p0 }
  0x92   : > { %s4780_s24 = scalar_lea.hbm %s5812_s3, %s4773_s23  ;;  %s3927_s15 = scalar_lea.hbm %s5812_s3, 32 }
  0x93   : > { %s3922_s14 = scalar_lea.hbm %s4780_s24, 16  ;;  %p3928_p9 = scmp.lt.u32.totalorder %s4780_s24, %s5812_s3 }
  0x94   : > { %p3923_p2 = scmp.ne.s32.totalorder %s4780_s24, %s3922_s14  ;;  %p3929_p1 = scmp.lt.u32.totalorder %s3927_s15, %s3922_s14 }
  0x95   : > { %s5814_s30 = scalar_select %p4798_p4, 1, 0 }
  0x96   : > { %p3925_p6 = pnand %p4798_p4, %p3923_p2  ;;  %p3930_p3 = por %p3929_p1, %p3928_p9 }
  0x97   : > { %p3931_p10 = scmp.lt.u32.totalorder %s3922_s14, %s4780_s24 }
  0x98   : > { %p3926_p8 = pneg %p3925_p6 }
  0x99   : > { %p3932_p11 = por %p3931_p10, %p3930_p3 }
  0x9b   : > { %p3933_p12 = pnand %p3932_p11, %p3926_p8 }
  0x9d   : > { %3936 = shalt.err (!%p3933_p12)
}
  0x9e   : > { %s3937_s27 = scalar_lea.vmem %s4782_s6, 16  ;;  %s4489_s1 = smov [#allocation9]  }
  0x9f   : > { %p3938_p2 = scmp.ne.s32.totalorder %s4782_s6, %s3937_s27  ;;  %s3942_s22 = sshll.u32 %s4489_s1, 4  ;;  %s3943_s22 = int_to_ptr.vmem [resolvable:$false] %s3942_s22 }
  0xa0   : > { %s3944_s8 = scalar_lea.vmem %s3943_s22, 32  ;;  %p3945_p5 = scmp.lt.s32.totalorder %s4782_s6, %s3943_s22 }
  0xa1   : > { %p3940_p6 = pnand %p3938_p2, %p4798_p4  ;;  %p3946_p7 = scmp.lt.s32.totalorder %s3944_s8, %s3937_s27 }
  0xa3   : > { %p3941_p13 = pneg %p3940_p6  ;;  %p3947_p9 = por %p3946_p7, %p3945_p5 }
  0xa5   : > { %p3948_p1 = pnand %p3947_p9, %p3941_p13 }
  0xa7   : > { %3951 = shalt.err (!%p3948_p1)
}
  0xa8   : > { %s5815_s14 = scalar_lea.sflag [#allocation10], %s4764_s18  ;;  %s4824_s15 = sshll.u32 %s4480_s0, 8 }
  0xa9   : > { %3590 = dma.hbm_to_vmem [thread:$0]  (!%p4786_p0), %s4780_s24, 16, %s4782_s6, %s5815_s14  }
  0xaa   : > { %s5816_s5 = sld [smem:[#allocation59_spill]]  ;;  %s669_s22 = scalar_lea.vmem [#allocation12], %s4791_s13 }
  0xab   : > { %s676_s8 = sshll.u32 %s669_s22, 4  ;;  %s5757_s3 = scalar_lea.sflag [#allocation13], %s4764_s18  ;;  %s4833_s8 = int_to_ptr.vmem [resolvable:$true] %s676_s8 }
  0xb0   : > { %s4830_s27 = scalar_lea.hbm %s5816_s5, %s4824_s15  ;;  %s3957_s14 = scalar_lea.hbm %s5816_s5, 512 }
  0xb1   : > { %s3952_s29 = scalar_lea.hbm %s4830_s27, 256  ;;  %p3958_p8 = scmp.lt.u32.totalorder %s4830_s27, %s5816_s5 }
  0xb2   : > { %p3953_p5 = scmp.ne.s32.totalorder %s4830_s27, %s3952_s29  ;;  %p3959_p3 = scmp.lt.u32.totalorder %s3957_s14, %s3952_s29 }
  0xb3   : > { %p3961_p11 = scmp.lt.u32.totalorder %s3952_s29, %s4830_s27 }
  0xb4   : > { %p3955_p7 = pnand %p3953_p5, %p4798_p4  ;;  %p3960_p10 = por %p3959_p3, %p3958_p8 }
  0xb6   : > { %p3956_p13 = pneg %p3955_p7  ;;  %p3962_p12 = por %p3961_p11, %p3960_p10 }
  0xb8   : > { %p3963_p2 = pnand %p3962_p12, %p3956_p13 }
  0xba   : > { %3966 = shalt.err (!%p3963_p2)
}
  0xbb   : > { %s3967_s22 = scalar_lea.vmem %s4833_s8, 256  ;;  %s4490_s6 = smov [#allocation12]  }
  0xbc   : > { %p3968_p6 = scmp.ne.s32.totalorder %s4833_s8, %s3967_s22  ;;  %s3972_s24 = sshll.u32 %s4490_s6, 4  ;;  %s3973_s24 = int_to_ptr.vmem [resolvable:$false] %s3972_s24 }
  0xbd   : > { %s3974_s20 = scalar_lea.vmem %s3973_s24, 512  ;;  %p3975_p5 = scmp.lt.s32.totalorder %s4833_s8, %s3973_s24 }
  0xbe   : > { %p3970_p9 = pnand %p3968_p6, %p4798_p4  ;;  %p3976_p7 = scmp.lt.s32.totalorder %s3974_s20, %s3967_s22 }
  0xc0   : > { %p3971_p1 = pneg %p3970_p9  ;;  %p3977_p8 = por %p3976_p7, %p3975_p5 }
  0xc2   : > { %p3978_p3 = pnand %p3977_p8, %p3971_p1 }
  0xc4   : > { %3981 = shalt.err (!%p3978_p3)
}
  0xc5   : > { %s5758_s29 = smov 64   ;;  %s5764_s14 = smov 4  }
  0xc6   : > { %3596 = dma.hbm_to_vmem [thread:$0]  (!%p4786_p0), %s4830_s27, 256, %s4833_s8, %s5757_s3, %s5758_s29, %s5758_s29, %s5764_s14  }
  0xc7   : > { %s5817_s7 = sld [smem:[#allocation61_spill]]  ;;  %s710_s24 = scalar_lea.vmem [#allocation15], %s4767_s10 }
  0xc8   : > { %s717_s20 = sshll.u32 %s710_s24, 4  ;;  %s5762_s5 = scalar_lea.sflag [#allocation16], %s4764_s18  ;;  %s718_s20 = int_to_ptr.vmem [resolvable:$true] %s717_s20 }
  0xcd   : > { %s4866_s6 = scalar_lea.hbm %s5817_s7, %s4773_s23  ;;  %s3987_s8 = scalar_lea.hbm %s5817_s7, 32 }
  0xce   : > { %s3982_s19 = scalar_lea.hbm %s4866_s6, 16  ;;  %p3988_p12 = scmp.lt.u32.totalorder %s4866_s6, %s5817_s7 }
  0xcf   : > { %p3983_p13 = scmp.ne.s32.totalorder %s4866_s6, %s3982_s19  ;;  %p3989_p2 = scmp.lt.u32.totalorder %s3987_s8, %s3982_s19 }
  0xd0   : > { %p3991_p9 = scmp.lt.u32.totalorder %s3982_s19, %s4866_s6 }
  0xd1   : > { %p3985_p10 = pnand %p3983_p13, %p4798_p4  ;;  %p3990_p6 = por %p3989_p2, %p3988_p12 }
  0xd3   : > { %p3986_p11 = pneg %p3985_p10  ;;  %p3992_p1 = por %p3991_p9, %p3990_p6 }
  0xd5   : > { %p3993_p5 = pnand %p3992_p1, %p3986_p11 }
  0xd7   : > { %3996 = shalt.err (!%p3993_p5)
}
  0xd8   : > { %s3997_s24 = scalar_lea.vmem %s718_s20, 16  ;;  %s4493_s3 = smov [#allocation15]  }
  0xd9   : > { %p3998_p7 = scmp.ne.s32.totalorder %s718_s20, %s3997_s24  ;;  %s4002_s29 = sshll.u32 %s4493_s3, 4  ;;  %s4003_s29 = int_to_ptr.vmem [resolvable:$false] %s4002_s29 }
  0xda   : > { %s4004_s25 = scalar_lea.vmem %s4003_s29, 32  ;;  %p4005_p13 = scmp.lt.s32.totalorder %s718_s20, %s4003_s29 }
  0xdb   : > { %p4000_p8 = pnand %p3998_p7, %p4798_p4  ;;  %p4006_p10 = scmp.lt.s32.totalorder %s4004_s25, %s3997_s24 }
  0xdd   : > { %p4001_p3 = pneg %p4000_p8  ;;  %p4007_p0 = por %p4006_p10, %p4005_p13 }
  0xdf   : > { %p4008_p2 = pnand %p4007_p0, %p4001_p3 }
  0xe1   : > { %4011 = shalt.err (!%p4008_p2)
}
  0xe2   : > { %p5818_p12 = scmp.ne.s32.totalorder %s5813_s12, 0  ;;  %s5819_s9 = sld [smem:[#allocation63_spill]] }
  0xe3   : > { %s744_s29 = scalar_lea.vmem [#allocation18], %s4767_s10  ;;  %s5763_s1 = scalar_lea.sflag [#allocation19], %s4764_s18 }
  0xe4   : > { %3602 = dma.hbm_to_vmem [thread:$0]  (!%p5818_p12), %s4866_s6, 16, %s718_s20, %s5762_s5  }
  0xe5   : > { %s751_s8 = sshll.u32 %s744_s29, 4  ;;  %s752_s8 = int_to_ptr.vmem [resolvable:$true] %s751_s8 }
  0xe8   : > { %s4893_s3 = scalar_lea.hbm %s5819_s9, %s4773_s23  ;;  %s4017_s20 = scalar_lea.hbm %s5819_s9, 32 }
  0xe9   : > { %s4012_s22 = scalar_lea.hbm %s4893_s3, 16  ;;  %p4018_p9 = scmp.lt.u32.totalorder %s4893_s3, %s5819_s9 }
  0xea   : > { %p4013_p0 = scmp.ne.s32.totalorder %s4893_s3, %s4012_s22  ;;  %p4019_p1 = scmp.lt.u32.totalorder %s4017_s20, %s4012_s22 }
  0xeb   : > { %p4021_p7 = scmp.lt.u32.totalorder %s4012_s22, %s4893_s3 }
  0xec   : > { %p4015_p11 = pnand %p4013_p0, %p4798_p4  ;;  %p4020_p5 = por %p4019_p1, %p4018_p9 }
  0xee   : > { %p4016_p6 = pneg %p4015_p11  ;;  %p4022_p8 = por %p4021_p7, %p4020_p5 }
  0xf0   : > { %p4023_p3 = pnand %p4022_p8, %p4016_p6 }
  0xf2   : > { %4026 = shalt.err (!%p4023_p3)
}
  0xf3   : > { %s4027_s27 = scalar_lea.vmem %s752_s8, 16  ;;  %s4494_s29 = smov [#allocation18]  }
  0xf4   : > { %p4028_p13 = scmp.ne.s32.totalorder %s752_s8, %s4027_s27  ;;  %s4032_s5 = sshll.u32 %s4494_s29, 4  ;;  %s4033_s5 = int_to_ptr.vmem [resolvable:$false] %s4032_s5 }
  0xf5   : > { %s4034_s24 = scalar_lea.vmem %s4033_s5, 32  ;;  %p4035_p0 = scmp.lt.s32.totalorder %s752_s8, %s4033_s5 }
  0xf6   : > { %p4030_p10 = pnand %p4028_p13, %p4798_p4  ;;  %p4036_p11 = scmp.lt.s32.totalorder %s4034_s24, %s4027_s27 }
  0xf8   : > { %p4031_p2 = pneg %p4030_p10  ;;  %p4037_p12 = por %p4036_p11, %p4035_p0 }
  0xfa   : > { %p4038_p1 = pnand %p4037_p12, %p4031_p2 }
  0xfc   : > { %4041 = shalt.err (!%p4038_p1)
}
  0xfd   : > { %p5820_p9 = scmp.ne.s32.totalorder %s5813_s12, 0  ;;  %s5821_s11 = sld [smem:[#allocation65_spill]] }
  0xfe   : > { %s782_s5 = scalar_lea.vmem [#allocation21], %s4767_s10  ;;  %s5766_s19 = scalar_lea.sflag [#allocation22], %s4764_s18 }
  0xff   : > { %3608 = dma.hbm_to_vmem [thread:$0]  (!%p5820_p9), %s4893_s3, 16, %s752_s8, %s5763_s1  }
 0x100   : > { %s789_s25 = sshll.u32 %s782_s5, 4  ;;  %s790_s25 = int_to_ptr.vmem [resolvable:$true] %s789_s25 }
 0x103   : > { %s4920_s20 = scalar_lea.hbm %s5821_s11, %s4773_s23  ;;  %s4047_s8 = scalar_lea.hbm %s5821_s11, 32 }
 0x104   : > { %s4042_s27 = scalar_lea.hbm %s4920_s20, 16  ;;  %p4048_p7 = scmp.lt.u32.totalorder %s4920_s20, %s5821_s11 }
 0x105   : > { %p4043_p12 = scmp.ne.s32.totalorder %s4920_s20, %s4042_s27  ;;  %p4049_p8 = scmp.lt.u32.totalorder %s4047_s8, %s4042_s27 }
 0x106   : > { %p4051_p13 = scmp.lt.u32.totalorder %s4042_s27, %s4920_s20 }
 0x107   : > { %p4045_p6 = pnand %p4043_p12, %p4798_p4  ;;  %p4050_p3 = por %p4049_p8, %p4048_p7 }
 0x109   : > { %p4046_p5 = pneg %p4045_p6  ;;  %p4052_p10 = por %p4051_p13, %p4050_p3 }
 0x10b   : > { %p4053_p2 = pnand %p4052_p10, %p4046_p5 }
 0x10d   : > { %4056 = shalt.err (!%p4053_p2)
}
 0x10e   : > { %s4057_s6 = scalar_lea.vmem %s790_s25, 16  ;;  %s4495_s5 = smov [#allocation21]  }
 0x10f   : > { %p4058_p0 = scmp.ne.s32.totalorder %s790_s25, %s4057_s6  ;;  %s4062_s1 = sshll.u32 %s4495_s5, 4  ;;  %s4063_s1 = int_to_ptr.vmem [resolvable:$false] %s4062_s1 }
 0x110   : > { %s4064_s29 = scalar_lea.vmem %s4063_s1, 32  ;;  %p4065_p12 = scmp.lt.s32.totalorder %s790_s25, %s4063_s1 }
 0x111   : > { %p4060_p11 = pnand %p4058_p0, %p4798_p4  ;;  %p4066_p6 = scmp.lt.s32.totalorder %s4064_s29, %s4057_s6 }
 0x113   : > { %p4061_p1 = pneg %p4060_p11  ;;  %p4067_p9 = por %p4066_p6, %p4065_p12 }
 0x115   : > { %p4068_p7 = pnand %p4067_p9, %p4061_p1 }
 0x117   : > { %4071 = shalt.err (!%p4068_p7)
}
 0x118   : > { %p5822_p8 = scmp.ne.s32.totalorder %s5813_s12, 0  ;;  %s4496_s27 = smov [#allocation3]  }
 0x119   : > { %s547_s3 = sshll.u32 %s4496_s27, 4  ;;  %s5823_s22 = sld [smem:[#allocation54_spill]]  ;;  %s548_s3 = int_to_ptr.vmem [resolvable:$true] %s547_s3 }
 0x11a   : > { %3614 = dma.hbm_to_vmem [thread:$0]  (!%p5822_p8), %s4920_s20, 16, %s790_s25, %s5766_s19  }
 0x11b   : > { %p5824_p9 = scmp.ne.s32.totalorder %s5803_s2, 0 }
 0x11f   : > { %s4072_s5 = scalar_lea.hbm %s5823_s22, 256 }
 0x120   : > { %p4073_p5 = scmp.ne.s32.totalorder %s5823_s22, %s4072_s5  ;;  %p4079_p10 = scmp.lt.u32.totalorder %s4072_s5, %s5823_s22 }
 0x122   : > { %p4075_p3 = pnand %p4073_p5, %p5824_p9 }
 0x124   : > { %p4076_p13 = pneg %p4075_p3 }
 0x126   : > { %p4081_p2 = pnand %p4079_p10, %p4076_p13 }
 0x128   : > { %4084 = shalt.err (!%p4081_p2)
}
 0x129   : > { %s4085_s20 = scalar_lea.vmem %s548_s3, 256  ;;  %p4093_p12 = scmp.lt.s32.totalorder %s548_s3, %s548_s3 }
 0x12a   : > { %p4086_p0 = scmp.ne.s32.totalorder %s548_s3, %s4085_s20  ;;  %p4094_p6 = scmp.lt.s32.totalorder %s4085_s20, %s4085_s20 }
 0x12c   : > { %p4088_p11 = pnand %p4086_p0, %p5824_p9  ;;  %p4095_p7 = por %p4094_p6, %p4093_p12 }
 0x12e   : > { %p4089_p1 = pneg %p4088_p11 }
 0x130   : > { %p4096_p8 = pnand %p4095_p7, %p4089_p1 }
 0x132   : > { %4099 = shalt.err (!%p4096_p8)
}
 0x133   : > { %s4497_s14 = smov 128   ;;  %s4498_s25 = smov 8  }
 0x134   : > { %p5825_p5 = scmp.ne.s32.totalorder %s5800_s26, 0  ;;  %s4499_s24 = smov [#allocation8]  }
 0x135   : > { %s571_s5 = sshll.u32 %s4499_s24, 4  ;;  %s4500_s1 = smov [#allocation29]   ;;  %s572_s5 = int_to_ptr.vmem [resolvable:$true] %s571_s5 }
 0x136   : > { %3568 = dma.hbm_to_vmem [thread:$0]  (!%p5825_p5), %s5823_s22, 256, %s548_s3, [#allocation4], %s4497_s14, %s4497_s14, %s4498_s25  }
 0x137   : > { %s606_s6 = sshll.u32 %s4500_s1, 4  ;;  %s5826_s20 = sld [smem:[#allocation56_spill]]  ;;  %s607_s6 = int_to_ptr.vmem [resolvable:$true] %s606_s6 }
 0x13d   : > { %s4100_s7 = scalar_lea.hbm %s5826_s20, 256 }
 0x13e   : > { %p4101_p8 = scmp.ne.s32.totalorder %s5826_s20, %s4100_s7  ;;  %p4107_p10 = scmp.lt.u32.totalorder %s4100_s7, %s5826_s20 }
 0x140   : > { %p4103_p3 = pnand %p4101_p8, %p5824_p9 }
 0x142   : > { %p4104_p13 = pneg %p4103_p3 }
 0x144   : > { %p4109_p2 = pnand %p4107_p10, %p4104_p13 }
 0x146   : > { %4112 = shalt.err (!%p4109_p2)
}
 0x147   : > { %s4113_s3 = scalar_lea.vmem %s572_s5, 256  ;;  %p4121_p12 = scmp.lt.s32.totalorder %s572_s5, %s572_s5 }
 0x148   : > { %p4114_p0 = scmp.ne.s32.totalorder %s572_s5, %s4113_s3  ;;  %p4122_p6 = scmp.lt.s32.totalorder %s4113_s3, %s4113_s3 }
 0x14a   : > { %p4116_p11 = pnand %p4114_p0, %p5824_p9  ;;  %p4123_p7 = por %p4122_p6, %p4121_p12 }
 0x14c   : > { %p4117_p1 = pneg %p4116_p11 }
 0x14e   : > { %p4124_p4 = pnand %p4123_p7, %p4117_p1 }
 0x150   : > { %4127 = shalt.err (!%p4124_p4)
}
 0x151   : > { %3574 = dma.hbm_to_vmem [thread:$0]  (!%p5825_p5), %s5826_s20, 256, %s572_s5, [#allocation7], %s4497_s14, %s4497_s14, %s4498_s25  }
 0x152   : > { %s4128_s21 = scalar_lea.hbm %s5731_s16, 256 }
 0x153   : > { %p4129_p8 = scmp.ne.s32.totalorder %s5731_s16, %s4128_s21  ;;  %p4135_p4 = scmp.lt.u32.totalorder %s4128_s21, %s5731_s16 }
 0x155   : > { %p4131_p3 = pnand %p4129_p8, %p5824_p9 }
 0x157   : > { %p4132_p13 = pneg %p4131_p3 }
 0x159   : > { %p4137_p10 = pnand %p4135_p4, %p4132_p13 }
 0x15b   : > { %4140 = shalt.err (!%p4137_p10)
}
 0x15c   : > { %s4141_s1 = scalar_lea.vmem %s607_s6, 256  ;;  %p4149_p1 = scmp.lt.s32.totalorder %s607_s6, %s607_s6 }
 0x15d   : > { %p4142_p2 = scmp.ne.s32.totalorder %s607_s6, %s4141_s1  ;;  %p4150_p12 = scmp.lt.s32.totalorder %s4141_s1, %s4141_s1 }
 0x15f   : > { %p4144_p0 = pnand %p4142_p2, %p5824_p9  ;;  %p4151_p6 = por %p4150_p12, %p4149_p1 }
 0x161   : > { %p4145_p11 = pneg %p4144_p0 }
 0x163   : > { %p4152_p7 = pnand %p4151_p6, %p4145_p11 }
 0x165   : > { %4155 = shalt.err (!%p4152_p7)
}
 0x166   : > { %s5827_s14 = smov 4   ;;  %s5828_s25 = smov 64  }
 0x167   : > { %3583 = dma.hbm_to_vmem [thread:$0]  (!%p5825_p5), %s5731_s16, 256, %s607_s6, [#allocation28], %s5828_s25, %s5828_s25, %s5827_s14  }
 0x168   : > { %s4501_s3 = smov [#allocation30]   ;;  %s5829_s4 = sld [smem:[#allocation58_spill]] }
 0x169   : > { %s620_s9 = sshll.u32 %s4501_s3, 4  ;;  %s4156_s27 = scalar_lea.hbm %s5732_s17, 16  ;;  %s621_s9 = int_to_ptr.vmem [resolvable:$true] %s620_s9 }
 0x16a   : > { %p4157_p8 = scmp.ne.s32.totalorder %s5732_s17, %s4156_s27  ;;  %p4163_p4 = scmp.lt.u32.totalorder %s4156_s27, %s5732_s17 }
 0x16c   : > { %p4159_p3 = pnand %p4157_p8, %p5824_p9 }
 0x16e   : > { %s5004_s28 = scalar_lea.hbm %s5829_s4, %s4773_s23  ;;  %p4160_p13 = pneg %p4159_p3 }
 0x170   : > { %p4165_p10 = pnand %p4163_p4, %p4160_p13 }
 0x172   : > { %4168 = shalt.err (!%p4165_p10)
}
 0x173   : > { %s4169_s5 = scalar_lea.vmem %s621_s9, 16  ;;  %s4176_s29 = scalar_lea.vmem %s621_s9, 32 }
 0x174   : > { %p4170_p2 = scmp.ne.s32.totalorder %s621_s9, %s4169_s5  ;;  %p4177_p1 = scmp.lt.s32.totalorder %s621_s9, %s621_s9 }
 0x175   : > { %p4178_p12 = scmp.lt.s32.totalorder %s4176_s29, %s4169_s5 }
 0x176   : > { %p4172_p0 = pnand %p4170_p2, %p5824_p9 }
 0x177   : > { %p4179_p6 = por %p4178_p12, %p4177_p1 }
 0x178   : > { %p4173_p11 = pneg %p4172_p0 }
 0x17a   : > { %p4180_p7 = pnand %p4179_p6, %p4173_p11 }
 0x17c   : > { %4183 = shalt.err (!%p4180_p7)
}
 0x17d   : > { %3586 = dma.hbm_to_vmem [thread:$0]  (!%p5825_p5), %s5732_s17, 16, %s621_s9, [#allocation31]  }
 0x17e   : > { %s651_s2 = scalar_lea.vmem [#allocation11], %s4767_s10  ;;  %s5830_s27 = sld [smem:[#allocation60_spill]] }
 0x17f   : > { %s658_s7 = sshll.u32 %s651_s2, 4  ;;  %s4184_s26 = scalar_lea.hbm %s5004_s28, 16  ;;  %s659_s7 = int_to_ptr.vmem [resolvable:$true] %s658_s7 }
 0x180   : > { %p4185_p9 = scmp.ne.s32.totalorder %s5004_s28, %s4184_s26  ;;  %p5832_p8 = scmp.ne.s32.totalorder %s5814_s30, 0 }
 0x181   : > { %s4189_s5 = scalar_lea.hbm %s5829_s4, 32  ;;  %p4190_p5 = scmp.lt.u32.totalorder %s5004_s28, %s5829_s4 }
 0x182   : > { %p4187_p3 = pnand %p4185_p9, %p5832_p8  ;;  %p4191_p4 = scmp.lt.u32.totalorder %s4189_s5, %s4184_s26 }
 0x183   : > { %p4193_p2 = scmp.lt.u32.totalorder %s4184_s26, %s5004_s28 }
 0x184   : > { %s5831_s8 = smov %s5830_s27  ;;  %s5029_s24 = scalar_lea.hbm %s5830_s27, %s4824_s15 }
 0x185   : > { %p4188_p13 = pneg %p4187_p3  ;;  %p4192_p10 = por %p4191_p4, %p4190_p5 }
 0x187   : > { %p4194_p0 = por %p4193_p2, %p4192_p10 }
 0x189   : > { %p4195_p11 = pnand %p4194_p0, %p4188_p13 }
 0x18b   : > { %4198 = shalt.err (!%p4195_p11)
}
 0x18c   : > { %s4199_s9 = scalar_lea.vmem %s659_s7, 16  ;;  %s4502_s11 = smov [#allocation11]  }
 0x18d   : > { %p4200_p1 = scmp.ne.s32.totalorder %s659_s7, %s4199_s9  ;;  %s4204_s2 = sshll.u32 %s4502_s11, 4  ;;  %s4205_s2 = int_to_ptr.vmem [resolvable:$false] %s4204_s2 }
 0x18e   : > { %s4206_s21 = scalar_lea.vmem %s4205_s2, 32  ;;  %p4207_p7 = scmp.lt.s32.totalorder %s659_s7, %s4205_s2 }
 0x18f   : > { %p4202_p12 = pnand %p4200_p1, %p5832_p8  ;;  %p4208_p9 = scmp.lt.s32.totalorder %s4206_s21, %s4199_s9 }
 0x191   : > { %p4203_p6 = pneg %p4202_p12  ;;  %p4209_p3 = por %p4208_p9, %p4207_p7 }
 0x193   : > { %p4210_p4 = pnand %p4209_p3, %p4203_p6 }
 0x195   : > { %4213 = shalt.err (!%p4210_p4)
}
 0x196   : > { %p5833_p5 = scmp.ne.s32.totalorder %s5813_s12, 0  ;;  %s5834_s19 = scalar_lea.sflag [#allocation10], %s4764_s18 }
 0x197   : > { %s690_s27 = scalar_lea.vmem [#allocation14], %s4791_s13  ;;  %s5835_s5 = sld [smem:[#allocation62_spill]] }
 0x198   : > { %3593 = dma.hbm_to_vmem [thread:$0]  (!%p5833_p5), %s5004_s28, 16, %s659_s7, %s5834_s19  }
 0x199   : > { %s697_s26 = sshll.u32 %s690_s27, 4  ;;  %s4214_s3 = scalar_lea.hbm %s5029_s24, 256  ;;  %s5051_s26 = int_to_ptr.vmem [resolvable:$true] %s697_s26 }
 0x19a   : > { %p4215_p13 = scmp.ne.s32.totalorder %s5029_s24, %s4214_s3  ;;  %s4219_s2 = scalar_lea.hbm %s5831_s8, 512 }
 0x19b   : > { %p4220_p0 = scmp.lt.u32.totalorder %s5029_s24, %s5831_s8  ;;  %p4221_p11 = scmp.lt.u32.totalorder %s4219_s2, %s4214_s3 }
 0x19c   : > { %p4217_p10 = pnand %p4215_p13, %p5832_p8  ;;  %p4223_p12 = scmp.lt.u32.totalorder %s4214_s3, %s5029_s24 }
 0x19d   : > { %s5057_s29 = scalar_lea.hbm %s5835_s5, %s4773_s23  ;;  %p4222_p1 = por %p4221_p11, %p4220_p0 }
 0x19e   : > { %p4218_p2 = pneg %p4217_p10 }
 0x19f   : > { %p4224_p6 = por %p4223_p12, %p4222_p1 }
 0x1a1   : > { %p4225_p7 = pnand %p4224_p6, %p4218_p2 }
 0x1a3   : > { %4228 = shalt.err (!%p4225_p7)
}
 0x1a4   : > { %s4229_s7 = scalar_lea.vmem %s5051_s26, 256  ;;  %s4503_s19 = smov [#allocation14]  }
 0x1a5   : > { %p4230_p9 = scmp.ne.s32.totalorder %s5051_s26, %s4229_s7  ;;  %s4234_s27 = sshll.u32 %s4503_s19, 4  ;;  %s4235_s27 = int_to_ptr.vmem [resolvable:$false] %s4234_s27 }
 0x1a6   : > { %s4236_s6 = scalar_lea.vmem %s4235_s27, 512  ;;  %p4237_p13 = scmp.lt.s32.totalorder %s5051_s26, %s4235_s27 }
 0x1a7   : > { %p4232_p3 = pnand %p4230_p9, %p5832_p8  ;;  %p4238_p10 = scmp.lt.s32.totalorder %s4236_s6, %s4229_s7 }
 0x1a9   : > { %p4233_p4 = pneg %p4232_p3  ;;  %p4239_p0 = por %p4238_p10, %p4237_p13 }
 0x1ab   : > { %p4240_p11 = pnand %p4239_p0, %p4233_p4 }
 0x1ad   : > { %4243 = shalt.err (!%p4240_p11)
}
 0x1ae   : > { %s5836_s1 = scalar_lea.sflag [#allocation13], %s4764_s18  ;;  %s727_s3 = scalar_lea.vmem [#allocation17], %s4767_s10 }
 0x1af   : > { %3599 = dma.hbm_to_vmem [thread:$0]  (!%p5833_p5), %s5029_s24, 256, %s5051_s26, %s5836_s1, %s5828_s25, %s5828_s25, %s5827_s14  }
 0x1b0   : > { %s734_s9 = sshll.u32 %s727_s3, 4  ;;  %s5837_s21 = sld [smem:[#allocation64_spill]]  ;;  %s735_s9 = int_to_ptr.vmem [resolvable:$true] %s734_s9 }
 0x1b1   : > { %s4244_s7 = scalar_lea.hbm %s5057_s29, 16  ;;  %s4249_s6 = scalar_lea.hbm %s5835_s5, 32 }
 0x1b2   : > { %p4245_p2 = scmp.ne.s32.totalorder %s5057_s29, %s4244_s7  ;;  %p4250_p6 = scmp.lt.u32.totalorder %s5057_s29, %s5835_s5 }
 0x1b3   : > { %p4251_p7 = scmp.lt.u32.totalorder %s4249_s6, %s4244_s7  ;;  %p4253_p3 = scmp.lt.u32.totalorder %s4244_s7, %s5057_s29 }
 0x1b4   : > { %p4247_p1 = pnand %p4245_p2, %p5832_p8 }
 0x1b5   : > { %p4252_p9 = por %p4251_p7, %p4250_p6 }
 0x1b6   : > { %s5090_s28 = scalar_lea.hbm %s5837_s21, %s4824_s15  ;;  %p4248_p12 = pneg %p4247_p1 }
 0x1b7   : > { %p4254_p4 = por %p4253_p3, %p4252_p9 }
 0x1b9   : > { %p4255_p13 = pnand %p4254_p4, %p4248_p12 }
 0x1bb   : > { %4258 = shalt.err (!%p4255_p13)
}
 0x1bc   : > { %s4259_s15 = scalar_lea.vmem %s735_s9, 16  ;;  %s4504_s24 = smov [#allocation17]  }
 0x1bd   : > { %p4260_p10 = scmp.ne.s32.totalorder %s735_s9, %s4259_s15  ;;  %s4264_s26 = sshll.u32 %s4504_s24, 4  ;;  %s4265_s26 = int_to_ptr.vmem [resolvable:$false] %s4264_s26 }
 0x1be   : > { %s4266_s1 = scalar_lea.vmem %s4265_s26, 32  ;;  %p4267_p2 = scmp.lt.s32.totalorder %s735_s9, %s4265_s26 }
 0x1bf   : > { %p4262_p0 = pnand %p4260_p10, %p5832_p8  ;;  %p4268_p1 = scmp.lt.s32.totalorder %s4266_s1, %s4259_s15 }
 0x1c1   : > { %p4263_p11 = pneg %p4262_p0  ;;  %p4269_p5 = por %p4268_p1, %p4267_p2 }
 0x1c3   : > { %p4270_p6 = pnand %p4269_p5, %p4263_p11 }
 0x1c5   : > { %4273 = shalt.err (!%p4270_p6)
}
 0x1c6   : > { %p5838_p7 = scmp.ne.s32.totalorder %s5813_s12, 0  ;;  %s5839_s4 = scalar_lea.sflag [#allocation16], %s4764_s18 }
 0x1c7   : > { %s762_s8 = scalar_lea.vmem [#allocation20], %s4791_s13  ;;  %s3231_s11 = sshll.u32 %s4767_s10, 6 }
 0x1c8   : > { %3605 = dma.hbm_to_vmem [thread:$0]  (!%p5838_p7), %s5057_s29, 16, %s735_s9, %s5839_s4  }
 0x1c9   : > { %s769_s3 = sshll.u32 %s762_s8, 4  ;;  %s4274_s2 = scalar_lea.hbm %s5090_s28, 256  ;;  %s5113_s3 = int_to_ptr.vmem [resolvable:$true] %s769_s3 }
 0x1ca   : > { %p4275_p5 = scmp.ne.s32.totalorder %s5090_s28, %s4274_s2  ;;  %s4279_s27 = scalar_lea.hbm %s5837_s21, 512 }
 0x1cb   : > { %p4280_p3 = scmp.lt.u32.totalorder %s5090_s28, %s5837_s21  ;;  %p4281_p4 = scmp.lt.u32.totalorder %s4279_s27, %s4274_s2 }
 0x1cc   : > { %p4277_p12 = pnand %p4275_p5, %p5832_p8  ;;  %p4283_p10 = scmp.lt.u32.totalorder %s4274_s2, %s5090_s28 }
 0x1cd   : > { %p4282_p13 = por %p4281_p4, %p4280_p3 }
 0x1ce   : > { %p4278_p9 = pneg %p4277_p12 }
 0x1cf   : > { %p4284_p0 = por %p4283_p10, %p4282_p13 }
 0x1d1   : > { %p4285_p11 = pnand %p4284_p0, %p4278_p9 }
 0x1d3   : > { %4288 = shalt.err (!%p4285_p11)
}
 0x1d4   : > { %s4289_s13 = scalar_lea.vmem %s5113_s3, 256  ;;  %s4505_s29 = smov [#allocation20]  }
 0x1d5   : > { %p4290_p2 = scmp.ne.s32.totalorder %s5113_s3, %s4289_s13  ;;  %s4294_s9 = sshll.u32 %s4505_s29, 4  ;;  %s4295_s9 = int_to_ptr.vmem [resolvable:$false] %s4294_s9 }
 0x1d6   : > { %s4296_s24 = scalar_lea.vmem %s4295_s9, 512  ;;  %p4297_p5 = scmp.lt.s32.totalorder %s5113_s3, %s4295_s9 }
 0x1d7   : > { %p4292_p1 = pnand %p4290_p2, %p5832_p8  ;;  %p4298_p12 = scmp.lt.s32.totalorder %s4296_s24, %s4289_s13 }
 0x1d9   : > { %p4293_p6 = pneg %p4292_p1  ;;  %p4299_p3 = por %p4298_p12, %p4297_p5 }
 0x1db   : > { %p4300_p4 = pnand %p4299_p3, %p4293_p6 }
 0x1dd   : > { %4303 = shalt.err (!%p4300_p4)
}
 0x1de   : > { %s5840_s26 = scalar_lea.sflag [#allocation19], %s4764_s18  ;;  %s3305_s1 = sshll.u32 %s4480_s0, 10 }
 0x1df   : > { %3611 = dma.hbm_to_vmem [thread:$0]  (!%p5838_p7), %s5090_s28, 256, %s5113_s3, %s5840_s26, %s5828_s25, %s5828_s25, %s5827_s14  }
 0x1e0   : > { %s800_s4 = scalar_lea.vmem [#allocation23], %s3231_s11  ;;  %s5841_s19 = sld [smem:[#allocation66_spill]] }
 0x1e1   : > { %s807_s8 = sshll.u32 %s800_s4, 4  ;;  %s5149_s8 = int_to_ptr.vmem [resolvable:$true] %s807_s8 }
 0x1e6   : > { %s5842_s6 = smov %s5841_s19  ;;  %s5147_s27 = scalar_lea.hbm %s5841_s19, %s3305_s1 }
 0x1e7   : > { %s4304_s15 = scalar_lea.hbm %s5147_s27, 1024  ;;  %s4309_s11 = scalar_lea.hbm %s5842_s6, 2048 }
 0x1e8   : > { %p4305_p9 = scmp.ne.s32.totalorder %s5147_s27, %s4304_s15  ;;  %p4310_p0 = scmp.lt.u32.totalorder %s5147_s27, %s5842_s6 }
 0x1e9   : > { %p4311_p11 = scmp.lt.u32.totalorder %s4309_s11, %s4304_s15  ;;  %p4313_p1 = scmp.lt.u32.totalorder %s4304_s15, %s5147_s27 }
 0x1ea   : > { %p4307_p13 = pnand %p4305_p9, %p5832_p8 }
 0x1eb   : > { %p4312_p2 = por %p4311_p11, %p4310_p0 }
 0x1ec   : > { %p4308_p10 = pneg %p4307_p13 }
 0x1ed   : > { %p4314_p6 = por %p4313_p1, %p4312_p2 }
 0x1ef   : > { %p4315_p5 = pnand %p4314_p6, %p4308_p10 }
 0x1f1   : > { %4318 = shalt.err (!%p4315_p5)
}
 0x1f2   : > { %s4319_s9 = scalar_lea.vmem %s5149_s8, 1024  ;;  %s4506_s24 = smov [#allocation23]  }
 0x1f3   : > { %p4320_p12 = scmp.ne.s32.totalorder %s5149_s8, %s4319_s9  ;;  %s4324_s26 = sshll.u32 %s4506_s24, 4  ;;  %s4325_s26 = int_to_ptr.vmem [resolvable:$false] %s4324_s26 }
 0x1f4   : > { %s4326_s1 = scalar_lea.vmem %s4325_s26, 2048  ;;  %p4327_p9 = scmp.lt.s32.totalorder %s5149_s8, %s4325_s26 }
 0x1f5   : > { %p4322_p3 = pnand %p4320_p12, %p5832_p8  ;;  %p4328_p13 = scmp.lt.s32.totalorder %s4326_s1, %s4319_s9 }
 0x1f7   : > { %p4323_p4 = pneg %p4322_p3  ;;  %p4329_p0 = por %p4328_p13, %p4327_p9 }
 0x1f9   : > { %p4330_p11 = pnand %p4329_p0, %p4323_p4 }
 0x1fb   : > { %4333 = shalt.err (!%p4330_p11)
}
 0x1fc   : > { %s5843_s4 = scalar_lea.sflag [#allocation22], %s4764_s18  ;;  %s5844_s19 = sld [smem:[#allocation67_spill]] }
 0x1fd   : > { %3617 = dma.hbm_to_vmem [thread:$0]  (!%p5838_p7), %s5147_s27, 1024, %s5149_s8, %s5843_s4, %s5828_s25, %s5828_s25, %s5827_s14  }
 0x1fe   : > { %s820_s3 = scalar_lea.vmem [#allocation24], %s4767_s10  ;;  %s818_s13 = scalar_lea.sflag [#allocation25], %s4764_s18 }
 0x1ff   : > { %s827_s11 = sshll.u32 %s820_s3, 4  ;;  %s828_s11 = int_to_ptr.vmem [resolvable:$true] %s827_s11 }
 0x202   : > { %s5845_s15 = smov %s5844_s19  ;;  %s5181_s28 = scalar_lea.hbm %s5844_s19, %s4773_s23 }
 0x203   : > { %s4334_s29 = scalar_lea.hbm %s5181_s28, 16  ;;  %s4339_s25 = scalar_lea.hbm %s5845_s15, 32 }
 0x204   : > { %p4335_p10 = scmp.ne.s32.totalorder %s5181_s28, %s4334_s29  ;;  %p4340_p6 = scmp.lt.u32.totalorder %s5181_s28, %s5845_s15 }
 0x205   : > { %p4341_p5 = scmp.lt.u32.totalorder %s4339_s25, %s4334_s29  ;;  %p4343_p3 = scmp.lt.u32.totalorder %s4334_s29, %s5181_s28 }
 0x206   : > { %p4337_p2 = pnand %p4335_p10, %p5832_p8 }
 0x207   : > { %p4342_p12 = por %p4341_p5, %p4340_p6 }
 0x208   : > { %p4338_p1 = pneg %p4337_p2 }
 0x209   : > { %p4344_p4 = por %p4343_p3, %p4342_p12 }
 0x20b   : > { %p4345_p9 = pnand %p4344_p4, %p4338_p1 }
 0x20d   : > { %4348 = shalt.err (!%p4345_p9)
}
 0x20e   : > { %s4349_s18 = scalar_lea.vmem %s828_s11, 16  ;;  %s4507_s10 = smov [#allocation24]  }
 0x20f   : > { %p4350_p13 = scmp.ne.s32.totalorder %s828_s11, %s4349_s18  ;;  %s4354_s27 = sshll.u32 %s4507_s10, 4  ;;  %s4355_s27 = int_to_ptr.vmem [resolvable:$false] %s4354_s27 }
 0x210   : > { %s4356_s24 = scalar_lea.vmem %s4355_s27, 32  ;;  %p4357_p10 = scmp.lt.s32.totalorder %s828_s11, %s4355_s27 }
 0x211   : > { %p4352_p0 = pnand %p4350_p13, %p5832_p8  ;;  %p4358_p2 = scmp.lt.s32.totalorder %s4356_s24, %s4349_s18 }
 0x213   : > { %p4353_p11 = pneg %p4352_p0  ;;  %p4359_p7 = por %p4358_p2, %p4357_p10 }
 0x215   : > { %p4360_p5 = pnand %p4359_p7, %p4353_p11 }
 0x217   : > { %4363 = shalt.err (!%p4360_p5)
}
 0x218   : > { %p5846_p6 = scmp.ne.s32.totalorder %s5813_s12, 0  ;;  %s5847_s26 = sld [smem:[#allocation50_spill]] }
 0x21a   : > { %3620 = dma.hbm_to_vmem [thread:$0]  (!%p5846_p6), %s5181_s28, 16, %s828_s11, %s818_s13  }
 0x21e   : > { %p5848_p1 = scmp.ne.s32.totalorder %s5847_s26, 0 }
 0x21f   : > { %s5849_s1 = sld [smem:[#allocation49_spill]] (!%p5848_p1) }
 0x220   : > { %836 = sbr.rel (%p5848_p1) target bundleno = 4413 (0x113d), region = 92 }
 0x225   : > { %p5850_p12 = scmp.eq.s32.totalorder (!%p5848_p1), %s5849_s1, 0 }
 0x227   : > { %4415 = dma.done.wait (%p5850_p12), [#allocation4], 256   ;;  %p5851_p8 = pmov %p5850_p12 }
 0x229   : > { %4417 = vsyncadd (%p5851_p8), [#allocation4], 4294967040  ;;  %p5852_p3 = pmov %p5851_p8 }
 0x22b   : > { %4419 = dma.done.wait (%p5852_p3), [#allocation7], 272   ;;  %p5853_p4 = pmov %p5852_p3 }
 0x22c   : > { %s5854_s30 = sld [smem:[#allocation45_spill]]  ;;  %s5213_s4 = sand.u32 1, %s5849_s1  }
 0x22d   : > { %4421 = vsyncadd (%p5853_p4), [#allocation7], 4294967024  ;;  %s5855_s12 = sld [smem:[#allocation52_spill]]  ;;  %s851_s7 = scalar_lea.sflag [#allocation10], %s5213_s4 }
 0x232   : > { %s5216_s2 = sand.u32 1, %s5854_s30  }
 0x233   : > { %s853_s19 = scalar_lea.vmem [#allocation9], %s5216_s2  ;;  %p5856_p7 = scmp.ne.s32.totalorder %s5855_s12, 0 }
 0x235   : > { %4423 = dma.done.wait (%p5856_p7), %s851_s7, 32  }
 0x236   : > { %4425 = vsyncadd (%p5856_p7), %s851_s7, 4294967264  ;;  %s5225_s28 = sshll.u32 %s5216_s2, 4  ;;  %s861_s3 = scalar_lea.vmem [#allocation11], %s5216_s2 }
 0x237   : > { %s867_s11 = scalar_lea.sflag [#allocation13], %s5213_s4  ;;  %s870_s13 = scalar_lea.vmem [#allocation12], %s5225_s28 }
 0x238   : > { %4427 = dma.done.wait (%p5856_p7), %s867_s11, 512  }
 0x239   : > { %4429 = vsyncadd (%p5856_p7), %s867_s11, 4294966784  ;;  %s879_s29 = scalar_lea.vmem [#allocation14], %s5225_s28  ;;  %s885_s9 = scalar_lea.sflag [#allocation16], %s5213_s4 }
 0x23a   : > { %s887_s14 = scalar_lea.vmem [#allocation15], %s5216_s2 }
 0x23b   : > { %4431 = dma.done.wait (%p5856_p7), %s885_s9, 32  }
 0x23c   : > { %4433 = vsyncadd (%p5856_p7), %s885_s9, 4294967264  ;;  %s895_s25 = scalar_lea.vmem [#allocation17], %s5216_s2  ;;  %s901_s8 = scalar_lea.sflag [#allocation19], %s5213_s4 }
 0x23d   : > { %s903_s23 = scalar_lea.vmem [#allocation18], %s5216_s2 }
 0x23e   : > { %4435 = dma.done.wait (%p5856_p7), %s901_s8, 272  }
 0x23f   : > { %4437 = vsyncadd (%p5856_p7), %s901_s8, 4294967024  ;;  %s912_s18 = scalar_lea.vmem [#allocation20], %s5225_s28  ;;  %s918_s10 = scalar_lea.sflag [#allocation22], %s5213_s4 }
 0x240   : > { %s920_s27 = scalar_lea.vmem [#allocation21], %s5216_s2 }
 0x241   : > { %4439 = dma.done.wait (%p5856_p7), %s918_s10, 1040  }
 0x242   : > { %4441 = vsyncadd (%p5856_p7), %s918_s10, 4294966256  ;;  %s3242_s24 = sshll.u32 %s5216_s2, 6  ;;  %s935_s30 = scalar_lea.sflag [#allocation25], %s5213_s4 }
 0x243   : > { %s5256_s26 = scalar_lea.vmem [#allocation23], %s3242_s24  ;;  %s937_s7 = scalar_lea.vmem [#allocation24], %s5216_s2 }
 0x244   : > { %4443 = dma.done.wait (%p5856_p7), %s935_s30, 16  }
 0x245   : > { %4445 = vsyncadd (%p5856_p7), %s935_s30, 4294967280  ;;  %p5857_p9 = pmov %p5852_p3 }
 0x246   : > { %p5858_p13 = pmov %p5852_p3 }
 0x247   : > { %4447 = dma.done.wait (%p5857_p9), [#allocation25], 16  }
 0x248   : > { %4449 = vsyncadd (%p5858_p13), [#allocation25], 4294967280  ;;  %p5859_p0 = pmov %p5852_p3 }
 0x24a   : > { %4451 = dma.done.wait (%p5859_p0), [#allocation28], 272   ;;  %p5860_p11 = pmov %p5859_p0 }
 0x24b   : > { %p5861_p10 = pmov %p5859_p0 }
 0x24c   : > { %4453 = vsyncadd (%p5860_p11), [#allocation28], 4294967024 }
 0x24d   : > { %4455 = dma.done.wait (%p5861_p10), [#allocation31], 16   ;;  %p5862_p2 = pmov %p5859_p0 }
 0x24e   : > { %s5863_s12 = sld [smem:[#allocation47_spill]] }
 0x24f   : > { %4457 = vsyncadd (%p5862_p2), [#allocation31], 4294967280 }
 0x254   : > { %p3247_p5 = scmp.ne.s32.totalorder %s5863_s12, 0 }
 0x255   : > { %v1050_v0 = vld [vmem:[#allocation6] sm:$0x1] (!%p3247_p5)  ;;  %v1051_v1 = vld [vmem:[#allocation8] sm:$0x1] (!%p3247_p5)  ;;  %vm1054_vm0 = vcmask (!%p3247_p5), 253952   ;;  %v1053_v2 = vld [vmem:[#allocation8 + $0x1] sm:$0xff] (!%p3247_p5) }
 0x256   : > { %1049 = sbr.rel (%p3247_p5) target bundleno = 605 (0x25d), region = 168  ;;  %v1052_v3 = vadd.f32 (!%p3247_p5), %v1051_v1, %v1050_v0  ;;  %v1056_v4 = vld [vmem:[#allocation3] sm:$0xff] (!%p3247_p5)  ;;  %vm1058_vm1 = vcmask (!%p3247_p5), 261120   ;;  %v1062_v5 = vld [vmem:[#allocation3 + $0x8] sm:$0xff] (!%p3247_p5) }
 0x257   : > { %v1057_v6 = vadd.f32 (!%p3247_p5), %v1056_v4, %v1053_v2  ;;  %v1063_v7 = vadd.f32 (!%p3247_p5), %v1062_v5, %v1053_v2 }
 0x258   : > { %1055 = vst.msk [vmem:[#allocation2] sm:$0x1] (!%p3247_p5), %vm1054_vm0, %v1052_v3  ;;  %1060 = vst.msk [vmem:[#allocation2 + $0x9] sm:$0x1] (!%p3247_p5), %vm1054_vm0, %v1052_v3 }
 0x259   : > { %1059 = vst.msk [vmem:[#allocation2 + $0x1] sm:$0xff] (!%p3247_p5), %vm1058_vm1, %v1057_v6  ;;  %1064 = vst.msk [vmem:[#allocation2 + $0xa] sm:$0xff] (!%p3247_p5), %vm1058_vm1, %v1063_v7 }
 0x25d PF: > { %vm1070_vm2 = vcmask 261120   ;;  %vm1077_vm3 = vcmask 254976   ;;  %v3741_v29 = vld [vmem:[%s870_s13] sm:$0xff]   ;;  %v3742_v30 = vld [vmem:[%s870_s13 + $0x8] sm:$0xff]   ;;  %v4508_v58 = vmov 0.0   ;;  %vm4509_vm4 = vmmov 0  }
 0x25e   : > { %3363 = vmatprep.subr.bf16.mxu0 %v3741_v29  ;;  %v3248_v42 = vld [vmem:[%s853_s19] ss:$0 sm:$0xff]  ;;  %3383 = vmatprep.subr.bf16.mxu1 %v4508_v58  ;;  %s4510_s1 = smov 112   ;;  %s4511_s4 = smov 120   ;;  %vm1225_vm5 = vcmask 64512   ;;  %vm1420_vm6 = vcmask 72704  }
 0x25f   : > { %3364 = vmatpush3.bf16.msra.mxu0 %v3741_v29  ;;  %v3249_v48 = vld [vmem:[%s861_s3] ss:$0 sm:$0xff]  ;;  %3385 = vmatprep.mubr.msk.bf16.mxu1 %vm4509_vm4, %v4508_v58  ;;  %s4512_s19 = smov 104   ;;  %s4513_s3 = smov 96   ;;  %vm1424_vm7 = vcmask 65536   ;;  %vm1519_vm9 = vcmask 1043456  }
 0x260   : > { %v1065_v8 = vld [vmem:[#allocation2] sm:$0xff]  ;;  %v1067_v9 = vld [vmem:[#allocation2 + $0x10] sm:$0x3]  ;;  %v1066_v10 = vld [vmem:[#allocation2 + $0x8] sm:$0xff]  ;;  %3365 = vmatprep.subr.bf16.mxu0 %v3742_v30  ;;  %s4514_s11 = smov 64   ;;  %vm1520_vm10 = vcmask 1044480  }
 0x261   : > { %v1071_v11 = vsel %vm1070_vm2, %v1065_v8, 0.0  ;;  %v1078_v12 = vsel %vm1077_vm3, %v1067_v9, 0.0  ;;  %v1074_v13 = vsel %vm1070_vm2, %v1066_v10, 0.0  ;;  %vm1760_vm8 = vsmask.f32 3328  ;;  %s4516_s13 = smov 8  }
 0x262   : > { %1072 = vadd.xlane.f32.xlu0 %v1071_v11  ;;  %1079 = vadd.xlane.f32.xlu1 %v1078_v12  ;;  %s4517_s9 = smov 16   ;;  %s4518_s8 = smov 24   ;;  %vm1740_vm11 = vcmask 130048   ;;  %vm1743_vm12 = vcmask 195584   ;;  %vm2409_vm13 = vcmask 1040384  }
 0x263   : > { %3366 = vmatpush3.bf16.msra.mxu0 %v3742_v30  ;;  %s5864_s28 = sld [smem:[#allocation47_spill]] }
 0x264   : > { %3371 = vmatprep.subr.bf16.mxu0 %v4508_v58 }
 0x266   : > { %1075 = vadd.xlane.f32.xlu0 %v1074_v13 }
 0x269   : > { %p3291_p6 = scmp.ne.s32.totalorder %s5864_s28, 1 }
 0x26a   : > { %vm4520_vm14 = vmmov (!%p3291_p6), 0  }
 0x2ef   : > { %v1073_v14 = vpop.xlane.xlu0 %1072  ;;  %v1080_v15 = vpop.xlane.xlu1 %1079 }
 0x2f0   : > { %v1082_v16 = vmul.f32 0.03125, %v1073_v14  ;;  %v1084_v17 = vmul.f32 0.03125, %v1080_v15 }
 0x2f2   : > { %v1085_v18 = vsub.f32 %v1065_v8, %v1082_v16  ;;  %v1087_v19 = vsub.f32 %v1067_v9, %v1084_v17 }
 0x2f3   : > { %v1076_v20 = vpop.xlane.xlu0 %1075 }
 0x2f4   : > { %v1083_v21 = vmul.f32 0.03125, %v1076_v20  ;;  %v1088_v22 = vmul.f32 %v1085_v18, %v1085_v18  ;;  %v1090_v23 = vmul.f32 %v1087_v19, %v1087_v19 }
 0x2f6   : > { %v1086_v24 = vsub.f32 %v1066_v10, %v1083_v21  ;;  %v1091_v25 = vsel %vm1070_vm2, %v1088_v22, 0.0  ;;  %v1097_v26 = vsel %vm1077_vm3, %v1090_v23, 0.0 }
 0x2f7   : > { %1092 = vadd.xlane.f32.xlu1 %v1091_v25 }
 0x2f8   : > { %v1089_v27 = vmul.f32 %v1086_v24, %v1086_v24 }
 0x2fa   : > { %v1094_v28 = vsel %vm1070_vm2, %v1089_v27, 0.0 }
 0x2fb   : > { %1098 = vadd.xlane.f32.xlu1 %v1097_v26  ;;  %1095 = vadd.xlane.f32.xlu0 %v1094_v28 }
 0x384   : > { %v1093_v31 = vpop.xlane.xlu1 %1092 }
 0x385   : > { %v1100_v32 = vmul.f32 0.03125, %v1093_v31 }
 0x387   : > { %v1103_v33 = vadd.f32 1e-05, %v1100_v32 }
 0x388   : > { %v1099_v34 = vpop.xlane.xlu1 %1098  ;;  %v1096_v35 = vpop.xlane.xlu0 %1095 }
 0x389   : > { %3755 = vrsqrt.f32 %v1103_v33  ;;  %v1102_v36 = vmul.f32 0.03125, %v1099_v34  ;;  %v1101_v37 = vmul.f32 0.03125, %v1096_v35 }
 0x38b   : > { %v1105_v38 = vadd.f32 1e-05, %v1102_v36  ;;  %v1104_v39 = vadd.f32 1e-05, %v1101_v37 }
 0x38d   : > { %3757 = vrsqrt.f32 %v1105_v38 }
 0x38e   : > { %3759 = vrsqrt.f32 %v1104_v39 }
 0x393   : > { %v3756_v40 = vpop.eup %3755 }
 0x394   : > { %v1109_v41 = vmul.f32 %v3756_v40, %v1085_v18 }
 0x396   : > { %v1118_v47 = vmul.f32 %v3248_v42, %v1109_v41 }
 0x397   : > { %v3758_v43 = vpop.eup %3757 }
 0x398   : > { %v3760_v44 = vpop.eup %3759  ;;  %v1111_v45 = vmul.f32 %v3758_v43, %v1087_v19  ;;  %v1127_v52 = vadd.f32 %v3249_v48, %v1118_v47 }
 0x399   : > { %v1110_v46 = vmul.f32 %v3760_v44, %v1086_v24 }
 0x39a   : > { %v1120_v49 = vmul.f32 %v3248_v42, %v1111_v45 }
 0x39b   : > { %v1119_v50 = vmul.f32 %v3248_v42, %v1110_v46 }
 0x39c   : > { %v1129_v51 = vadd.f32 %v3249_v48, %v1120_v49 }
 0x39d   : > { %v1128_v53 = vadd.f32 %v3249_v48, %v1119_v50 }
 0x39e   : > { %v1131_v54 = vpack.c.bf16 %v1129_v51, %v1129_v51 }
 0x39f   : > { %v1130_v55 = vpack.c.bf16 %v1128_v53, %v1127_v52 }
 0x3a1   : > { %3367 = vmatprep.mubr.msk.bf16.mxu0 %vm1070_vm2, %v1130_v55 }
 0x3a2   : > { %3368 = vmatmul.mubr.msk.bf16.vlgmr.msra.gmra.mrb[0].mxu0 %vm1070_vm2, %v1131_v54 }
 0x3a3   : > { %3373 = vmatprep.mubr.msk.bf16.mxu0 %vm4509_vm4, %v4508_v58 }
 0x475   : > { %v5293_v56 = vpop.f32.mrb[0].mxu0 }
 0x476   : > { %v1188_v57 = vpop.f32.mrb[1].mxu0  ;;  %v1208_v39 = vpack.c.bf16 %v5293_v56, %v5293_v56 }
 0x477   : > { %v3370_v59 = vpop.f32.mrb[2].mxu0  ;;  %v1202_v61 = vmul.f32 0.35355338, %v1188_v57 }
 0x478   : > { %v1191_v60 = vpop.f32.mrb[3].mxu0  ;;  %v1786_v42 = vshrl.u32 %v1208_v39, 16  ;;  %v1789_v43 = vshll.u32 %v1208_v39, 16 }
 0x479   : > { %v1203_v62 = vmul.f32 0.35355338, %v1191_v60  ;;  %v5301_v63 = vpack.c.bf16 %v1191_v60, %v1188_v57 }
 0x47a   : > { %v1788_v46 = vrot.slane %v1786_v42, 4  ;;  %v1791_v47 = vrot.slane %v1789_v43, 5 }
 0x47b   : > { %v5303_v0 = vpack.c.bf16 %v1203_v62, %v1202_v61  ;;  %1219 = vrot.lane.b32.xlu1 %v5301_v63, %s4510_s1  ;;  %1217 = vrot.lane.b32.xlu0 %v5301_v63, %s4511_s4  ;;  %v1778_v40 = vshrl.u32 %v5301_v63, 16  ;;  %v1781_v41 = vshll.u32 %v5301_v63, 16 }
 0x47c   : > { %v1792_v50 = vor.u32 %v1791_v47, %v1788_v46 }
 0x47d   : > { %v1780_v44 = vrot.slane %v1778_v40, 4  ;;  %v1783_v45 = vrot.slane %v1781_v41, 5 }
 0x47f   : > { %1221 = vrot.lane.b32.xlu1 %v5301_v63, %s4512_s19  ;;  %v1784_v48 = vor.u32 %v1783_v45, %v1780_v44 }
 0x481   : > { %v5397_v51 = vsel %vm1760_vm8, %v1784_v48, %v1792_v50  ;;  %v1204_v48 = vmul.f32 0.35355338, %v5293_v56 }
 0x483   : > { %1223 = vrot.lane.b32.xlu1 %v5301_v63, %s4513_s3 }
 0x4ed   : > { %v5313_v1 = vpop.permute.xlu1 %1219  ;;  %v5315_v2 = vpop.permute.xlu0 %1217 }
 0x4ee   : > { %1322 = vrot.lane.b32.xlu1 %v5313_v1, %s4513_s3  ;;  %1273 = vrot.lane.b32.xlu0 %v5315_v2, %s4513_s3  ;;  %v1863_v50 = vshll.u32 %v5315_v2, 16 }
 0x4f1   : > { %v5321_v3 = vpop.permute.xlu1 %1221 }
 0x4f2   : > { %1371 = vrot.lane.b32.xlu1 %v5321_v3, %s4513_s3  ;;  %1210 = vrot.lane.b32.xlu0 %v5303_v0, %s4511_s4 }
 0x4f5   : > { %v1224_v4 = vpop.permute.xlu1 %1223 }
 0x4f6   : > { %v1230_v5 = vsel %vm1225_vm5, %v1224_v4, 0  ;;  %1214 = vrot.lane.b32.xlu1 %v5303_v0, %s4512_s19  ;;  %1212 = vrot.lane.b32.xlu0 %v5303_v0, %s4510_s1 }
 0x4f7   : > { %3372 = vmatpush3.bf16.xpose.msra.mxu0 %v1230_v5 }
 0x4f8   : > { %3377 = vmatprep.subr.bf16.mxu0 %v4508_v58 }
 0x4fe   : > { %3374 = vmatmul.mubr.msk.bf16.vlgmr.msra.gmra.mrb[4].mxu0 %vm1225_vm5, %v5303_v0 }
 0x4ff   : > { %3379 = vmatprep.mubr.msk.bf16.mxu0 %vm4509_vm4, %v4508_v58 }
 0x560   : > { %v1323_v6 = vpop.permute.xlu1 %1322  ;;  %v1274_v7 = vpop.permute.xlu0 %1273 }
 0x561   : > { %v1279_v8 = vsel %vm1225_vm5, %v1274_v7, 0  ;;  %v1328_v9 = vsel %vm1225_vm5, %v1323_v6, 0 }
 0x562   : > { %3378 = vmatpush3.bf16.xpose.msra.mxu0 %v1279_v8  ;;  %3384 = vmatpush3.bf16.xpose.msra.mxu1 %v1328_v9 }
 0x563   : > { %3389 = vmatprep.subr.bf16.mxu0 %v4508_v58  ;;  %3395 = vmatprep.subr.bf16.mxu1 %v4508_v58 }
 0x564   : > { %v5341_v10 = vpop.permute.xlu0 %1210  ;;  %v1372_v11 = vpop.permute.xlu1 %1371 }
 0x565   : > { %v1377_v13 = vsel %vm1225_vm5, %v1372_v11, 0 }
 0x568   : > { %v5343_v12 = vpop.permute.xlu0 %1212  ;;  %v5355_v14 = vpop.permute.xlu1 %1214 }
 0x569   : > { %3380 = vmatmul.mubr.msk.bf16.vlgmr.msra.gmra.mrb[8].mxu0 %vm1225_vm5, %v5341_v10  ;;  %3386 = vmatmul.mubr.msk.bf16.vlgmr.msra.gmra.mrb[0].mxu1 %vm1225_vm5, %v5343_v12 }
 0x56a   : > { %3390 = vmatpush3.bf16.xpose.msra.mxu0 %v1377_v13  ;;  %3391 = vmatprep.mubr.msk.bf16.mxu0 %vm4509_vm4, %v4508_v58 }
 0x56b   : > { %3401 = vmatprep.subr.bf16.mxu0 %v4508_v58  ;;  %3397 = vmatprep.mubr.msk.bf16.mxu1 %vm4509_vm4, %v4508_v58 }
 0x571   : > { %3392 = vmatmul.mubr.msk.bf16.vlgmr.msra.gmra.mrb[12].mxu0 %vm1225_vm5, %v5355_v14 }
 0x572   : > { %3403 = vmatprep.mubr.msk.bf16.mxu0 %vm4509_vm4, %v4508_v58 }
 0x5d1   : > { %v1266_v15 = vpop.f32.mrb[4].mxu0 }
 0x5d2   : > { %v3375_v16 = vpop.f32.mrb[5].mxu0  ;;  %v1421_v17 = vsel %vm1420_vm6, %v1266_v15, -inf }
 0x5d3   : > { %1422 = vmax.xlane.f32.xlu0 %v1421_v17  ;;  %v1269_v18 = vpop.f32.mrb[6].mxu0 }
 0x5d4   : > { %v3376_v19 = vpop.f32.mrb[7].mxu0  ;;  %v1425_v20 = vsel %vm1424_vm7, %v1269_v18, -inf }
 0x5d5   : > { %1426 = vmax.xlane.f32.xlu1 %v1425_v20 }
 0x63c   : > { %v5363_v21 = vpop.f32.mrb[8].mxu0  ;;  %v5365_v22 = vpop.f32.mrb[0].mxu1 }
 0x63d   : > { %v3381_v23 = vpop.f32.mrb[9].mxu0  ;;  %v3387_v24 = vpop.f32.mrb[1].mxu1  ;;  %v1428_v25 = vsel %vm1420_vm6, %v5363_v21, -inf  ;;  %v1434_v34 = vsel %vm1420_vm6, %v5365_v22, -inf }
 0x63e   : > { %v5369_v26 = vpop.f32.mrb[2].mxu1  ;;  %1429 = vmax.xlane.f32.xlu0 %v1428_v25  ;;  %v1318_v27 = vpop.f32.mrb[10].mxu0 }
 0x63f   : > { %v3382_v28 = vpop.f32.mrb[11].mxu0  ;;  %v3388_v29 = vpop.f32.mrb[3].mxu1  ;;  %v1437_v30 = vsel %vm1424_vm7, %v5369_v26, -inf  ;;  %v1431_v31 = vsel %vm1424_vm7, %v1318_v27, -inf }
 0x640   : > { %1438 = vmax.xlane.f32.xlu1 %v1437_v30 }
 0x642   : > { %1432 = vmax.xlane.f32.xlu0 %v1431_v31 }
 0x644   : > { %v5374_v32 = vpop.f32.mrb[12].mxu0 }
 0x645   : > { %v3393_v33 = vpop.f32.mrb[13].mxu0  ;;  %v1440_v38 = vsel %vm1420_vm6, %v5374_v32, -inf }
 0x646   : > { %1435 = vmax.xlane.f32.xlu0 %v1434_v34  ;;  %v1416_v35 = vpop.f32.mrb[14].mxu0 }
 0x647   : > { %v3394_v36 = vpop.f32.mrb[15].mxu0  ;;  %v1443_v37 = vsel %vm1424_vm7, %v1416_v35, -inf }
 0x648   : > { %1444 = vmax.xlane.f32.xlu1 %v1443_v37 }
 0x64a   : > { %1441 = vmax.xlane.f32.xlu0 %v1440_v38 }
 0x659   : > { %1756 = vrot.lane.b32.xlu1 %v1208_v39, %s4510_s1 }
 0x65d   : > { %1758 = vrot.lane.b32.xlu1 %v1208_v39, %s4512_s19 }
 0x660   : > { %1754 = vrot.lane.b32.xlu0 %v1208_v39, %s4511_s4  ;;  %v1423_v54 = vpop.xlane.xlu0 %1422 }
 0x661   : > { %1514 = vrot.lane.b32.xlu1 %v5301_v63, %s4514_s11  ;;  %v1446_v55 = vsub.f32 %v1266_v15, %v1423_v54 }
 0x662   : > { %v1427_v49 = vpop.xlane.xlu1 %1426 }
 0x663   : > { %v1447_v52 = vsub.f32 %v1269_v18, %v1427_v49  ;;  %v1454_v59 = vmul.f32 1.442695, %v1446_v55  ;;  %v1860_v49 = vshrl.u32 %v5315_v2, 16 }
 0x664   : > { %1567 = vrot.lane.b32.xlu0 %v5315_v2, %s4514_s11 }
 0x665   : > { %1616 = vrot.lane.b32.xlu1 %v5313_v1, %s4514_s11  ;;  %v1456_v53 = vmul.f32 1.442695, %v1447_v52 }
 0x667   : > { %3761 = vpow2.f32 %v1456_v53 }
 0x668   : > { %3763 = vpow2.f32 %v1454_v59  ;;  %v1942_v59 = vshrl.u32 %v5313_v1, 16 }
 0x669   : > { %1665 = vrot.lane.b32.xlu1 %v5321_v3, %s4514_s11 }
 0x66a   : > { %v1944_v2 = vrot.slane %v1942_v59, 4 }
 0x66d   : > { %1794 = vrot.lane.b32.xlu1 %v5397_v51, %s4513_s3 }
 0x671   : > { %v5401_v57 = vpop.eup %3761 }
 0x672   : > { %v1473_v60 = vsel %vm1424_vm7, %v5401_v57, 0.0  ;;  %v5405_v61 = vpop.eup %3763 }
 0x673   : > { %v1470_v62 = vsel %vm1420_vm6, %v5405_v61, 0.0 }
 0x683   : > { %1474 = vadd.xlane.f32.xlu0 %v1473_v60  ;;  %v5447_v60 = vpack.c.bf16 %v1204_v48, %v1204_v48 }
 0x691   : > { %1471 = vadd.xlane.f32.xlu1 %v1470_v62  ;;  %v1945_v62 = vshll.u32 %v5313_v1, 16 }
 0x6cb   : > { %v1430_v63 = vpop.xlane.xlu0 %1429 }
 0x6cc   : > { %v1448_v4 = vsub.f32 %v5363_v21, %v1430_v63  ;;  %v1862_v63 = vrot.slane %v1860_v49, 4 }
 0x6cd   : > { %v1439_v5 = vpop.xlane.xlu1 %1438 }
 0x6ce   : > { %v1458_v6 = vmul.f32 1.442695, %v1448_v4  ;;  %v1451_v7 = vsub.f32 %v5369_v26, %v1439_v5  ;;  %v1865_v4 = vrot.slane %v1863_v50, 5 }
 0x6cf   : > { %v1433_v8 = vpop.xlane.xlu0 %1432 }
 0x6d0   : > { %3765 = vpow2.f32 %v1458_v6  ;;  %v1449_v9 = vsub.f32 %v1318_v27, %v1433_v8  ;;  %v1464_v11 = vmul.f32 1.442695, %v1451_v7  ;;  %v4515_v27 = vmov 65535  }
 0x6d1   : > { %v1521_v28 = vsel %vm1519_vm9, 4294967295, %v4515_v27 }
 0x6d2   : > { %v1460_v13 = vmul.f32 1.442695, %v1449_v9  ;;  %v5417_v31 = vsel %vm1520_vm10, %v1521_v28, 0  ;;  %v1947_v9 = vrot.slane %v1945_v62, 5  ;;  %v1764_v62 = vshll.u32 %v5303_v0, 16 }
 0x6d3   : > { %v1436_v15 = vpop.xlane.xlu0 %1435 }
 0x6d4   : > { %3767 = vpow2.f32 %v1460_v13  ;;  %v1450_v16 = vsub.f32 %v5365_v22, %v1436_v15  ;;  %v2027_v13 = vshll.u32 %v5321_v3, 16  ;;  %v1866_v15 = vor.u32 %v1865_v4, %v1862_v63 }
 0x6d5   : > { %v1445_v17 = vpop.xlane.xlu1 %1444  ;;  %3769 = vpow2.f32 %v1464_v11  ;;  %v2024_v11 = vshrl.u32 %v5321_v3, 16 }
 0x6d6   : > { %v1462_v18 = vmul.f32 1.442695, %v1450_v16  ;;  %v1453_v19 = vsub.f32 %v1416_v35, %v1445_v17 }
 0x6d7   : > { %v1442_v20 = vpop.xlane.xlu0 %1441 }
 0x6d8   : > { %3771 = vpow2.f32 %v1462_v18  ;;  %v1468_v21 = vmul.f32 1.442695, %v1453_v19  ;;  %v1452_v23 = vsub.f32 %v5374_v32, %v1442_v20  ;;  %v2026_v19 = vrot.slane %v2024_v11, 4 }
 0x6d9   : > { %v1757_v24 = vpop.permute.xlu1 %1756  ;;  %v2029_v20 = vrot.slane %v2027_v13, 5 }
 0x6da   : > { %v5413_v25 = vpop.eup %3765  ;;  %3773 = vpow2.f32 %v1468_v21  ;;  %v1466_v26 = vmul.f32 1.442695, %v1452_v23  ;;  %v1950_v52 = vshrl.u32 %v1757_v24, 16  ;;  %v1953_v53 = vshll.u32 %v1757_v24, 16 }
 0x6db   : > { %v1755_v29 = vpop.permute.xlu0 %1754  ;;  %v1476_v22 = vsel %vm1420_vm6, %v5413_v25, 0.0  ;;  %v1948_v21 = vor.u32 %v1947_v9, %v1944_v2  ;;  %v2030_v24 = vor.u32 %v2029_v20, %v2026_v19  ;;  %v1766_v9 = vrot.slane %v1764_v62, 5 }
 0x6dc   : > { %3775 = vpow2.f32 %v1466_v26  ;;  %1477 = vadd.xlane.f32.xlu0 %v1476_v22  ;;  %v1868_v46 = vshrl.u32 %v1755_v29, 16  ;;  %v1871_v47 = vshll.u32 %v1755_v29, 16  ;;  %v1952_v5 = vrot.slane %v1950_v52, 4 }
 0x6dd   : > { %v1759_v30 = vpop.permute.xlu1 %1758  ;;  %v1955_v6 = vrot.slane %v1953_v53, 5 }
 0x6de   : > { %v5419_v33 = vpop.eup %3767  ;;  %v1870_v54 = vrot.slane %v1868_v46, 4  ;;  %v1873_v55 = vrot.slane %v1871_v47, 5  ;;  %v2032_v56 = vshrl.u32 %v1759_v30, 16  ;;  %v2035_v8 = vshll.u32 %v1759_v30, 16 }
 0x6df   : > { %v1568_v32 = vpop.permute.xlu0 %1567  ;;  %v1479_v34 = vsel %vm1424_vm7, %v5419_v33, 0.0  ;;  %v5423_v35 = vpop.eup %3769  ;;  %v1956_v16 = vor.u32 %v1955_v6, %v1952_v5  ;;  %v1769_v5 = vshrl.u32 %v5447_v60, 16 }
 0x6e0   : > { %v1573_v36 = vand.u32 %v1568_v32, %v5417_v31  ;;  %1480 = vadd.xlane.f32.xlu0 %v1479_v34  ;;  %v1485_v40 = vsel %vm1424_vm7, %v5423_v35, 0.0  ;;  %v1874_v7 = vor.u32 %v1873_v55, %v1870_v54  ;;  %v2034_v17 = vrot.slane %v2032_v56, 4 }
 0x6e1   : > { %v1515_v37 = vpop.permute.xlu1 %1514  ;;  %v2037_v1 = vrot.slane %v2035_v8, 5  ;;  %v5464_v3 = vsel %vm1760_vm8, %v1948_v21, %v1956_v16  ;;  %v1761_v54 = vshrl.u32 %v5303_v0, 16  ;;  %v1846_v16 = vshll.u32 %v5341_v10, 16 }
 0x6e2   : > { %v5426_v38 = vpop.eup %3771  ;;  %v1524_v39 = vand.u32 %v5417_v31, %v1515_v37  ;;  %3402 = vmatpush3.bf16.msra.mxu0 %v1573_v36  ;;  %v5457_v18 = vsel %vm1760_vm8, %v1866_v15, %v1874_v7 }
 0x6e3   : > { %v1482_v41 = vsel %vm1420_vm6, %v5426_v38, 0.0  ;;  %3413 = vmatprep.subr.bf16.mxu0 %v4508_v58  ;;  %v2038_v23 = vor.u32 %v2037_v1, %v2034_v17  ;;  %v1763_v7 = vrot.slane %v1761_v54, 4 }
 0x6e4   : > { %v5434_v42 = vpop.eup %3773  ;;  %1486 = vadd.xlane.f32.xlu0 %v1485_v40  ;;  %1483 = vadd.xlane.f32.xlu1 %v1482_v41 }
 0x6e5   : > { %3396 = vmatpush3.bf16.msra.mxu1 %v1524_v39  ;;  %v1491_v45 = vsel %vm1424_vm7, %v5434_v42, 0.0  ;;  %v5469_v26 = vsel %vm1760_vm8, %v2030_v24, %v2038_v23  ;;  %v1617_v27 = vpop.permute.xlu1 %1616 }
 0x6e6   : > { %v5436_v43 = vpop.eup %3775  ;;  %3407 = vmatprep.subr.bf16.mxu1 %v4508_v58  ;;  %v1622_v40 = vand.u32 %v1617_v27, %v5417_v31 }
 0x6e7   : > { %v1488_v44 = vsel %vm1420_vm6, %v5436_v43, 0.0 }
 0x6e8   : > { %1489 = vadd.xlane.f32.xlu1 %v1488_v44  ;;  %1492 = vadd.xlane.f32.xlu0 %v1491_v45 }
 0x6e9   : > { %v1666_v28 = vpop.permute.xlu1 %1665 }
 0x6ea   : > { %v1671_v59 = vand.u32 %v1666_v28, %v5417_v31  ;;  %v1848_v28 = vrot.slane %v1846_v16, 5 }
 0x6ed   : > { %v1795_v29 = vpop.permute.xlu1 %1794 }
 0x6ee   : > { %v1800_v17 = vsel %vm1225_vm5, %v1795_v29, 0 }
 0x6f9   : > { %1747 = vrot.lane.b32.xlu1 %v5447_v60, %s4511_s4 }
 0x6fd   : > { %1749 = vrot.lane.b32.xlu1 %v5447_v60, %s4510_s1 }
 0x6fe   : > { %1876 = vrot.lane.b32.xlu0 %v5457_v18, %s4513_s3 }
 0x701   : > { %1751 = vrot.lane.b32.xlu1 %v5447_v60, %s4512_s19 }
 0x702   : > { %1958 = vrot.lane.b32.xlu0 %v5464_v3, %s4513_s3 }
 0x706   : > { %2040 = vrot.lane.b32.xlu0 %v5469_v26, %s4513_s3 }
 0x710   : > { %v1475_v22 = vpop.xlane.xlu0 %1474 }
 0x711   : > { %3777 = vrcp.f32 %v1475_v22 }
 0x71b   : > { %v3778_v32 = vpop.eup %3777 }
 0x71c   : > { %v1503_v36 = vmul.f32 %v3778_v32, %v5401_v57  ;;  %v1928_v32 = vshll.u32 %v5343_v12, 16 }
 0x71e   : > { %v1472_v30 = vpop.xlane.xlu1 %1471 }
 0x71f   : > { %3779 = vrcp.f32 %v1472_v30  ;;  %v1925_v30 = vshrl.u32 %v5343_v12, 16  ;;  %v2007_v12 = vshrl.u32 %v5355_v14, 16 }
 0x721   : > { %v2009_v54 = vrot.slane %v2007_v12, 4 }
 0x729   : > { %v3780_v34 = vpop.eup %3779 }
 0x72a   : > { %v1502_v37 = vmul.f32 %v3780_v34, %v5405_v61 }
 0x72c   : > { %v1510_v39 = vpack.c.bf16 %v1503_v36, %v1502_v37 }
 0x72e   : > { %3398 = vmatmul.mubr.msk.bf16.vlgmr.msra.gmra.mrb[4].mxu1 %vm1420_vm6, %v1510_v39 }
 0x72f   : > { %3408 = vmatpush3.bf16.msra.mxu1 %v1622_v40  ;;  %3409 = vmatprep.mubr.msk.bf16.mxu1 %vm4509_vm4, %v4508_v58 }
 0x730   : > { %3419 = vmatprep.subr.bf16.mxu1 %v4508_v58 }
 0x769   : > { %v1478_v41 = vpop.xlane.xlu0 %1477 }
 0x76a   : > { %3781 = vrcp.f32 %v1478_v41 }
 0x76d   : > { %v1481_v44 = vpop.xlane.xlu0 %1480 }
 0x76e   : > { %3783 = vrcp.f32 %v1481_v44 }
 0x771   : > { %v1487_v45 = vpop.xlane.xlu0 %1486  ;;  %v1484_v46 = vpop.xlane.xlu1 %1483 }
 0x772   : > { %3785 = vrcp.f32 %v1487_v45 }
 0x773   : > { %3787 = vrcp.f32 %v1484_v46  ;;  %v2010_v46 = vshll.u32 %v5355_v14, 16 }
 0x774   : > { %v3782_v47 = vpop.eup %3781 }
 0x775   : > { %v1493_v57 = vpop.xlane.xlu0 %1492  ;;  %v1490_v61 = vpop.xlane.xlu1 %1489  ;;  %v1504_v49 = vmul.f32 %v3782_v47, %v5413_v25  ;;  %v1772_v25 = vshll.u32 %v5447_v60, 16  ;;  %v1771_v60 = vrot.slane %v1769_v5, 4  ;;  %v2012_v14 = vrot.slane %v2010_v46, 5 }
 0x776   : > { %3789 = vrcp.f32 %v1493_v57  ;;  %v1927_v57 = vrot.slane %v1925_v30, 4 }
 0x777   : > { %3791 = vrcp.f32 %v1490_v61  ;;  %v1774_v15 = vrot.slane %v1772_v25, 5  ;;  %v1930_v61 = vrot.slane %v1928_v32, 5 }
 0x778   : > { %v3784_v48 = vpop.eup %3783 }
 0x779   : > { %v1505_v50 = vmul.f32 %v3784_v48, %v5419_v33  ;;  %v1748_v52 = vpop.permute.xlu1 %1747  ;;  %v1877_v6 = vpop.permute.xlu0 %1876  ;;  %v1775_v22 = vor.u32 %v1774_v15, %v1771_v60 }
 0x77a   : > { %v1851_v56 = vshrl.u32 %v1748_v52, 16  ;;  %v1854_v8 = vshll.u32 %v1748_v52, 16  ;;  %v1882_v29 = vsel %vm1225_vm5, %v1877_v6, 0 }
 0x77b   : > { %v1511_v53 = vpack.c.bf16 %v1505_v50, %v1504_v49 }
 0x77c   : > { %v3786_v55 = vpop.eup %3785  ;;  %v1853_v19 = vrot.slane %v1851_v56, 4  ;;  %v1856_v20 = vrot.slane %v1854_v8, 5 }
 0x77d   : > { %v3788_v63 = vpop.eup %3787  ;;  %v1507_v4 = vmul.f32 %v3786_v55, %v5423_v35  ;;  %3404 = vmatmul.mubr.msk.bf16.vlgmr.msra.gmra.mrb[16].mxu0 %vm1420_vm6, %v1511_v53  ;;  %v1750_v35 = vpop.permute.xlu1 %1749  ;;  %v1931_v55 = vor.u32 %v1930_v61, %v1927_v57 }
 0x77e   : > { %v1506_v33 = vmul.f32 %v3788_v63, %v5426_v38  ;;  %3414 = vmatpush3.bf16.msra.mxu0 %v1671_v59  ;;  %3415 = vmatprep.mubr.msk.bf16.mxu0 %vm4509_vm4, %v4508_v58  ;;  %v1843_v38 = vshrl.u32 %v5341_v10, 16  ;;  %v1959_v23 = vpop.permute.xlu0 %1958  ;;  %v1933_v24 = vshrl.u32 %v1750_v35, 16  ;;  %v1936_v27 = vshll.u32 %v1750_v35, 16 }
 0x77f   : > { %3425 = vmatprep.subr.bf16.mxu0 %v4508_v58  ;;  %v1857_v34 = vor.u32 %v1856_v20, %v1853_v19  ;;  %v1964_v45 = vsel %vm1225_vm5, %v1959_v23, 0  ;;  %v2013_v63 = vor.u32 %v2012_v14, %v2009_v54 }
 0x780   : > { %v3790_v0 = vpop.eup %3789  ;;  %v1512_v2 = vpack.c.bf16 %v1507_v4, %v1506_v33  ;;  %v1845_v10 = vrot.slane %v1843_v38, 4  ;;  %v1935_v37 = vrot.slane %v1933_v24, 4  ;;  %v1938_v39 = vrot.slane %v1936_v27, 5 }
 0x781   : > { %v3792_v11 = vpop.eup %3791  ;;  %v1509_v13 = vmul.f32 %v3790_v0, %v5434_v42  ;;  %v1767_v42 = vor.u32 %v1766_v9, %v1763_v7 }
 0x782   : > { %v1508_v1 = vmul.f32 %v3792_v11, %v5436_v43  ;;  %3410 = vmatmul.mubr.msk.bf16.vlgmr.msra.gmra.mrb[8].mxu1 %vm1420_vm6, %v1512_v2  ;;  %v1752_v43 = vpop.permute.xlu1 %1751  ;;  %v1849_v44 = vor.u32 %v1848_v28, %v1845_v10  ;;  %v2041_v47 = vpop.permute.xlu0 %2040  ;;  %v1939_v48 = vor.u32 %v1938_v39, %v1935_v37 }
 0x783   : > { %3420 = vmatpush3.bf16.xpose.msra.mxu1 %v1800_v17  ;;  %3421 = vmatprep.mubr.msk.bf16.mxu1 %vm4509_vm4, %v4508_v58  ;;  %v1776_v36 = vsel %vm1760_vm8, %v1767_v42, %v1775_v22  ;;  %v2015_v40 = vshrl.u32 %v1752_v43, 16  ;;  %v2018_v41 = vshll.u32 %v1752_v43, 16  ;;  %v2046_v53 = vsel %vm1225_vm5, %v2041_v47, 0 }
 0x784   : > { %v1513_v21 = vpack.c.bf16 %v1509_v13, %v1508_v1  ;;  %3431 = vmatprep.subr.bf16.mxu1 %v4508_v58  ;;  %v1858_v52 = vsel %vm1760_vm8, %v1849_v44, %v1857_v34  ;;  %v1940_v62 = vsel %vm1760_vm8, %v1931_v55, %v1939_v48 }
 0x785   : > { %v2017_v49 = vrot.slane %v2015_v40, 4  ;;  %v2020_v50 = vrot.slane %v2018_v41, 5 }
 0x786   : > { %3416 = vmatmul.mubr.msk.bf16.vlgmr.msra.gmra.mrb[20].mxu0 %vm1420_vm6, %v1513_v21 }
 0x787   : > { %3426 = vmatpush3.bf16.xpose.msra.mxu0 %v1882_v29  ;;  %3427 = vmatprep.mubr.msk.bf16.mxu0 %vm4509_vm4, %v4508_v58  ;;  %v2021_v59 = vor.u32 %v2020_v50, %v2017_v49 }
 0x788   : > { %3437 = vmatprep.subr.bf16.mxu0 %v4508_v58 }
 0x789   : > { %v2022_v4 = vsel %vm1760_vm8, %v2013_v63, %v2021_v59 }
 0x78a   : > { %3422 = vmatmul.mubr.msk.bf16.vlgmr.msra.gmra.mrb[12].mxu1 %vm1225_vm5, %v1776_v36 }
 0x78b   : > { %3432 = vmatpush3.bf16.xpose.msra.mxu1 %v1964_v45  ;;  %3433 = vmatprep.mubr.msk.bf16.mxu1 %vm4509_vm4, %v4508_v58 }
 0x78c   : > { %3443 = vmatprep.subr.bf16.mxu1 %v4508_v58 }
 0x78e   : > { %3428 = vmatmul.mubr.msk.bf16.vlgmr.msra.gmra.mrb[24].mxu0 %vm1225_vm5, %v1858_v52 }
 0x78f   : > { %3438 = vmatpush3.bf16.xpose.msra.mxu0 %v2046_v53  ;;  %3439 = vmatprep.mubr.msk.bf16.mxu0 %vm4509_vm4, %v4508_v58 }
 0x790   : > { %3449 = vmatprep.subr.bf16.mxu0 %v4508_v58 }
 0x792   : > { %3434 = vmatmul.mubr.msk.bf16.vlgmr.msra.gmra.mrb[16].mxu1 %vm1225_vm5, %v1940_v62 }
 0x793   : > { %3445 = vmatprep.mubr.msk.bf16.mxu1 %vm4509_vm4, %v4508_v58 }
 0x796   : > { %3440 = vmatmul.mubr.msk.bf16.vlgmr.msra.gmra.mrb[28].mxu0 %vm1225_vm5, %v2022_v4 }
 0x797   : > { %3451 = vmatprep.mubr.msk.bf16.mxu0 %vm4509_vm4, %v4508_v58 }
 0x801   : > { %v5531_v5 = vpop.f32.mrb[4].mxu1 }
 0x802   : > { %v3399_v25 = vpop.f32.mrb[5].mxu1 }
 0x803   : > { %v5533_v33 = vpop.f32.mrb[6].mxu1 }
 0x804   : > { %v3400_v6 = vpop.f32.mrb[7].mxu1 }
 0x850   : > { %v5535_v7 = vpop.f32.mrb[16].mxu0 }
 0x851   : > { %v3405_v0 = vpop.f32.mrb[17].mxu0 }
 0x852   : > { %v5537_v56 = vpop.f32.mrb[18].mxu0 }
 0x853   : > { %v3711_v8 = vpack.i.bf16 %v5535_v7, %v5537_v56  ;;  %v3406_v35 = vpop.f32.mrb[19].mxu0 }
 0x855   : > { %v5541_v2 = vpop.f32.mrb[8].mxu1 }
 0x856   : > { %v3411_v9 = vpop.f32.mrb[9].mxu1 }
 0x857   : > { %v5543_v11 = vpop.f32.mrb[10].mxu1 }
 0x858   : > { %v3721_v13 = vpack.i.bf16 %v5541_v2, %v5543_v11  ;;  %v3412_v60 = vpop.f32.mrb[11].mxu1 }
 0x859   : > { %v5547_v15 = vpop.f32.mrb[20].mxu0 }
 0x85a   : > { %v3417_v38 = vpop.f32.mrb[21].mxu0 }
 0x85b   : > { %v5549_v16 = vpop.f32.mrb[22].mxu0 }
 0x85c   : > { %v3736_v17 = vpack.i.bf16 %v5547_v15, %v5549_v16  ;;  %v3418_v1 = vpop.f32.mrb[23].mxu0 }
 0x85d   : > { %v1836_v19 = vpop.f32.mrb[12].mxu1 }
 0x85e   : > { %v3423_v20 = vpop.f32.mrb[13].mxu1  ;;  %v2089_v21 = vsel %vm1420_vm6, %v1836_v19, -inf }
 0x85f   : > { %2090 = vmax.xlane.f32.xlu0 %v2089_v21  ;;  %v1839_v42 = vpop.f32.mrb[14].mxu1 }
 0x860   : > { %v3424_v23 = vpop.f32.mrb[15].mxu1  ;;  %v2092_v24 = vsel %vm1424_vm7, %v1839_v42, -inf }
 0x861   : > { %2093 = vmax.xlane.f32.xlu1 %v2092_v24  ;;  %v1918_v27 = vpop.f32.mrb[24].mxu0 }
 0x862   : > { %v3429_v10 = vpop.f32.mrb[25].mxu0  ;;  %v2095_v28 = vsel %vm1420_vm6, %v1918_v27, -inf }
 0x863   : > { %2096 = vmax.xlane.f32.xlu0 %v2095_v28  ;;  %v1921_v29 = vpop.f32.mrb[26].mxu0 }
 0x864   : > { %v3430_v43 = vpop.f32.mrb[27].mxu0  ;;  %v2098_v32 = vsel %vm1424_vm7, %v1921_v29, -inf }
 0x865   : > { %v2000_v22 = vpop.f32.mrb[16].mxu1 }
 0x866   : > { %v3435_v30 = vpop.f32.mrb[17].mxu1  ;;  %v2101_v41 = vsel %vm1420_vm6, %v2000_v22, -inf }
 0x867   : > { %v2003_v34 = vpop.f32.mrb[18].mxu1  ;;  %2099 = vmax.xlane.f32.xlu0 %v2098_v32 }
 0x868   : > { %v3436_v36 = vpop.f32.mrb[19].mxu1  ;;  %v2104_v37 = vsel %vm1424_vm7, %v2003_v34, -inf }
 0x869   : > { %2105 = vmax.xlane.f32.xlu1 %v2104_v37  ;;  %v2082_v39 = vpop.f32.mrb[28].mxu0 }
 0x86a   : > { %v3441_v40 = vpop.f32.mrb[29].mxu0  ;;  %v2107_v46 = vsel %vm1420_vm6, %v2082_v39, -inf }
 0x86b   : > { %2102 = vmax.xlane.f32.xlu0 %v2101_v41  ;;  %v2085_v44 = vpop.f32.mrb[30].mxu0 }
 0x86c   : > { %v3442_v45 = vpop.f32.mrb[31].mxu0  ;;  %v2110_v12 = vsel %vm1424_vm7, %v2085_v44, -inf }
 0x86d   : > { %2111 = vmax.xlane.f32.xlu1 %v2110_v12 }
 0x86f   : > { %2108 = vmax.xlane.f32.xlu0 %v2107_v46 }
 0x8ec   : > { %v2091_v57 = vpop.xlane.xlu0 %2090 }
 0x8ed   : > { %v2113_v61 = vsub.f32 %v1836_v19, %v2091_v57 }
 0x8ee   : > { %v2094_v47 = vpop.xlane.xlu1 %2093 }
 0x8ef   : > { %v2121_v48 = vmul.f32 1.442695, %v2113_v61  ;;  %v2114_v49 = vsub.f32 %v1839_v42, %v2094_v47 }
 0x8f0   : > { %v2097_v50 = vpop.xlane.xlu0 %2096 }
 0x8f1   : > { %3793 = vpow2.f32 %v2121_v48  ;;  %v2123_v52 = vmul.f32 1.442695, %v2114_v49  ;;  %v2115_v53 = vsub.f32 %v1918_v27, %v2097_v50 }
 0x8f3   : > { %3795 = vpow2.f32 %v2123_v52  ;;  %v2125_v54 = vmul.f32 1.442695, %v2115_v53 }
 0x8f4   : > { %v2100_v14 = vpop.xlane.xlu0 %2099 }
 0x8f5   : > { %3797 = vpow2.f32 %v2125_v54  ;;  %v2116_v55 = vsub.f32 %v1921_v29, %v2100_v14 }
 0x8f6   : > { %v2106_v59 = vpop.xlane.xlu1 %2105 }
 0x8f7   : > { %v2127_v62 = vmul.f32 1.442695, %v2116_v55  ;;  %v2118_v63 = vsub.f32 %v2003_v34, %v2106_v59 }
 0x8f8   : > { %v2103_v4 = vpop.xlane.xlu0 %2102 }
 0x8f9   : > { %3799 = vpow2.f32 %v2127_v62  ;;  %v2131_v25 = vmul.f32 1.442695, %v2118_v63  ;;  %v2117_v6 = vsub.f32 %v2000_v22, %v2103_v4 }
 0x8fa   : > { %v2112_v30 = vpop.xlane.xlu1 %2111 }
 0x8fb   : > { %v5561_v0 = vpop.eup %3793  ;;  %3801 = vpow2.f32 %v2131_v25  ;;  %v2129_v35 = vmul.f32 1.442695, %v2117_v6  ;;  %v2120_v32 = vsub.f32 %v2085_v44, %v2112_v30  ;;  %v3744_v30 = vld [vmem:[%s879_s29 + $0x8] sm:$0xff]  }
 0x8fc   : > { %v2109_v9 = vpop.xlane.xlu0 %2108  ;;  %v2137_v60 = vsel %vm1420_vm6, %v5561_v0, 0.0 }
 0x8fd   : > { %v3796_v38 = vpop.eup %3795  ;;  %3803 = vpow2.f32 %v2129_v35  ;;  %v2119_v1 = vsub.f32 %v2082_v39, %v2109_v9  ;;  %2138 = vadd.xlane.f32.xlu0 %v2137_v60  ;;  %v2135_v34 = vmul.f32 1.442695, %v2120_v32 }
 0x8fe   : > { %v2140_v19 = vsel %vm1424_vm7, %v3796_v38, 0.0 }
 0x8ff   : > { %v3798_v20 = vpop.eup %3797  ;;  %v2133_v21 = vmul.f32 1.442695, %v2119_v1  ;;  %2141 = vadd.xlane.f32.xlu1 %v2140_v19 }
 0x900   : > { %v2143_v42 = vsel %vm1420_vm6, %v3798_v20, 0.0 }
 0x901   : > { %3805 = vpow2.f32 %v2133_v21  ;;  %2144 = vadd.xlane.f32.xlu0 %v2143_v42 }
 0x902   : > { %3807 = vpow2.f32 %v2135_v34 }
 0x903   : > { %v3800_v23 = vpop.eup %3799 }
 0x904   : > { %v2146_v24 = vsel %vm1424_vm7, %v3800_v23, 0.0 }
 0x905   : > { %v5568_v27 = vpop.eup %3801  ;;  %2147 = vadd.xlane.f32.xlu1 %v2146_v24 }
 0x906   : > { %v2152_v29 = vsel %vm1424_vm7, %v5568_v27, 0.0 }
 0x907   : > { %v3804_v10 = vpop.eup %3803 }
 0x908   : > { %v2149_v28 = vsel %vm1420_vm6, %v3804_v10, 0.0 }
 0x909   : > { %2150 = vadd.xlane.f32.xlu0 %v2149_v28  ;;  %2153 = vadd.xlane.f32.xlu1 %v2152_v29 }
 0x90b   : > { %v5573_v43 = vpop.eup %3805 }
 0x90c   : > { %v2155_v22 = vsel %vm1420_vm6, %v5573_v43, 0.0  ;;  %v3808_v36 = vpop.eup %3807 }
 0x90d   : > { %2156 = vadd.xlane.f32.xlu0 %v2155_v22  ;;  %v2158_v37 = vsel %vm1424_vm7, %v3808_v36, 0.0  ;;  %v3743_v22 = vld [vmem:[%s879_s29] sm:$0xff]  }
 0x91a   : > { %2230 = vrot.lane.b32.xlu1 %v5457_v18, %s4514_s11 }
 0x91e   : > { %2279 = vrot.lane.b32.xlu1 %v5464_v3, %s4514_s11 }
 0x923   : > { %2181 = vrot.lane.b32.xlu0 %v5397_v51, %s4514_s11 }
 0x927   : > { %3712 = vrot.lane.b32.xlu0 %v3711_v8, %s4516_s13 }
 0x942   : > { %2159 = vadd.xlane.f32.xlu1 %v2158_v37 }
 0x953   : > { %2328 = vrot.lane.b32.xlu1 %v5469_v26, %s4514_s11 }
 0x98a   : > { %v2139_v18 = vpop.xlane.xlu0 %2138 }
 0x98c   : > { %v2142_v3 = vpop.xlane.xlu1 %2141 }
 0x98d   : > { %3809 = vrcp.f32 %v2142_v3 }
 0x98e   : > { %v2145_v51 = vpop.xlane.xlu0 %2144 }
 0x98f   : > { %3811 = vrcp.f32 %v2145_v51 }
 0x990   : > { %3813 = vrcp.f32 %v2139_v18 }
 0x992   : > { %v2148_v39 = vpop.xlane.xlu1 %2147 }
 0x993   : > { %3815 = vrcp.f32 %v2148_v39 }
 0x996   : > { %v2151_v7 = vpop.xlane.xlu0 %2150  ;;  %v2154_v56 = vpop.xlane.xlu1 %2153 }
 0x997   : > { %3817 = vrcp.f32 %v2151_v7  ;;  %v3810_v8 = vpop.eup %3809 }
 0x998   : > { %3819 = vrcp.f32 %v2154_v56  ;;  %v2170_v46 = vmul.f32 %v3810_v8, %v3796_v38 }
 0x999   : > { %v3812_v44 = vpop.eup %3811 }
 0x99a   : > { %v2157_v40 = vpop.xlane.xlu0 %2156  ;;  %v2231_v41 = vpop.permute.xlu1 %2230  ;;  %v2171_v57 = vmul.f32 %v3812_v44, %v3798_v20 }
 0x99b   : > { %v2236_v45 = vand.u32 %v2231_v41, %v5417_v31  ;;  %v3814_v12 = vpop.eup %3813  ;;  %3821 = vrcp.f32 %v2157_v40 }
 0x99c   : > { %v2169_v49 = vmul.f32 %v3814_v12, %v5561_v0 }
 0x99d   : > { %v3816_v26 = vpop.eup %3815  ;;  %3450 = vmatpush3.bf16.msra.mxu0 %v2236_v45 }
 0x99e   : > { %v2172_v61 = vmul.f32 %v3816_v26, %v3800_v23  ;;  %v2182_v47 = vpop.permute.xlu0 %2181  ;;  %3461 = vmatprep.subr.bf16.mxu0 %v4508_v58  ;;  %v2280_v50 = vpop.permute.xlu1 %2279  ;;  %v2177_v54 = vpack.c.bf16 %v2170_v46, %v2169_v49 }
 0x99f   : > { %v2187_v48 = vand.u32 %v2182_v47, %v5417_v31  ;;  %v2285_v55 = vand.u32 %v2280_v50, %v5417_v31 }
 0x9a0   : > { %v2178_v52 = vpack.c.bf16 %v2172_v61, %v2171_v57 }
 0x9a1   : > { %3444 = vmatpush3.bf16.msra.mxu1 %v2187_v48  ;;  %v3818_v53 = vpop.eup %3817 }
 0x9a2   : > { %3452 = vmatmul.mubr.msk.bf16.vlgmr.msra.gmra.mrb[32].mxu0 %vm1420_vm6, %v2178_v52  ;;  %3455 = vmatprep.subr.bf16.mxu1 %v4508_v58  ;;  %v3820_v14 = vpop.eup %3819  ;;  %v2173_v59 = vmul.f32 %v3818_v53, %v3804_v10  ;;  %v3713_v11 = vpop.permute.xlu0 %3712 }
 0x9a3   : > { %3463 = vmatprep.mubr.msk.bf16.mxu0 %vm4509_vm4, %v4508_v58  ;;  %v2174_v62 = vmul.f32 %v3820_v14, %v5568_v27  ;;  %v3715_v8 = vunpack.i.h.bf16 %v3713_v11  ;;  %v3714_v40 = vunpack.i.l.bf16 %v3713_v11 }
 0x9a4   : > { %3446 = vmatmul.mubr.msk.bf16.vlgmr.msra.gmra.mrb[20].mxu1 %vm1420_vm6, %v2177_v54 }
 0x9a5   : > { %3456 = vmatpush3.bf16.msra.mxu1 %v2285_v55  ;;  %3457 = vmatprep.mubr.msk.bf16.mxu1 %vm4509_vm4, %v4508_v58  ;;  %v2179_v63 = vpack.c.bf16 %v2174_v62, %v2173_v59  ;;  %v3822_v0 = vpop.eup %3821  ;;  %v1738_v50 = vsel %vm1225_vm5, %v5531_v5, %v3715_v8  ;;  %v1739_v52 = vsel %vm1225_vm5, %v5533_v33, %v3714_v40  ;;  %v3270_v5 = vld [vmem:[%s887_s14] ss:$0 sm:$0xff]  ;;  %v3749_v8 = vld [vmem:[%s5256_s26 + $0x10] sm:$0xff]  }
 0x9a6   : > { %v2175_v9 = vmul.f32 %v3822_v0, %v5573_v43  ;;  %3467 = vmatprep.subr.bf16.mxu1 %v3743_v22  ;;  %v3750_v40 = vld [vmem:[%s5256_s26 + $0x18] sm:$0xff]  }
 0x9ac   : > { %3458 = vmatmul.mubr.msk.bf16.vlgmr.msra.gmra.mrb[24].mxu1 %vm1420_vm6, %v2179_v63 }
 0x9ad   : > { %3468 = vmatpush3.bf16.msra.mxu1 %v3743_v22 }
 0x9ae   : > { %3469 = vmatprep.subr.bf16.mxu1 %v3744_v30 }
 0x9b1   : > { %3470 = vmatpush3.bf16.msra.mxu1 %v3744_v30 }
 0x9cf   : > { %v2160_v4 = vpop.xlane.xlu1 %2159 }
 0x9d0   : > { %3823 = vrcp.f32 %v2160_v4 }
 0x9d3   : > { %v2329_v25 = vpop.permute.xlu1 %2328 }
 0x9d4   : > { %v2334_v6 = vand.u32 %v2329_v25, %v5417_v31 }
 0x9d6   : > { %3462 = vmatpush3.bf16.msra.mxu0 %v2334_v6 }
 0x9da   : > { %v3824_v35 = vpop.eup %3823 }
 0x9db   : > { %v2176_v60 = vmul.f32 %v3824_v35, %v3808_v36 }
 0x9dd   : > { %v2180_v38 = vpack.c.bf16 %v2176_v60, %v2175_v9 }
 0x9df   : > { %3464 = vmatmul.mubr.msk.bf16.vlgmr.msra.gmra.mrb[36].mxu0 %vm1420_vm6, %v2180_v38 }
 0xa75   : > { %v2272_v58 = vpop.f32.mrb[32].mxu0 }
 0xa76   : > { %v3453_v1 = vpop.f32.mrb[33].mxu0 }
 0xa77   : > { %v2223_v19 = vpop.f32.mrb[20].mxu1  ;;  %v2275_v20 = vpop.f32.mrb[34].mxu0  ;;  %v3831_v1 = vld [vmem:[#allocation2] sm:$0xff] }
 0xa78   : > { %v3716_v21 = vpack.i.bf16 %v2275_v20, %v2272_v58  ;;  %v3447_v42 = vpop.f32.mrb[21].mxu1  ;;  %v3454_v23 = vpop.f32.mrb[35].mxu0 }
 0xa79   : > { %v2226_v24 = vpop.f32.mrb[22].mxu1  ;;  %v3833_v23 = vld [vmem:[#allocation2 + $0x10] sm:$0x3] }
 0xa7a   : > { %v3448_v31 = vpop.f32.mrb[23].mxu1  ;;  %3717 = vrot.lane.b32.xlu0 %v3716_v21, %s4516_s13  ;;  %v3832_v21 = vld [vmem:[#allocation2 + $0x8] sm:$0xff] }
 0xa7e   : > { %3722 = vrot.lane.b32.xlu0 %v3721_v13, %s4517_s9 }
 0xa7f   : > { %v2321_v27 = vpop.f32.mrb[24].mxu1 }
 0xa80   : > { %v3459_v10 = vpop.f32.mrb[25].mxu1 }
 0xa81   : > { %v2324_v28 = vpop.f32.mrb[26].mxu1 }
 0xa82   : > { %v3726_v29 = vpack.i.bf16 %v2324_v28, %v2321_v27  ;;  %v3460_v43 = vpop.f32.mrb[27].mxu1 }
 0xa84   : > { %3727 = vrot.lane.b32.xlu1 %v3726_v29, %s4517_s9 }
 0xab2   : > { %v2370_v32 = vpop.f32.mrb[36].mxu0 }
 0xab3   : > { %v3465_v34 = vpop.f32.mrb[37].mxu0 }
 0xab4   : > { %v2373_v36 = vpop.f32.mrb[38].mxu0 }
 0xab5   : > { %v3731_v37 = vpack.i.bf16 %v2373_v36, %v2370_v32  ;;  %v3466_v2 = vpop.f32.mrb[39].mxu0 }
 0xab7   : > { %3732 = vrot.lane.b32.xlu1 %v3731_v37, %s4518_s8 }
 0xabb   : > { %3737 = vrot.lane.b32.xlu1 %v3736_v17, %s4518_s8 }
 0xaec   : > { %v3718_v13 = vpop.permute.xlu0 %3717 }
 0xaed   : > { %v3720_v3 = vunpack.i.h.bf16 %v3718_v13  ;;  %v3719_v51 = vunpack.i.l.bf16 %v3718_v13 }
 0xaef   : > { %v2402_v44 = vsel %vm1225_vm5, %v2226_v24, %v3720_v3  ;;  %v2401_v45 = vsel %vm1225_vm5, %v2223_v19, %v3719_v51  ;;  %v3745_v51 = vld [vmem:[%s912_s18] sm:$0xff]  }
 0xaf0   : > { %v3723_v56 = vpop.permute.xlu0 %3722  ;;  %3475 = vmatprep.subr.bf16.mxu0 %v3745_v51 }
 0xaf1   : > { %v3725_v16 = vunpack.i.h.bf16 %v3723_v56  ;;  %v3724_v17 = vunpack.i.l.bf16 %v3723_v56  ;;  %3476 = vmatpush3.bf16.msra.mxu0 %v3745_v51  ;;  %v3748_v56 = vld [vmem:[%s5256_s26 + $0x8] sm:$0xff]  }
 0xaf3   : > { %v1741_v14 = vsel %vm1740_vm11, %v1738_v50, %v3725_v16  ;;  %v1742_v55 = vsel %vm1740_vm11, %v1739_v52, %v3724_v17 }
 0xaf6   : > { %v3728_v18 = vpop.permute.xlu1 %3727 }
 0xaf7   : > { %v3730_v39 = vunpack.i.h.bf16 %v3728_v18  ;;  %v3729_v7 = vunpack.i.l.bf16 %v3728_v18 }
 0xaf9   : > { %v2403_v26 = vsel %vm1740_vm11, %v2401_v45, %v3729_v7  ;;  %v2404_v46 = vsel %vm1740_vm11, %v2402_v44, %v3730_v39  ;;  %v3746_v39 = vld [vmem:[%s912_s18 + $0x8] sm:$0xff]  }
 0xafa   : > { %3477 = vmatprep.subr.bf16.mxu0 %v3746_v39  ;;  %v3747_v7 = vld [vmem:[%s5256_s26] sm:$0xff]   ;;  %v3752_v44 = vld [vmem:[%s5256_s26 + $0x28] sm:$0xff]  }
 0xafb   : > { %3478 = vmatpush3.bf16.msra.mxu0 %v3746_v39  ;;  %3483 = vmatprep.subr.bf16.mxu1 %v3747_v7 }
 0xb29   : > { %v3733_v41 = vpop.permute.xlu1 %3732 }
 0xb2a   : > { %v3735_v12 = vunpack.i.h.bf16 %v3733_v41  ;;  %v3734_v15 = vunpack.i.l.bf16 %v3733_v41  ;;  %v3751_v41 = vld [vmem:[%s5256_s26 + $0x20] sm:$0xff]  }
 0xb2c   : > { %v2406_v57 = vsel %vm1743_vm12, %v2404_v46, %v3735_v12  ;;  %v2405_v61 = vsel %vm1743_vm12, %v2403_v26, %v3734_v15 }
 0xb2d   : > { %v2411_v47 = vrot.slane %v2406_v57, 7  ;;  %v2410_v48 = vrot.slane %v2405_v61, 7  ;;  %v3738_v49 = vpop.permute.xlu1 %3737 }
 0xb2e   : > { %v3740_v53 = vunpack.i.h.bf16 %v3738_v49  ;;  %v3739_v54 = vunpack.i.l.bf16 %v3738_v49  ;;  %v3275_v49 = vld [vmem:[%s895_s25] ss:$0 sm:$0xff] }
 0xb2f   : > { %v2412_v59 = vsel %vm2409_vm13, %v2410_v48, %v2411_v47 }
 0xb30   : > { %v1744_v62 = vsel %vm1743_vm12, %v1741_v14, %v3740_v53  ;;  %v1745_v63 = vsel %vm1743_vm12, %v1742_v55, %v3739_v54  ;;  %v2417_v6 = vpack.c.bf16 %v2412_v59, %v2412_v59  ;;  %v3276_v59 = vld [vmem:[%s903_s23] ss:$0 sm:$0xff] }
 0xb31   : > { %v2415_v4 = vsel %vm2409_vm13, %v1745_v63, %v2410_v48 }
 0xb32   : > { %v2416_v25 = vpack.c.bf16 %v2415_v4, %v1744_v62 }
 0xb34   : > { %3471 = vmatprep.mubr.msk.bf16.mxu1 %vm1070_vm2, %v2416_v25 }
 0xb35   : > { %3472 = vmatmul.mubr.msk.bf16.vlgmr.msra.gmra.mrb[28].mxu1 %vm1070_vm2, %v2417_v6 }
 0xb36   : > { %3484 = vmatpush3.bf16.msra.mxu1 %v3747_v7  ;;  %v3834_v7 = vld [vmem:[#allocation29] sm:$0xff] (!%p3291_p6)  }
 0xb37   : > { %3485 = vmatprep.subr.bf16.mxu1 %v3748_v56 }
 0xb3a   : > { %3486 = vmatpush3.bf16.msra.mxu1 %v3748_v56  ;;  %v4519_v56 = vmov (!%p3291_p6), 0.0  }
 0xb3b   : > { %3487 = vmatprep.subr.bf16.mxu1 %v3749_v8  ;;  %3503 = vmatprep.subr.bf16.mxu0 (!%p3291_p6), %v4519_v56 }
 0xb3e   : > { %3488 = vmatpush3.bf16.msra.mxu1 %v3749_v8  ;;  %v3835_v8 = vld [vmem:[#allocation29 + $0x8] sm:$0xff] (!%p3291_p6)  }
 0xb3f   : > { %3489 = vmatprep.subr.bf16.mxu1 %v3750_v40 }
 0xb42   : > { %3490 = vmatpush3.bf16.msra.mxu1 %v3750_v40 }
 0xb43   : > { %3491 = vmatprep.subr.bf16.mxu1 %v3751_v41 }
 0xb46   : > { %3492 = vmatpush3.bf16.msra.mxu1 %v3751_v41 }
 0xb47   : > { %3493 = vmatprep.subr.bf16.mxu1 %v3752_v44 }
 0xb4a   : > { %3494 = vmatpush3.bf16.msra.mxu1 %v3752_v44 }
 0xc08   : > { %v3473_v33 = vpop.f32.mrb[28].mxu1 }
 0xc09   : > { %v2481_v0 = vpop.f32.mrb[29].mxu1  ;;  %v2490_v35 = vadd.f32 %v3473_v33, %v3270_v5  ;;  %v3753_v33 = vld [vmem:[%s5256_s26 + $0x30] sm:$0xff]  }
 0xc0a   : > { %v2482_v9 = vadd.f32 %v3270_v5, %v2481_v0  ;;  %v3474_v60 = vpop.f32.mrb[30].mxu1  ;;  %3495 = vmatprep.subr.bf16.mxu1 %v3753_v33  ;;  %v3754_v0 = vld [vmem:[%s5256_s26 + $0x38] sm:$0xff]  }
 0xc0b   : > { %v2484_v38 = vpop.f32.mrb[31].mxu1  ;;  %v2497_v24 = vadd.f32 %v3833_v23, %v2490_v35  ;;  %3496 = vmatpush3.bf16.msra.mxu1 %v3753_v33  ;;  %v3277_v35 = vld [vmem:[%s920_s27] ss:$0 sm:$0xff] }
 0xc0c   : > { %v2485_v58 = vadd.f32 %v3270_v5, %v2484_v38  ;;  %v2495_v19 = vadd.f32 %v3831_v1, %v2482_v9  ;;  %3497 = vmatprep.subr.bf16.mxu1 %v3754_v0 }
 0xc0d   : > { %v2506_v27 = vsel %vm1077_vm3, %v2497_v24, 0.0 }
 0xc0e   : > { %v2500_v20 = vsel %vm1070_vm2, %v2495_v19, 0.0  ;;  %v2496_v42 = vadd.f32 %v3832_v21, %v2485_v58 }
 0xc0f   : > { %2501 = vadd.xlane.f32.xlu0 %v2500_v20  ;;  %3498 = vmatpush3.bf16.msra.mxu1 %v3754_v0 }
 0xc10   : > { %v2503_v31 = vsel %vm1070_vm2, %v2496_v42, 0.0 }
 0xc11   : > { %2504 = vadd.xlane.f32.xlu1 %v2503_v31 }
 0xc13   : > { %2507 = vadd.xlane.f32.xlu0 %v2506_v27 }
 0xc9c   : > { %v2502_v10 = vpop.xlane.xlu0 %2501 }
 0xc9d   : > { %v2509_v28 = vmul.f32 0.03125, %v2502_v10  ;;  %v3290_v10 = vld [vmem:[%s937_s7] ss:$0 sm:$0xff] }
 0xc9e   : > { %v2505_v29 = vpop.xlane.xlu1 %2504 }
 0xc9f   : > { %v2512_v43 = vsub.f32 %v2495_v19, %v2509_v28  ;;  %v2510_v22 = vmul.f32 0.03125, %v2505_v29 }
 0xca0   : > { %v2508_v30 = vpop.xlane.xlu0 %2507 }
 0xca1   : > { %v2513_v32 = vsub.f32 %v2496_v42, %v2510_v22  ;;  %v2511_v34 = vmul.f32 0.03125, %v2508_v30  ;;  %v2515_v36 = vmul.f32 %v2512_v43, %v2512_v43 }
 0xca3   : > { %v2514_v37 = vsub.f32 %v2497_v24, %v2511_v34  ;;  %v2518_v2 = vsel %vm1070_vm2, %v2515_v36, 0.0  ;;  %v2516_v11 = vmul.f32 %v2513_v32, %v2513_v32 }
 0xca4   : > { %2519 = vadd.xlane.f32.xlu0 %v2518_v2 }
 0xca5   : > { %v2517_v13 = vmul.f32 %v2514_v37, %v2514_v37  ;;  %v2521_v18 = vsel %vm1070_vm2, %v2516_v11, 0.0 }
 0xca7   : > { %v2524_v3 = vsel %vm1077_vm3, %v2517_v13, 0.0 }
 0xca8   : > { %2522 = vadd.xlane.f32.xlu0 %v2521_v18  ;;  %2525 = vadd.xlane.f32.xlu1 %v2524_v3 }
 0xd31   : > { %v2520_v45 = vpop.xlane.xlu0 %2519 }
 0xd32   : > { %v2527_v12 = vmul.f32 0.03125, %v2520_v45 }
 0xd34   : > { %v2530_v15 = vadd.f32 1e-05, %v2527_v12  ;;  %v3292_v12 = vld [vmem:[#allocation26] ss:$0 sm:$0xff] (!%p3291_p6) }
 0xd35   : > { %v2526_v16 = vpop.xlane.xlu1 %2525  ;;  %v2523_v17 = vpop.xlane.xlu0 %2522 }
 0xd36   : > { %3825 = vrsqrt.f32 %v2530_v15  ;;  %v2529_v26 = vmul.f32 0.03125, %v2526_v16  ;;  %v2528_v46 = vmul.f32 0.03125, %v2523_v17  ;;  %v3293_v16 = vld [vmem:[#allocation27] ss:$0 sm:$0xff] (!%p3291_p6) }
 0xd38   : > { %v2532_v57 = vadd.f32 1e-05, %v2529_v26  ;;  %v2531_v61 = vadd.f32 1e-05, %v2528_v46 }
 0xd3a   : > { %3827 = vrsqrt.f32 %v2532_v57  ;;  %v3294_v57 = vld [vmem:[#allocation30] ss:$0 sm:$0xff] (!%p3291_p6) }
 0xd3b   : > { %3829 = vrsqrt.f32 %v2531_v61 }
 0xd40   : > { %v3826_v47 = vpop.eup %3825 }
 0xd41   : > { %v2536_v48 = vmul.f32 %v3826_v47, %v2512_v43 }
 0xd43   : > { %v2545_v14 = vmul.f32 %v3275_v49, %v2536_v48 }
 0xd44   : > { %v3828_v50 = vpop.eup %3827 }
 0xd45   : > { %v3830_v52 = vpop.eup %3829  ;;  %v2538_v53 = vmul.f32 %v3828_v50, %v2514_v37  ;;  %v2554_v4 = vadd.f32 %v3276_v59, %v2545_v14 }
 0xd46   : > { %v2537_v54 = vmul.f32 %v3830_v52, %v2513_v32 }
 0xd47   : > { %v2547_v55 = vmul.f32 %v3275_v49, %v2538_v53 }
 0xd48   : > { %v2546_v62 = vmul.f32 %v3275_v49, %v2537_v54 }
 0xd49   : > { %v2556_v63 = vadd.f32 %v3276_v59, %v2547_v55 }
 0xd4a   : > { %v2555_v25 = vadd.f32 %v3276_v59, %v2546_v62 }
 0xd4b   : > { %v2558_v6 = vpack.c.bf16 %v2556_v63, %v2556_v63 }
 0xd4c   : > { %v2557_v5 = vpack.c.bf16 %v2555_v25, %v2554_v4 }
 0xd4e   : > { %3479 = vmatprep.mubr.msk.bf16.mxu0 %vm1070_vm2, %v2557_v5 }
 0xd4f   : > { %3480 = vmatmul.mubr.msk.bf16.vlgmr.msra.gmra.mrb[40].mxu0 %vm1070_vm2, %v2558_v6 }
 0xd50   : > { %3507 = vmatprep.mubr.msk.bf16.mxu0 (!%p3291_p6), %vm4520_vm14, %v4519_v56  ;;  %3504 = vmatpush3.bf16.msra.mxu0 (!%p3291_p6), %v3834_v7 }
 0xd51   : > { %3505 = vmatprep.subr.bf16.mxu0 (!%p3291_p6), %v4519_v56 }
 0xd54   : > { %3506 = vmatpush3.bf16.msra.mxu0 (!%p3291_p6), %v3835_v8 }
 0xe22   : > { %v3481_v9 = vpop.f32.mrb[40].mxu0 }
 0xe23   : > { %v2631_v60 = vadd.f32 %v3481_v9, %v3277_v35  ;;  %v2622_v38 = vpop.f32.mrb[41].mxu0 }
 0xe24   : > { %v2623_v58 = vadd.f32 %v3277_v35, %v2622_v38  ;;  %v3482_v1 = vpop.f32.mrb[42].mxu0 }
 0xe25   : > { %v2625_v19 = vpop.f32.mrb[43].mxu0  ;;  %v2638_v21 = vmax.f32 %v2631_v60, 0.0 }
 0xe26   : > { %v2626_v20 = vadd.f32 %v3277_v35, %v2625_v19  ;;  %v2636_v42 = vmax.f32 %v2623_v58, 0.0 }
 0xe27   : > { %v2640_v31 = vpack.c.bf16 %v2638_v21, %v2638_v21 }
 0xe28   : > { %v2637_v23 = vmax.f32 %v2626_v20, 0.0 }
 0xe2a   : > { %v2639_v24 = vpack.c.bf16 %v2637_v23, %v2636_v42 }
 0xe2c   : > { %3499 = vmatprep.mubr.bf16.mxu1 %v2639_v24 }
 0xe2d   : > { %3500 = vmatmul.mubr.bf16.vlgmr.msra.gmra.mrb[32].mxu1 %v2640_v31 }
 0xf00   : > { %v3501_v27 = vpop.f32.mrb[32].mxu1 }
 0xf01   : > { %v2755_v28 = vadd.f32 %v3501_v27, %v2556_v63  ;;  %v2739_v29 = vpop.f32.mrb[33].mxu1 }
 0xf02   : > { %v2753_v43 = vadd.f32 %v2739_v29, %v2554_v4  ;;  %v3502_v22 = vpop.f32.mrb[34].mxu1  ;;  %2772 = sbr.rel (%p3291_p6) target bundleno = 4379 (0x111b), region = 172 }
 0xf03   : > { %v2765_v30 = vadd.f32 %v3290_v10, %v2755_v28  ;;  %v2742_v32 = vpop.f32.mrb[35].mxu1 }
 0xf04   : > { %v2763_v34 = vadd.f32 %v3290_v10, %v2753_v43  ;;  %v2754_v36 = vadd.f32 %v2742_v32, %v2555_v25 }
 0xf05   : > { %2768 = vst.msk [vmem:[#allocation2 + $0x10] sm:$0x3] %vm1077_vm3, %v2765_v30 }
 0xf06   : > { %2766 = vst.msk [vmem:[#allocation2] sm:$0xff] %vm1070_vm2, %v2763_v34  ;;  %v2764_v37 = vadd.f32 %v3290_v10, %v2754_v36 }
 0xf08   : > { %2767 = vst.msk [vmem:[#allocation2 + $0x8] sm:$0xff] %vm1070_vm2, %v2764_v37  ;;  %v2773_v2 = vsel (!%p3291_p6), %vm2409_vm13, %v2763_v34, %v2764_v37 }
 0xf09   : > { %v2776_v11 = vsel %vm1077_vm3, %v2773_v2, 0.0 }
 0xf0a   : > { %2777 = vadd.xlane.f32.xlu0 %v2776_v11 }
 0xf97   : > { %v2778_v13 = vpop.xlane.xlu0 %2777 }
 0xf98   : > { %v2779_v18 = vmul.f32 0.03125, %v2778_v13 }
 0xf9a   : > { %v2780_v3 = vsub.f32 %v2773_v2, %v2779_v18 }
 0xf9c   : > { %v2781_v51 = vmul.f32 %v2780_v3, %v2780_v3 }
 0xf9e   : > { %v2782_v39 = vsel %vm1077_vm3, %v2781_v51, 0.0 }
 0xf9f   : > { %2783 = vadd.xlane.f32.xlu0 %v2782_v39 }
0x102c   : > { %v2784_v40 = vpop.xlane.xlu0 %2783 }
0x102d   : > { %v2785_v41 = vmul.f32 0.03125, %v2784_v40 }
0x102f   : > { %v2786_v44 = vadd.f32 1e-05, %v2785_v41 }
0x1031   : > { %3836 = vrsqrt.f32 %v2786_v44 }
0x103b   : > { %v3837_v45 = vpop.eup %3836 }
0x103c   : > { %v2788_v15 = vmul.f32 %v3837_v45, %v2780_v3 }
0x103e   : > { %v2795_v17 = vmul.f32 %v3292_v12, %v2788_v15 }
0x1040   : > { %v2802_v26 = vadd.f32 %v3293_v16, %v2795_v17 }
0x1042   : > { %v2803_v46 = vpack.c.bf16 %v2802_v26, %v2802_v26 }
0x1044   : > { %3508 = vmatmul.mubr.msk.bf16.vlgmr.msra.gmra.mrb[0].mxu0 %vm1070_vm2, %v2803_v46 }
0x1117   : > { %v2864_v61 = vpop.f32.mrb[0].mxu0 }
0x1118   : > { %v2865_v47 = vadd.f32 %v3294_v57, %v2864_v61  ;;  %v3509_v48 = vpop.f32.mrb[1].mxu0 }
0x1119   : > { %v2867_v49 = vpop.f32.mrb[2].mxu0 }
0x111a   : > { %2870 = vst [vmem:[#allocation32] sm:$0x3] %v2865_v47  ;;  %v3510_v50 = vpop.f32.mrb[3].mxu0 }
0x111b PF: > { %s5865_s2 = sld [smem:[#allocation49_spill]]  ;;  %s4521_s29 = smov [#allocation32]  }
0x111c   : > { %s2880_s14 = sshll.u32 %s4521_s29, 4  ;;  %s2881_s14 = int_to_ptr.vmem [resolvable:$true] %s2880_s14 }
0x111d   : > { %s4364_s25 = scalar_lea.vmem %s2881_s14, 32  ;;  %p4371_p4 = scmp.lt.s32.totalorder %s2881_s14, %s2881_s14 }
0x111e   : > { %p4365_p12 = scmp.ne.s32.totalorder %s2881_s14, %s4364_s25  ;;  %p4372_p7 = scmp.lt.s32.totalorder %s4364_s25, %s4364_s25 }
0x1120   : > { %p4373_p9 = por %p4372_p7, %p4371_p4 }
0x1121   : > { %p3636_p1 = scmp.eq.s32.totalorder %s5865_s2, 1 }
0x1123   : > { %p4366_p8 = pnand %p4365_p12, %p3636_p1 }
0x1125   : > { %p4367_p3 = pneg %p4366_p8 }
0x1127   : > { %p4374_p13 = pnand %p4373_p9, %p4367_p3 }
0x1129   : > { %4377 = shalt.err (!%p4374_p13)
}
0x112a   : > { %s5866_s10 = sld [smem:[#allocation70_spill]] }
0x1130   : > { %s4378_s27 = scalar_lea.hbm %s5866_s10, 32 }
0x1131   : > { %p4379_p0 = scmp.ne.s32.totalorder %s5866_s10, %s4378_s27  ;;  %p4384_p2 = scmp.lt.u32.totalorder %s4378_s27, %s5866_s10 }
0x1133   : > { %p4380_p11 = pnand %p4379_p0, %p3636_p1 }
0x1135   : > { %p4381_p10 = pneg %p4380_p11 }
0x1137   : > { %p4386_p5 = pnand %p4384_p2, %p4381_p10 }
0x1139   : > { %4389 = shalt.err (!%p4386_p5)
}
0x113a   : > { %3562 = dma.vmem_to_hbm [thread:$0]  (%p3636_p1), %s2881_s14, 32, %s5866_s10, [#allocation5]  }
0x113b   : > { %4459 = dma.done.wait (%p3636_p1), [#allocation5], 32  }
0x113c   : > { %4461 = vsyncadd (%p3636_p1), [#allocation5], 4294967264 }
0x113d PF: > { %s5867_s4 = sld [smem:[#allocation48_spill]]  ;;  %s5868_s27 = sld [smem:[#allocation45_spill]] }
0x113e   : > { %s5869_s28 = sld [smem:[#allocation46_spill]]  ;;  %s5870_s29 = sld [smem:[#allocation53_spill]] }
0x113f   : > { %s5871_s3 = sld [smem:[#allocation51_spill]]  ;;  %s5872_s30 = smov %s4480_s0 }
0x1143   : > { %s51_s19 = sadd.s32 1, %s5867_s4  }
0x1144   : > { %p48_p6 = scmp.ge.s32.totalorder %s51_s19, 4  }
0x1145   : > { %s5873_s0 = smov %s5871_s3 }
0x1146   :  { %50 = sbr.rel (!%p48_p6) target bundleno = 37 (0x25), region = 289 }
0x114d   :  { %2893 = vsyncpa [#allocation4], 1 }
0x114e   :  { %2895 = vsyncpa [#allocation4 + $0x1], 1 }
0x114f   :  { %2896 = vsyncpa [#allocation7], 1 }
0x1150   :  { %2897 = vsyncpa [#allocation10], 1 }
0x1151   :  { %2899 = vsyncpa [#allocation10 + $0x1], 1 }
0x1152   :  { %2900 = vsyncpa [#allocation13], 1 }
0x1153   :  { %2902 = vsyncpa [#allocation13 + $0x1], 1 }
0x1154   :  { %2903 = vsyncpa [#allocation16], 1 }
0x1155   :  { %2905 = vsyncpa [#allocation16 + $0x1], 1 }
0x1156   :  { %2906 = vsyncpa [#allocation19], 1 }
0x1157   :  { %2908 = vsyncpa [#allocation19 + $0x1], 1 }
0x1158   :  { %2909 = vsyncpa [#allocation22], 1 }
0x1159   :  { %2911 = vsyncpa [#allocation22 + $0x1], 1 }
0x115a   :  { %2912 = vsyncpa [#allocation25], 1 }
0x115b   :  { %2914 = vsyncpa [#allocation25 + $0x1], 1 }
0x115c   :  { %2915 = vsyncpa [#allocation28], 1 }
0x115d   :  { %2916 = vsyncpa [#allocation31], 1 }
0x115e   :  { %2917 = vsyncpa [#allocation5], 1 }
0x115f   :  { %2919 = vsyncpa [#allocation5 + $0x1], 1 }

</bundles_post_ra>
